<compile_context>
chip_gen: v6e
topology: v6e:2x2x1
jax: 0.10.0
libtpu: 0.0.40
codegen_flags: <defaults>
</compile_context>

<pallas_src>
import jax
import jax.numpy as jnp
from jax.experimental import pallas as pl
from jax.experimental.pallas import tpu as pltpu


def _round_up(x: int, m: int) -> int:
    return ((x + m - 1) // m) * m


def _make_kernel(n_extra: int, compute_dtype):
    """Fused MLP kernel, batch on the sublane axis.

    Ref order: x1, x2, x3, w1a, w1b, w1c, b1, [w_i, b_i]*n_extra, w_out, b_out, o.
    """

    def kernel(x1_ref, x2_ref, x3_ref, w1a_ref, w1b_ref, w1c_ref, b1_ref, *rest):
        o_ref = rest[-1]
        w_out_ref, b_out_ref = rest[-3], rest[-2]
        layer_params = rest[:-3]                       # (w, b) per extra hidden layer

        cd = compute_dtype
        # First layer: the input "concat" is fused into three partial matmuls
        # (in-kernel cast to compute_dtype; accumulation stays f32).
        z = (jnp.dot(x1_ref[...].astype(cd), w1a_ref[...],
                     preferred_element_type=jnp.float32)
             + jnp.dot(x2_ref[...].astype(cd), w1b_ref[...],
                       preferred_element_type=jnp.float32)
             + jnp.dot(x3_ref[...].astype(cd), w1c_ref[...],
                       preferred_element_type=jnp.float32)
             + b1_ref[...])                            # (block_b, units), f32
        h = jnp.maximum(z, 0.0)

        # Extra hidden layers: h = relu(h @ W_i.T + b_i)
        for i in range(n_extra):
            w = layer_params[2 * i][...]               # (units, units), compute_dtype
            b = layer_params[2 * i + 1][...]           # (1, units), f32
            z = jnp.dot(h.astype(cd), w, preferred_element_type=jnp.float32) + b
            h = jnp.maximum(z, 0.0)

        # Output head units -> 1 on the MXU (it has slack): (block_b, units)@(units, 1)
        y = (jnp.dot(h.astype(cd), w_out_ref[...], preferred_element_type=jnp.float32)
             + b_out_ref[...])                         # (block_b, 1)
        o_ref[...] = y.astype(o_ref.dtype)

    return kernel


def modelv1_forward(input1, input2, extrafeat, params, *, block_b=1024,
                    compute_dtype=jnp.float32, vmem_limit_bytes=None):
    """Pallas forward pass for Modelv1.

    params: dict with PyTorch nn.Linear layouts
      'hidden' : list of (W (out, in), b (out,)) — hidden_1 followed by the extra
                 Linear(units, units) layers
      'out'    : (W (1, units), b (1,))

    block_b:        batch tile (multiple of 8).  >= 1024 recommended on ALL TPU
                    generations (v5e/v6e/v7x) — per-grid-step overhead and DMA burst
                    size are the limiters at small tiles, not the MXU edge.  It is
                    clamped to round_up(B, 8) automatically.
    compute_dtype:  jnp.float32 (bit-faithful to the PyTorch module) or
                    jnp.bfloat16 (recommended on every generation: v5e's MXU is
                    natively bf16 and v5e has the lowest HBM bandwidth; v6e/v7x get
                    ~2x MXU throughput).  The cast happens in-kernel, so no extra
                    HBM passes; bias-add / ReLU / accumulation remain f32.
    vmem_limit_bytes: optional explicit scoped-VMEM limit.  Set this on v7x
                    (32 MiB scoped default of 64 MiB physical) if you push
                    block_b >= ~4K in f32 with large `units`.
    """
    assert block_b % 8 == 0, "block_b must be a multiple of 8"

    B, d1 = input1.shape
    d2 = input2.shape[1]
    d3 = extrafeat.shape[1]
    input_dim = d1 + d2 + d3

    hidden = params["hidden"]
    w_out, b_out = params["out"]
    units = hidden[0][0].shape[0]
    n_extra = len(hidden) - 1
    assert hidden[0][0].shape[1] == input_dim, "hidden_1 in_features mismatch"

    # --- One-time tiny weight transforms in the wrapper (KBs, not data passes). ---
    w1, b1 = hidden[0]
    w1_t = jnp.asarray(w1, compute_dtype).T                      # (input_dim, units)
    w1a, w1b, w1c = w1_t[:d1], w1_t[d1:d1 + d2], w1_t[d1 + d2:]  # split by input group
    flat_params = [w1a, w1b, w1c, jnp.asarray(b1, jnp.float32).reshape(1, -1)]
    for w, b in hidden[1:]:
        flat_params.append(jnp.asarray(w, compute_dtype).T)                 # (units, units)
        flat_params.append(jnp.asarray(b, jnp.float32).reshape(1, -1))      # (1, units)
    flat_params.append(jnp.asarray(w_out, compute_dtype).reshape(-1, 1))    # (units, 1)
    flat_params.append(jnp.asarray(b_out, jnp.float32).reshape(1, 1))       # (1, 1)

    # --- Grid: batch tiles; ragged last block (no padding pass over HBM). ---
    block_b = max(8, min(block_b, _round_up(B, 8)))
    grid = (pl.cdiv(B, block_b),)

    in_specs = [
        pl.BlockSpec((block_b, d1), lambda i: (i, 0)),
        pl.BlockSpec((block_b, d2), lambda i: (i, 0)),
        pl.BlockSpec((block_b, d3), lambda i: (i, 0)),
    ]
    # Weights/biases: grid-invariant (DMA'd once, stay resident in VMEM).
    in_specs += [pl.BlockSpec(p.shape, lambda i: (0, 0)) for p in flat_params]
    out_specs = pl.BlockSpec((block_b, 1), lambda i: (i, 0))

    # Advisory cost estimate so XLA schedules surrounding ops sensibly.
    flops = 2 * B * (input_dim * units + n_extra * units * units + units)
    bytes_accessed = int(
        input1.size * input1.dtype.itemsize
        + input2.size * input2.dtype.itemsize
        + extrafeat.size * extrafeat.dtype.itemsize
        + sum(int(p.size) * p.dtype.itemsize for p in flat_params)
        + B * 4)

    y = pl.pallas_call(
        _make_kernel(n_extra, compute_dtype),
        out_shape=jax.ShapeDtypeStruct((B, 1), jnp.float32),
        grid=grid,
        in_specs=in_specs,
        out_specs=out_specs,
        compiler_params=pltpu.CompilerParams(
            dimension_semantics=("parallel",),      # batch tiles shard across TCs (v7x)
            vmem_limit_bytes=vmem_limit_bytes,
        ),
        cost_estimate=pl.CostEstimate(
            flops=int(flops), transcendentals=0, bytes_accessed=bytes_accessed),
    )(input1, input2, extrafeat, *flat_params)

    return y


def init_params(key, input_dim, units, layers):
    """U(-1/sqrt(fan_in), 1/sqrt(fan_in)) like nn.Linear, PyTorch (out, in) layout."""
    hidden = []
    in_dim = input_dim
    for _ in range(layers):  # hidden_1 + (layers - 1) extra Linear(units, units)
        key, kw, kb = jax.random.split(key, 3)
        bound = 1.0 / (in_dim ** 0.5)
        w = jax.random.uniform(kw, (units, in_dim), jnp.float32, -bound, bound)
        b = jax.random.uniform(kb, (units,), jnp.float32, -bound, bound)
        hidden.append((w, b))
        in_dim = units
    key, kw, kb = jax.random.split(key, 3)
    bound = 1.0 / (units ** 0.5)
    w_out = jax.random.uniform(kw, (1, units), jnp.float32, -bound, bound)
    b_out = jax.random.uniform(kb, (1,), jnp.float32, -bound, bound)
    return {"hidden": hidden, "out": (w_out, b_out)}


def reference_forward(input1, input2, extrafeat, params):
    """Pure-JAX reference matching the PyTorch module (f32)."""
    x = jnp.concatenate([input1, input2, extrafeat], axis=1)
    for w, b in params["hidden"]:
        x = jnp.maximum(x @ w.T + b.reshape(1, -1), 0.0)
    w_out, b_out = params["out"]
    return x @ w_out.reshape(-1, 1) + b_out.reshape(1, 1)


if __name__ == "__main__":
    # Small, deterministic example shapes (batch deliberately NOT a multiple of the
    # tile to exercise the ragged last block).
    batch = 389
    d1, d2, d3 = 8, 8, 16          # input1, input2, extrafeat feature dims
    input_dim = d1 + d2 + d3       # 32
    units = 128
    layers = 3                     # hidden_1 + two extra Linear(units, units)

    key = jax.random.PRNGKey(0)
    key, k1, k2, k3, kp = jax.random.split(key, 5)
    input1 = jax.random.normal(k1, (batch, d1), jnp.float32)
    input2 = jax.random.normal(k2, (batch, d2), jnp.float32)
    extrafeat = jax.random.normal(k3, (batch, d3), jnp.float32)

    params = init_params(kp, input_dim, units, layers)
    ref = reference_forward(input1, input2, extrafeat, params)

    # f32 path, single (clamped) batch tile.
    out_f32 = jax.block_until_ready(
        modelv1_forward(input1, input2, extrafeat, params,
                        block_b=1024, compute_dtype=jnp.float32))
    assert out_f32.shape == (batch, 1)
    assert jnp.allclose(out_f32, ref, atol=5e-4, rtol=5e-4), "f32 mismatch vs reference"

    # Multi-tile path with a ragged last block (389 = 3*128 + 5).
    out_multi = jax.block_until_ready(
        modelv1_forward(input1, input2, extrafeat, params,
                        block_b=128, compute_dtype=jnp.float32))
    assert jnp.allclose(out_multi, ref, atol=5e-4, rtol=5e-4), "ragged-tile mismatch"

    # bf16 matmul path (recommended on v5e/v6e/v7x): looser tolerance vs f32 reference.
    out_bf16 = jax.block_until_ready(
        modelv1_forward(input1, input2, extrafeat, params,
                        block_b=1024, compute_dtype=jnp.bfloat16))
    assert out_bf16.shape == (batch, 1)
    assert jnp.allclose(out_bf16, ref, atol=5e-2, rtol=5e-2), "bf16 mismatch vs reference"

    print("KERNEL_OK")
</pallas_src>

<mosaic_0001>
module attributes {stable_mosaic.version = 11 : i64} {
  func.func @kernel(%arg0: i32, %arg1: memref<392x8xf32, #tpu.memory_space<vmem>>, %arg2: memref<392x8xf32, #tpu.memory_space<vmem>>, %arg3: memref<392x16xf32, #tpu.memory_space<vmem>>, %arg4: memref<8x128xf32, #tpu.memory_space<vmem>>, %arg5: memref<8x128xf32, #tpu.memory_space<vmem>>, %arg6: memref<16x128xf32, #tpu.memory_space<vmem>>, %arg7: memref<1x128xf32, #tpu.memory_space<vmem>>, %arg8: memref<128x128xf32, #tpu.memory_space<vmem>>, %arg9: memref<1x128xf32, #tpu.memory_space<vmem>>, %arg10: memref<128x128xf32, #tpu.memory_space<vmem>>, %arg11: memref<1x128xf32, #tpu.memory_space<vmem>>, %arg12: memref<128x1xf32, #tpu.memory_space<vmem>>, %arg13: memref<1x1xf32, #tpu.memory_space<vmem>>, %arg14: memref<392x1xf32, #tpu.memory_space<vmem>>) attributes {dimension_semantics = [#tpu.dimension_semantics<parallel>], iteration_bounds = array<i64: 1>, scalar_prefetch = 0 : i64, scratch_operands = 0 : i64, tpu.core_type = #tpu.core_type<tc>, window_params = [{transform_indices = @transform_0, window_bounds = array<i64: 392, 8>}, {transform_indices = @transform_1, window_bounds = array<i64: 392, 8>}, {transform_indices = @transform_2, window_bounds = array<i64: 392, 16>}, {pipeline_mode = #tpu.pipeline_mode<synchronous>, transform_indices = @transform_3, window_bounds = array<i64: 8, 128>}, {pipeline_mode = #tpu.pipeline_mode<synchronous>, transform_indices = @transform_4, window_bounds = array<i64: 8, 128>}, {pipeline_mode = #tpu.pipeline_mode<synchronous>, transform_indices = @transform_5, window_bounds = array<i64: 16, 128>}, {pipeline_mode = #tpu.pipeline_mode<synchronous>, transform_indices = @transform_6, window_bounds = array<i64: 1, 128>}, {pipeline_mode = #tpu.pipeline_mode<synchronous>, transform_indices = @transform_7, window_bounds = array<i64: 128, 128>}, {pipeline_mode = #tpu.pipeline_mode<synchronous>, transform_indices = @transform_8, window_bounds = array<i64: 1, 128>}, {pipeline_mode = #tpu.pipeline_mode<synchronous>, transform_indices = @transform_9, window_bounds = array<i64: 128, 128>}, {pipeline_mode = #tpu.pipeline_mode<synchronous>, transform_indices = @transform_10, window_bounds = array<i64: 1, 128>}, {pipeline_mode = #tpu.pipeline_mode<synchronous>, transform_indices = @transform_11, window_bounds = array<i64: 128, 1>}, {pipeline_mode = #tpu.pipeline_mode<synchronous>, transform_indices = @transform_12, window_bounds = array<i64: 1, 1>}, {transform_indices = @transform_13, window_bounds = array<i64: 392, 1>}]} {
    %c0 = arith.constant 0 : index
    %c0_0 = arith.constant 0 : index
    %0 = vector.load %arg1[%c0, %c0_0] : memref<392x8xf32, #tpu.memory_space<vmem>>, vector<392x8xf32>
    %c0_1 = arith.constant 0 : index
    %c0_2 = arith.constant 0 : index
    %1 = vector.load %arg4[%c0_1, %c0_2] : memref<8x128xf32, #tpu.memory_space<vmem>>, vector<8x128xf32>
    %cst = arith.constant dense<0.000000e+00> : vector<392x128xf32>
    %2 = tpu.matmul %0, %1, %cst {dimension_numbers = #tpu.dot_dimension_numbers<[1], [0], [0], [1], [0, 0, 1, 1], [], []>} : vector<392x8xf32>, vector<8x128xf32>, vector<392x128xf32> -> vector<392x128xf32>
    %c0_3 = arith.constant 0 : index
    %c0_4 = arith.constant 0 : index
    %3 = vector.load %arg2[%c0_3, %c0_4] : memref<392x8xf32, #tpu.memory_space<vmem>>, vector<392x8xf32>
    %c0_5 = arith.constant 0 : index
    %c0_6 = arith.constant 0 : index
    %4 = vector.load %arg5[%c0_5, %c0_6] : memref<8x128xf32, #tpu.memory_space<vmem>>, vector<8x128xf32>
    %cst_7 = arith.constant dense<0.000000e+00> : vector<392x128xf32>
    %5 = tpu.matmul %3, %4, %cst_7 {dimension_numbers = #tpu.dot_dimension_numbers<[1], [0], [0], [1], [0, 0, 1, 1], [], []>} : vector<392x8xf32>, vector<8x128xf32>, vector<392x128xf32> -> vector<392x128xf32>
    %6 = arith.addf %2, %5 : vector<392x128xf32>
    %c0_8 = arith.constant 0 : index
    %c0_9 = arith.constant 0 : index
    %7 = vector.load %arg3[%c0_8, %c0_9] : memref<392x16xf32, #tpu.memory_space<vmem>>, vector<392x16xf32>
    %c0_10 = arith.constant 0 : index
    %c0_11 = arith.constant 0 : index
    %8 = vector.load %arg6[%c0_10, %c0_11] : memref<16x128xf32, #tpu.memory_space<vmem>>, vector<16x128xf32>
    %cst_12 = arith.constant dense<0.000000e+00> : vector<392x128xf32>
    %9 = tpu.matmul %7, %8, %cst_12 {dimension_numbers = #tpu.dot_dimension_numbers<[1], [0], [0], [1], [0, 0, 1, 1], [], []>} : vector<392x16xf32>, vector<16x128xf32>, vector<392x128xf32> -> vector<392x128xf32>
    %10 = arith.addf %6, %9 : vector<392x128xf32>
    %c0_13 = arith.constant 0 : index
    %c0_14 = arith.constant 0 : index
    %11 = vector.load %arg7[%c0_13, %c0_14] : memref<1x128xf32, #tpu.memory_space<vmem>>, vector<1x128xf32>
    %12 = vector.broadcast %11 : vector<1x128xf32> to vector<392x128xf32>
    %13 = arith.addf %10, %12 : vector<392x128xf32>
    %cst_15 = arith.constant 0.000000e+00 : f32
    %14 = vector.broadcast %cst_15 : f32 to vector<392x128xf32>
    %15 = arith.maximumf %13, %14 : vector<392x128xf32>
    %c0_16 = arith.constant 0 : index
    %c0_17 = arith.constant 0 : index
    %16 = vector.load %arg8[%c0_16, %c0_17] : memref<128x128xf32, #tpu.memory_space<vmem>>, vector<128x128xf32>
    %c0_18 = arith.constant 0 : index
    %c0_19 = arith.constant 0 : index
    %17 = vector.load %arg9[%c0_18, %c0_19] : memref<1x128xf32, #tpu.memory_space<vmem>>, vector<1x128xf32>
    %cst_20 = arith.constant dense<0.000000e+00> : vector<392x128xf32>
    %18 = tpu.matmul %15, %16, %cst_20 {dimension_numbers = #tpu.dot_dimension_numbers<[1], [0], [0], [1], [0, 0, 1, 1], [], []>} : vector<392x128xf32>, vector<128x128xf32>, vector<392x128xf32> -> vector<392x128xf32>
    %19 = vector.broadcast %17 : vector<1x128xf32> to vector<392x128xf32>
    %20 = arith.addf %18, %19 : vector<392x128xf32>
    %cst_21 = arith.constant 0.000000e+00 : f32
    %21 = vector.broadcast %cst_21 : f32 to vector<392x128xf32>
    %22 = arith.maximumf %20, %21 : vector<392x128xf32>
    %c0_22 = arith.constant 0 : index
    %c0_23 = arith.constant 0 : index
    %23 = vector.load %arg10[%c0_22, %c0_23] : memref<128x128xf32, #tpu.memory_space<vmem>>, vector<128x128xf32>
    %c0_24 = arith.constant 0 : index
    %c0_25 = arith.constant 0 : index
    %24 = vector.load %arg11[%c0_24, %c0_25] : memref<1x128xf32, #tpu.memory_space<vmem>>, vector<1x128xf32>
    %cst_26 = arith.constant dense<0.000000e+00> : vector<392x128xf32>
    %25 = tpu.matmul %22, %23, %cst_26 {dimension_numbers = #tpu.dot_dimension_numbers<[1], [0], [0], [1], [0, 0, 1, 1], [], []>} : vector<392x128xf32>, vector<128x128xf32>, vector<392x128xf32> -> vector<392x128xf32>
    %26 = vector.broadcast %24 : vector<1x128xf32> to vector<392x128xf32>
    %27 = arith.addf %25, %26 : vector<392x128xf32>
    %cst_27 = arith.constant 0.000000e+00 : f32
    %28 = vector.broadcast %cst_27 : f32 to vector<392x128xf32>
    %29 = arith.maximumf %27, %28 : vector<392x128xf32>
    %c0_28 = arith.constant 0 : index
    %c0_29 = arith.constant 0 : index
    %30 = vector.load %arg12[%c0_28, %c0_29] : memref<128x1xf32, #tpu.memory_space<vmem>>, vector<128x1xf32>
    %cst_30 = arith.constant dense<0.000000e+00> : vector<392x1xf32>
    %31 = tpu.matmul %29, %30, %cst_30 {dimension_numbers = #tpu.dot_dimension_numbers<[1], [0], [0], [1], [0, 0, 1, 1], [], []>} : vector<392x128xf32>, vector<128x1xf32>, vector<392x1xf32> -> vector<392x1xf32>
    %c0_31 = arith.constant 0 : index
    %c0_32 = arith.constant 0 : index
    %32 = vector.load %arg13[%c0_31, %c0_32] : memref<1x1xf32, #tpu.memory_space<vmem>>, vector<1x1xf32>
    %33 = vector.broadcast %32 : vector<1x1xf32> to vector<392x1xf32>
    %34 = arith.addf %31, %33 : vector<392x1xf32>
    %c0_33 = arith.constant 0 : index
    %c0_34 = arith.constant 0 : index
    %35 = vector.load %arg14[%c0_33, %c0_34] : memref<392x1xf32, #tpu.memory_space<vmem>>, vector<392x1xf32>
    tpu.vector_store %arg14[%c0_33, %c0_34], %34 {strides = array<i32>} : memref<392x1xf32, #tpu.memory_space<vmem>>, vector<392x1xf32>,
    return
  }
  func.func @transform_0(%arg0: i32) -> (i32, i32) {
    %c0_i32 = arith.constant 0 : i32
    %c0_i32_0 = arith.constant 0 : i32
    return %arg0, %c0_i32 : i32, i32
  }
  func.func @transform_1(%arg0: i32) -> (i32, i32) {
    %c0_i32 = arith.constant 0 : i32
    %c0_i32_0 = arith.constant 0 : i32
    return %arg0, %c0_i32 : i32, i32
  }
  func.func @transform_2(%arg0: i32) -> (i32, i32) {
    %c0_i32 = arith.constant 0 : i32
    %c0_i32_0 = arith.constant 0 : i32
    return %arg0, %c0_i32 : i32, i32
  }
  func.func @transform_3(%arg0: i32) -> (i32, i32) {
    %c0_i32 = arith.constant 0 : i32
    %c0_i32_0 = arith.constant 0 : i32
    %c0_i32_1 = arith.constant 0 : i32
    return %c0_i32, %c0_i32_0 : i32, i32
  }
  func.func @transform_4(%arg0: i32) -> (i32, i32) {
    %c0_i32 = arith.constant 0 : i32
    %c0_i32_0 = arith.constant 0 : i32
    %c0_i32_1 = arith.constant 0 : i32
    return %c0_i32, %c0_i32_0 : i32, i32
  }
  func.func @transform_5(%arg0: i32) -> (i32, i32) {
    %c0_i32 = arith.constant 0 : i32
    %c0_i32_0 = arith.constant 0 : i32
    %c0_i32_1 = arith.constant 0 : i32
    return %c0_i32, %c0_i32_0 : i32, i32
  }
  func.func @transform_6(%arg0: i32) -> (i32, i32) {
    %c0_i32 = arith.constant 0 : i32
    %c0_i32_0 = arith.constant 0 : i32
    %c0_i32_1 = arith.constant 0 : i32
    return %c0_i32, %c0_i32_0 : i32, i32
  }
  func.func @transform_7(%arg0: i32) -> (i32, i32) {
    %c0_i32 = arith.constant 0 : i32
    %c0_i32_0 = arith.constant 0 : i32
    %c0_i32_1 = arith.constant 0 : i32
    return %c0_i32, %c0_i32_0 : i32, i32
  }
  func.func @transform_8(%arg0: i32) -> (i32, i32) {
    %c0_i32 = arith.constant 0 : i32
    %c0_i32_0 = arith.constant 0 : i32
    %c0_i32_1 = arith.constant 0 : i32
    return %c0_i32, %c0_i32_0 : i32, i32
  }
  func.func @transform_9(%arg0: i32) -> (i32, i32) {
    %c0_i32 = arith.constant 0 : i32
    %c0_i32_0 = arith.constant 0 : i32
    %c0_i32_1 = arith.constant 0 : i32
    return %c0_i32, %c0_i32_0 : i32, i32
  }
  func.func @transform_10(%arg0: i32) -> (i32, i32) {
    %c0_i32 = arith.constant 0 : i32
    %c0_i32_0 = arith.constant 0 : i32
    %c0_i32_1 = arith.constant 0 : i32
    return %c0_i32, %c0_i32_0 : i32, i32
  }
  func.func @transform_11(%arg0: i32) -> (i32, i32) {
    %c0_i32 = arith.constant 0 : i32
    %c0_i32_0 = arith.constant 0 : i32
    %c0_i32_1 = arith.constant 0 : i32
    return %c0_i32, %c0_i32_0 : i32, i32
  }
  func.func @transform_12(%arg0: i32) -> (i32, i32) {
    %c0_i32 = arith.constant 0 : i32
    %c0_i32_0 = arith.constant 0 : i32
    %c0_i32_1 = arith.constant 0 : i32
    return %c0_i32, %c0_i32_0 : i32, i32
  }
  func.func @transform_13(%arg0: i32) -> (i32, i32) {
    %c0_i32 = arith.constant 0 : i32
    %c0_i32_0 = arith.constant 0 : i32
    return %arg0, %c0_i32 : i32, i32
  }
}

</mosaic_0001>

<bundles_post_ra>
// kernel: tpu_custom_call.1
= control target key start
LH: loop header
LB: loop body
LE: loop exit
PB: predicated region body
PF: predicated region fallthrough
CT: control target
= control target key end

     0   :  { %vm146_vm0 = vcmask 64512   ;;  %v4360_v0 = vmov 0.0   ;;  %vm4361_vm1 = vmmov 0   ;;  %vm1112_vm2 = vcmask 130048   ;;  %s6375_s4 = inlined_call_operand.vmem [shape: f32[8,128], index: 4, kind: input, shape index: {}]   ;;  %s6376_s1 = inlined_call_operand.vmem [shape: f32[389,8], index: 1, kind: input, shape index: {}]   ;;  %s6377_s3 = inlined_call_operand.vmem [shape: f32[8,128], index: 3, kind: input, shape index: {}]   ;;  %s6378_s0 = inlined_call_operand.vmem [shape: f32[389,8], index: 0, kind: input, shape index: {}]   ;;  %s6379_s5 = inlined_call_operand.vmem [shape: f32[16,128], index: 5, kind: input, shape index: {}]   ;;  %s6380_s7 = inlined_call_operand.vmem [shape: f32[128,128], index: 7, kind: input, shape index: {}]   ;;  %s6381_s2 = inlined_call_operand.vmem [shape: f32[389,16], index: 2, kind: input, shape index: {}]   ;;  %s6382_s9 = inlined_call_operand.vmem [shape: f32[128,128], index: 9, kind: input, shape index: {}]   ;;  %s6383_s6 = inlined_call_operand.vmem [shape: f32[1,128], index: 6, kind: input, shape index: {}]   ;;  %s6384_s11 = inlined_call_operand.vmem [shape: f32[128,1], index: 11, kind: input, shape index: {}]   ;;  %s6385_s8 = inlined_call_operand.vmem [shape: f32[1,128], index: 8, kind: input, shape index: {}]   ;;  %s6386_s10 = inlined_call_operand.vmem [shape: f32[1,128], index: 10, kind: input, shape index: {}]   ;;  %s6387_s12 = inlined_call_operand.<no memory space> [shape: f32[1,1], index: 12, kind: input, shape index: {}]   ;;  %s6388_s13 = inlined_call_operand.vmem [shape: f32[389,1], index: 13, kind: output, shape index: {}]  }
   0x1   :  { %3372 = vmatprep.subr.mxu0 %v4360_v0  ;;  %v145_v1 = vld [vmem:[%s6375_s4] sm:$0xff]  ;;  %3374 = vmatprep.mubr.msk.f32.mxu0 %vm4361_vm1, %v4360_v0  ;;  %v1111_v5 = vld [vmem:[%s6379_s5 + $0x8] sm:$0xff]  ;;  %v98_v8 = vld [vmem:[%s6376_s1 + $0x10] sm:$0xff]  ;;  %vm2821_vm3 = vcmask 7168  }
   0x2   :  { %v96_v2 = vld [vmem:[%s6376_s1] sm:$0xff]  ;;  %3373 = vmatpush3.msra.mxu0 %v145_v1  ;;  %3521 = vmatprep.subr.mxu1 %v4360_v0  ;;  %v97_v6 = vld [vmem:[%s6376_s1 + $0x8] sm:$0xff]  ;;  %v48_v9 = vld [vmem:[%s6378_s0 + $0x10] sm:$0xff] }
   0x3   :  { %v95_v3 = vld [vmem:[%s6377_s3] sm:$0xff]  ;;  %3375 = vmatmul.mubr.msk.f32.vlgmr.msra.gmra.mxu0 %vm146_vm0, %v96_v2  ;;  %3523 = vmatprep.mubr.msk.f32.mxu1 %vm4361_vm1, %v4360_v0  ;;  %v47_v7 = vld [vmem:[%s6378_s0 + $0x8] sm:$0xff]  ;;  %v99_v10 = vld [vmem:[%s6376_s1 + $0x18] sm:$0xff] }
   0x4   :  { %v46_v4 = vld [vmem:[%s6378_s0] sm:$0xff]  ;;  %3522 = vmatpush3.msra.mxu1 %v95_v3  ;;  %3670 = vmatprep.subr.mxu0 %v4360_v0  ;;  %v49_v11 = vld [vmem:[%s6378_s0 + $0x18] sm:$0xff]  ;;  %v101_v15 = vld [vmem:[%s6376_s1 + $0x28] sm:$0xff] }
   0x5   :  { %3524 = vmatmul.mubr.msk.f32.vlgmr.msra.gmra.mxu1 %vm146_vm0, %v46_v4  ;;  %3671 = vmatpush3.msra.mxu0 %v1111_v5  ;;  %v100_v12 = vld [vmem:[%s6376_s1 + $0x20] sm:$0xff]  ;;  %v51_v16 = vld [vmem:[%s6378_s0 + $0x28] sm:$0xff]  ;;  %v102_v17 = vld [vmem:[%s6376_s1 + $0x30] sm:$0xff] }
   0x6   :  { %3377 = vmatprep.mubr.msk.f32.mxu0 %vm4361_vm1, %v4360_v0  ;;  %3526 = vmatprep.mubr.msk.f32.mxu1 %vm4361_vm1, %v4360_v0  ;;  %v50_v13 = vld [vmem:[%s6378_s0 + $0x20] sm:$0xff]  ;;  %v52_v18 = vld [vmem:[%s6378_s0 + $0x30] sm:$0xff]  ;;  %v103_v19 = vld [vmem:[%s6376_s1 + $0x38] sm:$0xff] }
   0x7   :  { %3378 = vmatmul.mubr.msk.f32.gmra.mxu0 %vm146_vm0, %v97_v6  ;;  %3672 = vmatprep.subr.mxu0 %v4360_v0  ;;  %v1110_v14 = vld [vmem:[%s6379_s5] sm:$0xff]  ;;  %v53_v20 = vld [vmem:[%s6378_s0 + $0x38] sm:$0xff]  ;;  %v105_v23 = vld [vmem:[%s6376_s1 + $0x48] sm:$0xff] }
   0x8   :  { %3380 = vmatprep.mubr.msk.f32.mxu0 %vm4361_vm1, %v4360_v0  ;;  %3821 = vmatprep.subr.mxu1 %v4360_v0  ;;  %v104_v21 = vld [vmem:[%s6376_s1 + $0x40] sm:$0xff]  ;;  %v55_v24 = vld [vmem:[%s6378_s0 + $0x48] sm:$0xff]  ;;  %v106_v25 = vld [vmem:[%s6376_s1 + $0x50] sm:$0xff] }
   0x9   :  { %3527 = vmatmul.mubr.msk.f32.gmra.mxu1 %vm146_vm0, %v47_v7  ;;  %3673 = vmatpush3.msra.mxu0 %v1110_v14  ;;  %v54_v22 = vld [vmem:[%s6378_s0 + $0x40] sm:$0xff]  ;;  %v56_v26 = vld [vmem:[%s6378_s0 + $0x50] sm:$0xff]  ;;  %v107_v27 = vld [vmem:[%s6376_s1 + $0x58] sm:$0xff] }
   0xa   :  { %3529 = vmatprep.mubr.msk.f32.mxu1 %vm4361_vm1, %v4360_v0  ;;  %4000 = vmatprep.subr.mxu0 %v4360_v0  ;;  %v57_v28 = vld [vmem:[%s6378_s0 + $0x58] sm:$0xff]  ;;  %v108_v29 = vld [vmem:[%s6376_s1 + $0x60] sm:$0xff]  ;;  %v109_v31 = vld [vmem:[%s6376_s1 + $0x68] sm:$0xff] }
   0xb   :  { %3381 = vmatmul.mubr.msk.f32.gmra.mxu0 %vm146_vm0, %v98_v8  ;;  %v58_v30 = vld [vmem:[%s6378_s0 + $0x60] sm:$0xff]  ;;  %v59_v32 = vld [vmem:[%s6378_s0 + $0x68] sm:$0xff]  ;;  %v110_v33 = vld [vmem:[%s6376_s1 + $0x70] sm:$0xff] }
   0xc   :  { %3383 = vmatprep.mubr.msk.f32.mxu0 %vm4361_vm1, %v4360_v0  ;;  %v60_v34 = vld [vmem:[%s6378_s0 + $0x70] sm:$0xff]  ;;  %v111_v35 = vld [vmem:[%s6376_s1 + $0x78] sm:$0xff]  ;;  %v112_v37 = vld [vmem:[%s6376_s1 + $0x80] sm:$0xff] }
   0xd   :  { %3530 = vmatmul.mubr.msk.f32.gmra.mxu1 %vm146_vm0, %v48_v9  ;;  %v61_v36 = vld [vmem:[%s6378_s0 + $0x78] sm:$0xff]  ;;  %v62_v38 = vld [vmem:[%s6378_s0 + $0x80] sm:$0xff]  ;;  %v113_v39 = vld [vmem:[%s6376_s1 + $0x88] sm:$0xff] }
   0xe   :  { %3532 = vmatprep.mubr.msk.f32.mxu1 %vm4361_vm1, %v4360_v0  ;;  %v63_v40 = vld [vmem:[%s6378_s0 + $0x88] sm:$0xff]  ;;  %v114_v41 = vld [vmem:[%s6376_s1 + $0x90] sm:$0xff]  ;;  %v115_v43 = vld [vmem:[%s6376_s1 + $0x98] sm:$0xff] }
   0xf   :  { %3384 = vmatmul.mubr.msk.f32.gmra.mxu0 %vm146_vm0, %v99_v10  ;;  %v64_v42 = vld [vmem:[%s6378_s0 + $0x90] sm:$0xff]  ;;  %v1739_v44 = vld [vmem:[%s6380_s7 + $0x78] sm:$0xff]  ;;  %v116_v46 = vld [vmem:[%s6376_s1 + $0xa0] sm:$0xff] }
  0x10   :  { %3386 = vmatprep.mubr.msk.f32.mxu0 %vm4361_vm1, %v4360_v0  ;;  %v65_v45 = vld [vmem:[%s6378_s0 + $0x98] sm:$0xff]  ;;  %3822 = vmatpush3.msra.mxu1 %v1739_v44  ;;  %v66_v47 = vld [vmem:[%s6378_s0 + $0xa0] sm:$0xff]  ;;  %v117_v48 = vld [vmem:[%s6376_s1 + $0xa8] sm:$0xff] }
  0x11   :  { %3533 = vmatmul.mubr.msk.f32.gmra.mxu1 %vm146_vm0, %v49_v11  ;;  %3823 = vmatprep.subr.mxu1 %v4360_v0  ;;  %v67_v49 = vld [vmem:[%s6378_s0 + $0xa8] sm:$0xff]  ;;  %v118_v50 = vld [vmem:[%s6376_s1 + $0xb0] sm:$0xff]  ;;  %v119_v53 = vld [vmem:[%s6376_s1 + $0xb8] sm:$0xff] }
  0x12   :  { %3535 = vmatprep.mubr.msk.f32.mxu1 %vm4361_vm1, %v4360_v0  ;;  %v68_v51 = vld [vmem:[%s6378_s0 + $0xb0] sm:$0xff]  ;;  %v69_v54 = vld [vmem:[%s6378_s0 + $0xb8] sm:$0xff]  ;;  %v120_v55 = vld [vmem:[%s6376_s1 + $0xc0] sm:$0xff] }
  0x13   :  { %3387 = vmatmul.mubr.msk.f32.gmra.mxu0 %vm146_vm0, %v100_v12  ;;  %v1738_v52 = vld [vmem:[%s6380_s7 + $0x70] sm:$0xff]  ;;  %v70_v56 = vld [vmem:[%s6378_s0 + $0xc0] sm:$0xff]  ;;  %v121_v57 = vld [vmem:[%s6376_s1 + $0xc8] sm:$0xff] }
  0x14   :  { %3389 = vmatprep.mubr.msk.f32.mxu0 %vm4361_vm1, %v4360_v0  ;;  %3824 = vmatpush3.msra.mxu1 %v1738_v52  ;;  %v71_v58 = vld [vmem:[%s6378_s0 + $0xc8] sm:$0xff]  ;;  %v122_v60 = vld [vmem:[%s6376_s1 + $0xd0] sm:$0xff]  ;;  %v123_v62 = vld [vmem:[%s6376_s1 + $0xd8] sm:$0xff] }
  0x15   :  { %3536 = vmatmul.mubr.msk.f32.gmra.mxu1 %vm146_vm0, %v50_v13  ;;  %3825 = vmatprep.subr.mxu1 %v4360_v0  ;;  %v1737_v59 = vld [vmem:[%s6380_s7 + $0x68] sm:$0xff]  ;;  %v72_v61 = vld [vmem:[%s6378_s0 + $0xd0] sm:$0xff]  ;;  %v73_v63 = vld [vmem:[%s6378_s0 + $0xd8] sm:$0xff] }
  0x16   :  { %3538 = vmatprep.mubr.msk.f32.mxu1 %vm4361_vm1, %v4360_v0  ;;  %3826 = vmatpush3.msra.mxu1 %v1737_v59  ;;  %v124_v1 = vld [vmem:[%s6376_s1 + $0xe0] sm:$0xff]  ;;  %v125_v4 = vld [vmem:[%s6376_s1 + $0xe8] sm:$0xff]  ;;  %v126_v6 = vld [vmem:[%s6376_s1 + $0xf0] sm:$0xff] }
  0x17   :  { %3390 = vmatmul.mubr.msk.f32.gmra.mxu0 %vm146_vm0, %v101_v15  ;;  %3827 = vmatprep.subr.mxu1 %v4360_v0  ;;  %v74_v2 = vld [vmem:[%s6378_s0 + $0xe0] sm:$0xff]  ;;  %v75_v5 = vld [vmem:[%s6378_s0 + $0xe8] sm:$0xff]  ;;  %v76_v7 = vld [vmem:[%s6378_s0 + $0xf0] sm:$0xff] }
  0x18   :  { %3392 = vmatprep.mubr.msk.f32.mxu0 %vm4361_vm1, %v4360_v0  ;;  %v1736_v3 = vld [vmem:[%s6380_s7 + $0x60] sm:$0xff]  ;;  %v127_v8 = vld [vmem:[%s6376_s1 + $0xf8] sm:$0xff]  ;;  %v129_v13 = vld [vmem:[%s6376_s1 + $0x108] sm:$0xff] }
  0x19   :  { %3539 = vmatmul.mubr.msk.f32.gmra.mxu1 %vm146_vm0, %v51_v16  ;;  %v77_v9 = vld [vmem:[%s6378_s0 + $0xf8] sm:$0xff]  ;;  %v128_v11 = vld [vmem:[%s6376_s1 + $0x100] sm:$0xff]  ;;  %v79_v14 = vld [vmem:[%s6378_s0 + $0x108] sm:$0xff] }
  0x1a   :  { %3541 = vmatprep.mubr.msk.f32.mxu1 %vm4361_vm1, %v4360_v0  ;;  %3828 = vmatpush3.msra.mxu1 %v1736_v3  ;;  %v1735_v10 = vld [vmem:[%s6380_s7 + $0x58] sm:$0xff]  ;;  %v78_v12 = vld [vmem:[%s6378_s0 + $0x100] sm:$0xff]  ;;  %v130_v15 = vld [vmem:[%s6376_s1 + $0x110] sm:$0xff] }
  0x1b   :  { %3393 = vmatmul.mubr.msk.f32.gmra.mxu0 %vm146_vm0, %v102_v17  ;;  %3829 = vmatprep.subr.mxu1 %v4360_v0  ;;  %v80_v16 = vld [vmem:[%s6378_s0 + $0x110] sm:$0xff] }
  0x1c   :  { %3395 = vmatprep.mubr.msk.f32.mxu0 %vm4361_vm1, %v4360_v0  ;;  %3830 = vmatpush3.msra.mxu1 %v1735_v10  ;;  %v1734_v17 = vld [vmem:[%s6380_s7 + $0x50] sm:$0xff] }
  0x1d   :  { %3542 = vmatmul.mubr.msk.f32.gmra.mxu1 %vm146_vm0, %v52_v18  ;;  %3831 = vmatprep.subr.mxu1 %v4360_v0  ;;  %v131_v18 = vld [vmem:[%s6376_s1 + $0x118] sm:$0xff]  ;;  %v92_v44 = vld [vmem:[%s6378_s0 + $0x170] sm:$0xff] }
  0x1e   :  { %3544 = vmatprep.mubr.msk.f32.mxu1 %vm4361_vm1, %v4360_v0  ;;  %3832 = vmatpush3.msra.mxu1 %v1734_v17 }
  0x1f   :  { %3396 = vmatmul.mubr.msk.f32.gmra.mxu0 %vm146_vm0, %v103_v19  ;;  %3833 = vmatprep.subr.mxu1 %v4360_v0  ;;  %v81_v19 = vld [vmem:[%s6378_s0 + $0x118] sm:$0xff] }
  0x20   :  { %3398 = vmatprep.mubr.msk.f32.mxu0 %vm4361_vm1, %v4360_v0 }
  0x21   :  { %3545 = vmatmul.mubr.msk.f32.gmra.mxu1 %vm146_vm0, %v53_v20  ;;  %v132_v20 = vld [vmem:[%s6376_s1 + $0x120] sm:$0xff] }
  0x22   :  { %3547 = vmatprep.mubr.msk.f32.mxu1 %vm4361_vm1, %v4360_v0 }
  0x23   :  { %3399 = vmatmul.mubr.msk.f32.gmra.mxu0 %vm146_vm0, %v104_v21  ;;  %v82_v21 = vld [vmem:[%s6378_s0 + $0x120] sm:$0xff] }
  0x24   :  { %3401 = vmatprep.mubr.msk.f32.mxu0 %vm4361_vm1, %v4360_v0 }
  0x25   :  { %3548 = vmatmul.mubr.msk.f32.gmra.mxu1 %vm146_vm0, %v54_v22  ;;  %v133_v22 = vld [vmem:[%s6376_s1 + $0x128] sm:$0xff] }
  0x26   :  { %3550 = vmatprep.mubr.msk.f32.mxu1 %vm4361_vm1, %v4360_v0 }
  0x27   :  { %3402 = vmatmul.mubr.msk.f32.gmra.mxu0 %vm146_vm0, %v105_v23  ;;  %v83_v23 = vld [vmem:[%s6378_s0 + $0x128] sm:$0xff] }
  0x28   :  { %3404 = vmatprep.mubr.msk.f32.mxu0 %vm4361_vm1, %v4360_v0 }
  0x29   :  { %3551 = vmatmul.mubr.msk.f32.gmra.mxu1 %vm146_vm0, %v55_v24  ;;  %v1733_v24 = vld [vmem:[%s6380_s7 + $0x48] sm:$0xff] }
  0x2a   :  { %3553 = vmatprep.mubr.msk.f32.mxu1 %vm4361_vm1, %v4360_v0  ;;  %3834 = vmatpush3.msra.mxu1 %v1733_v24 }
  0x2b   :  { %3405 = vmatmul.mubr.msk.f32.gmra.mxu0 %vm146_vm0, %v106_v25  ;;  %v134_v25 = vld [vmem:[%s6376_s1 + $0x130] sm:$0xff]  ;;  %3835 = vmatprep.subr.mxu1 %v4360_v0 }
  0x2c   :  { %3407 = vmatprep.mubr.msk.f32.mxu0 %vm4361_vm1, %v4360_v0 }
  0x2d   :  { %3554 = vmatmul.mubr.msk.f32.gmra.mxu1 %vm146_vm0, %v56_v26  ;;  %v84_v26 = vld [vmem:[%s6378_s0 + $0x130] sm:$0xff] }
  0x2e   :  { %3556 = vmatprep.mubr.msk.f32.mxu1 %vm4361_vm1, %v4360_v0 }
  0x2f   :  { %3408 = vmatmul.mubr.msk.f32.gmra.mxu0 %vm146_vm0, %v107_v27  ;;  %v135_v27 = vld [vmem:[%s6376_s1 + $0x138] sm:$0xff] }
  0x30   :  { %3410 = vmatprep.mubr.msk.f32.mxu0 %vm4361_vm1, %v4360_v0 }
  0x31   :  { %3557 = vmatmul.mubr.msk.f32.gmra.mxu1 %vm146_vm0, %v57_v28  ;;  %v85_v28 = vld [vmem:[%s6378_s0 + $0x138] sm:$0xff] }
  0x32   :  { %3559 = vmatprep.mubr.msk.f32.mxu1 %vm4361_vm1, %v4360_v0 }
  0x33   :  { %3411 = vmatmul.mubr.msk.f32.gmra.mxu0 %vm146_vm0, %v108_v29  ;;  %v136_v29 = vld [vmem:[%s6376_s1 + $0x140] sm:$0xff] }
  0x34   :  { %3413 = vmatprep.mubr.msk.f32.mxu0 %vm4361_vm1, %v4360_v0 }
  0x35   :  { %3560 = vmatmul.mubr.msk.f32.gmra.mxu1 %vm146_vm0, %v58_v30  ;;  %v86_v30 = vld [vmem:[%s6378_s0 + $0x140] sm:$0xff] }
  0x36   :  { %3562 = vmatprep.mubr.msk.f32.mxu1 %vm4361_vm1, %v4360_v0 }
  0x37   :  { %3414 = vmatmul.mubr.msk.f32.gmra.mxu0 %vm146_vm0, %v109_v31  ;;  %v1732_v31 = vld [vmem:[%s6380_s7 + $0x40] sm:$0xff] }
  0x38   :  { %3416 = vmatprep.mubr.msk.f32.mxu0 %vm4361_vm1, %v4360_v0  ;;  %3836 = vmatpush3.msra.mxu1 %v1732_v31 }
  0x39   :  { %3563 = vmatmul.mubr.msk.f32.gmra.mxu1 %vm146_vm0, %v59_v32  ;;  %v137_v32 = vld [vmem:[%s6376_s1 + $0x148] sm:$0xff]  ;;  %3837 = vmatprep.subr.mxu1 %v4360_v0 }
  0x3a   :  { %3565 = vmatprep.mubr.msk.f32.mxu1 %vm4361_vm1, %v4360_v0 }
  0x3b   :  { %3417 = vmatmul.mubr.msk.f32.gmra.mxu0 %vm146_vm0, %v110_v33  ;;  %v87_v33 = vld [vmem:[%s6378_s0 + $0x148] sm:$0xff] }
  0x3c   :  { %3419 = vmatprep.mubr.msk.f32.mxu0 %vm4361_vm1, %v4360_v0 }
  0x3d   :  { %3566 = vmatmul.mubr.msk.f32.gmra.mxu1 %vm146_vm0, %v60_v34  ;;  %v138_v34 = vld [vmem:[%s6376_s1 + $0x150] sm:$0xff] }
  0x3e   :  { %3568 = vmatprep.mubr.msk.f32.mxu1 %vm4361_vm1, %v4360_v0 }
  0x3f   :  { %3420 = vmatmul.mubr.msk.f32.gmra.mxu0 %vm146_vm0, %v111_v35  ;;  %v88_v35 = vld [vmem:[%s6378_s0 + $0x150] sm:$0xff] }
  0x40   :  { %3422 = vmatprep.mubr.msk.f32.mxu0 %vm4361_vm1, %v4360_v0 }
  0x41   :  { %3569 = vmatmul.mubr.msk.f32.gmra.mxu1 %vm146_vm0, %v61_v36  ;;  %v139_v36 = vld [vmem:[%s6376_s1 + $0x158] sm:$0xff] }
  0x42   :  { %3571 = vmatprep.mubr.msk.f32.mxu1 %vm4361_vm1, %v4360_v0 }
  0x43   :  { %3423 = vmatmul.mubr.msk.f32.gmra.mxu0 %vm146_vm0, %v112_v37  ;;  %v89_v37 = vld [vmem:[%s6378_s0 + $0x158] sm:$0xff] }
  0x44   :  { %3425 = vmatprep.mubr.msk.f32.mxu0 %vm4361_vm1, %v4360_v0 }
  0x45   :  { %3572 = vmatmul.mubr.msk.f32.gmra.mxu1 %vm146_vm0, %v62_v38  ;;  %v1731_v38 = vld [vmem:[%s6380_s7 + $0x38] sm:$0xff] }
  0x46   :  { %3574 = vmatprep.mubr.msk.f32.mxu1 %vm4361_vm1, %v4360_v0  ;;  %3838 = vmatpush3.msra.mxu1 %v1731_v38 }
  0x47   :  { %3426 = vmatmul.mubr.msk.f32.gmra.mxu0 %vm146_vm0, %v113_v39  ;;  %v140_v39 = vld [vmem:[%s6376_s1 + $0x160] sm:$0xff]  ;;  %3839 = vmatprep.subr.mxu1 %v4360_v0 }
  0x48   :  { %3428 = vmatprep.mubr.msk.f32.mxu0 %vm4361_vm1, %v4360_v0 }
  0x49   :  { %3575 = vmatmul.mubr.msk.f32.gmra.mxu1 %vm146_vm0, %v63_v40  ;;  %v90_v40 = vld [vmem:[%s6378_s0 + $0x160] sm:$0xff] }
  0x4a   :  { %3577 = vmatprep.mubr.msk.f32.mxu1 %vm4361_vm1, %v4360_v0 }
  0x4b   :  { %3429 = vmatmul.mubr.msk.f32.gmra.mxu0 %vm146_vm0, %v114_v41  ;;  %v141_v41 = vld [vmem:[%s6376_s1 + $0x168] sm:$0xff] }
  0x4c   :  { %3431 = vmatprep.mubr.msk.f32.mxu0 %vm4361_vm1, %v4360_v0 }
  0x4d   :  { %3578 = vmatmul.mubr.msk.f32.gmra.mxu1 %vm146_vm0, %v64_v42  ;;  %v91_v42 = vld [vmem:[%s6378_s0 + $0x168] sm:$0xff] }
  0x4e   :  { %3580 = vmatprep.mubr.msk.f32.mxu1 %vm4361_vm1, %v4360_v0 }
  0x4f   :  { %3432 = vmatmul.mubr.msk.f32.gmra.mxu0 %vm146_vm0, %v115_v43  ;;  %v142_v43 = vld [vmem:[%s6376_s1 + $0x170] sm:$0xff] }
  0x50   :  { %3434 = vmatprep.mubr.msk.f32.mxu0 %vm4361_vm1, %v4360_v0 }
  0x51   :  { %3581 = vmatmul.mubr.msk.f32.gmra.mxu1 %vm146_vm0, %v65_v45  ;;  %v1730_v45 = vld [vmem:[%s6380_s7 + $0x30] sm:$0xff] }
  0x52   :  { %3583 = vmatprep.mubr.msk.f32.mxu1 %vm4361_vm1, %v4360_v0  ;;  %3840 = vmatpush3.msra.mxu1 %v1730_v45  ;;  %v1070_v45 = vld [vmem:[%s6381_s2 + $0x48] sm:$0xff] }
  0x53   :  { %3435 = vmatmul.mubr.msk.f32.gmra.mxu0 %vm146_vm0, %v116_v46  ;;  %v143_v46 = vld [vmem:[%s6376_s1 + $0x178] sm:$0xff]  ;;  %3841 = vmatprep.subr.mxu1 %v4360_v0 }
  0x54   :  { %3437 = vmatprep.mubr.msk.f32.mxu0 %vm4361_vm1, %v4360_v0 }
  0x55   :  { %3584 = vmatmul.mubr.msk.f32.gmra.mxu1 %vm146_vm0, %v66_v47  ;;  %v93_v47 = vld [vmem:[%s6378_s0 + $0x178] sm:$0xff] }
  0x56   :  { %3586 = vmatprep.mubr.msk.f32.mxu1 %vm4361_vm1, %v4360_v0 }
  0x57   :  { %3438 = vmatmul.mubr.msk.f32.gmra.mxu0 %vm146_vm0, %v117_v48  ;;  %v144_v48 = vld [vmem:[%s6376_s1 + $0x180] sm:$0xff] }
  0x58   :  { %3440 = vmatprep.mubr.msk.f32.mxu0 %vm4361_vm1, %v4360_v0 }
  0x59   :  { %3587 = vmatmul.mubr.msk.f32.gmra.mxu1 %vm146_vm0, %v67_v49  ;;  %v94_v49 = vld [vmem:[%s6378_s0 + $0x180] sm:$0xff] }
  0x5a   :  { %3589 = vmatprep.mubr.msk.f32.mxu1 %vm4361_vm1, %v4360_v0 }
  0x5b   :  { %3441 = vmatmul.mubr.msk.f32.gmra.mxu0 %vm146_vm0, %v118_v50 }
  0x5c   :  { %3443 = vmatprep.mubr.msk.f32.mxu0 %vm4361_vm1, %v4360_v0 }
  0x5d   :  { %3590 = vmatmul.mubr.msk.f32.gmra.mxu1 %vm146_vm0, %v68_v51  ;;  %v1061_v51 = vld [vmem:[%s6381_s2] sm:$0xff] }
  0x5e   :  { %3592 = vmatprep.mubr.msk.f32.mxu1 %vm4361_vm1, %v4360_v0 }
  0x5f   :  { %3444 = vmatmul.mubr.msk.f32.gmra.mxu0 %vm146_vm0, %v119_v53 }
  0x60   :  { %3446 = vmatprep.mubr.msk.f32.mxu0 %vm4361_vm1, %v4360_v0 }
  0x61   :  { %3593 = vmatmul.mubr.msk.f32.gmra.mxu1 %vm146_vm0, %v69_v54 }
  0x62   :  { %3595 = vmatprep.mubr.msk.f32.mxu1 %vm4361_vm1, %v4360_v0 }
  0x63   :  { %3447 = vmatmul.mubr.msk.f32.gmra.mxu0 %vm146_vm0, %v120_v55 }
  0x64   :  { %3449 = vmatprep.mubr.msk.f32.mxu0 %vm4361_vm1, %v4360_v0 }
  0x65   :  { %3596 = vmatmul.mubr.msk.f32.gmra.mxu1 %vm146_vm0, %v70_v56 }
  0x66   :  { %3598 = vmatprep.mubr.msk.f32.mxu1 %vm4361_vm1, %v4360_v0 }
  0x67   :  { %3450 = vmatmul.mubr.msk.f32.gmra.mxu0 %vm146_vm0, %v121_v57  ;;  %v1729_v57 = vld [vmem:[%s6380_s7 + $0x28] sm:$0xff] }
  0x68   :  { %3452 = vmatprep.mubr.msk.f32.mxu0 %vm4361_vm1, %v4360_v0  ;;  %3842 = vmatpush3.msra.mxu1 %v1729_v57 }
  0x69   :  { %3599 = vmatmul.mubr.msk.f32.gmra.mxu1 %vm146_vm0, %v71_v58  ;;  %v1062_v58 = vld [vmem:[%s6381_s2 + $0x8] sm:$0xff]  ;;  %3843 = vmatprep.subr.mxu1 %v4360_v0 }
  0x6a   :  { %3601 = vmatprep.mubr.msk.f32.mxu1 %vm4361_vm1, %v4360_v0 }
  0x6b   :  { %3453 = vmatmul.mubr.msk.f32.gmra.mxu0 %vm146_vm0, %v122_v60 }
  0x6c   :  { %3455 = vmatprep.mubr.msk.f32.mxu0 %vm4361_vm1, %v4360_v0 }
  0x6d   :  { %3602 = vmatmul.mubr.msk.f32.gmra.mxu1 %vm146_vm0, %v72_v61 }
  0x6e   :  { %3604 = vmatprep.mubr.msk.f32.mxu1 %vm4361_vm1, %v4360_v0 }
  0x6f   :  { %3456 = vmatmul.mubr.msk.f32.gmra.mxu0 %vm146_vm0, %v123_v62 }
  0x70   :  { %3458 = vmatprep.mubr.msk.f32.mxu0 %vm4361_vm1, %v4360_v0 }
  0x71   :  { %3605 = vmatmul.mubr.msk.f32.gmra.mxu1 %vm146_vm0, %v73_v63 }
  0x72   :  { %3607 = vmatprep.mubr.msk.f32.mxu1 %vm4361_vm1, %v4360_v0 }
  0x73   :  { %3459 = vmatmul.mubr.msk.f32.gmra.mxu0 %vm146_vm0, %v124_v1  ;;  %v1063_v1 = vld [vmem:[%s6381_s2 + $0x10] sm:$0xff] }
  0x74   :  { %3461 = vmatprep.mubr.msk.f32.mxu0 %vm4361_vm1, %v4360_v0 }
  0x75   :  { %3608 = vmatmul.mubr.msk.f32.gmra.mxu1 %vm146_vm0, %v74_v2 }
  0x76   :  { %3610 = vmatprep.mubr.msk.f32.mxu1 %vm4361_vm1, %v4360_v0 }
  0x77   :  { %3462 = vmatmul.mubr.msk.f32.gmra.mxu0 %vm146_vm0, %v125_v4 }
  0x78   :  { %3464 = vmatprep.mubr.msk.f32.mxu0 %vm4361_vm1, %v4360_v0 }
  0x79   :  { %3611 = vmatmul.mubr.msk.f32.gmra.mxu1 %vm146_vm0, %v75_v5 }
  0x7a   :  { %3613 = vmatprep.mubr.msk.f32.mxu1 %vm4361_vm1, %v4360_v0 }
  0x7b   :  { %3465 = vmatmul.mubr.msk.f32.gmra.mxu0 %vm146_vm0, %v126_v6 }
  0x7c   :  { %3467 = vmatprep.mubr.msk.f32.mxu0 %vm4361_vm1, %v4360_v0 }
  0x7d   :  { %3614 = vmatmul.mubr.msk.f32.gmra.mxu1 %vm146_vm0, %v76_v7  ;;  %v1064_v7 = vld [vmem:[%s6381_s2 + $0x18] sm:$0xff] }
  0x7e   :  { %3616 = vmatprep.mubr.msk.f32.mxu1 %vm4361_vm1, %v4360_v0 }
  0x7f   :  { %3468 = vmatmul.mubr.msk.f32.gmra.mxu0 %vm146_vm0, %v127_v8 }
  0x80   :  { %3470 = vmatprep.mubr.msk.f32.mxu0 %vm4361_vm1, %v4360_v0 }
  0x81   :  { %3617 = vmatmul.mubr.msk.f32.gmra.mxu1 %vm146_vm0, %v77_v9 }
  0x82   :  { %3619 = vmatprep.mubr.msk.f32.mxu1 %vm4361_vm1, %v4360_v0 }
  0x83   :  { %3471 = vmatmul.mubr.msk.f32.gmra.mxu0 %vm146_vm0, %v128_v11 }
  0x84   :  { %3473 = vmatprep.mubr.msk.f32.mxu0 %vm4361_vm1, %v4360_v0 }
  0x85   :  { %3620 = vmatmul.mubr.msk.f32.gmra.mxu1 %vm146_vm0, %v78_v12 }
  0x86   :  { %3622 = vmatprep.mubr.msk.f32.mxu1 %vm4361_vm1, %v4360_v0 }
  0x87   :  { %3474 = vmatmul.mubr.msk.f32.gmra.mxu0 %vm146_vm0, %v129_v13  ;;  %v1728_v13 = vld [vmem:[%s6380_s7 + $0x20] sm:$0xff] }
  0x88   :  { %3476 = vmatprep.mubr.msk.f32.mxu0 %vm4361_vm1, %v4360_v0  ;;  %3844 = vmatpush3.msra.mxu1 %v1728_v13 }
  0x89   :  { %3623 = vmatmul.mubr.msk.f32.gmra.mxu1 %vm146_vm0, %v79_v14  ;;  %v1065_v14 = vld [vmem:[%s6381_s2 + $0x20] sm:$0xff]  ;;  %3845 = vmatprep.subr.mxu1 %v4360_v0 }
  0x8a   :  { %3625 = vmatprep.mubr.msk.f32.mxu1 %vm4361_vm1, %v4360_v0 }
  0x8b   :  { %3477 = vmatmul.mubr.msk.f32.gmra.mxu0 %vm146_vm0, %v130_v15 }
  0x8c   :  { %3479 = vmatprep.mubr.msk.f32.mxu0 %vm4361_vm1, %v4360_v0 }
  0x8d   :  { %3626 = vmatmul.mubr.msk.f32.gmra.mxu1 %vm146_vm0, %v80_v16 }
  0x8e   :  { %3628 = vmatprep.mubr.msk.f32.mxu1 %vm4361_vm1, %v4360_v0 }
  0x8f   :  { %3480 = vmatmul.mubr.msk.f32.gmra.mxu0 %vm146_vm0, %v131_v18 }
  0x90   :  { %3482 = vmatprep.mubr.msk.f32.mxu0 %vm4361_vm1, %v4360_v0 }
  0x91   :  { %3629 = vmatmul.mubr.msk.f32.gmra.mxu1 %vm146_vm0, %v81_v19 }
  0x92   :  { %3631 = vmatprep.mubr.msk.f32.mxu1 %vm4361_vm1, %v4360_v0 }
  0x93   :  { %3483 = vmatmul.mubr.msk.f32.gmra.mxu0 %vm146_vm0, %v132_v20  ;;  %v1066_v20 = vld [vmem:[%s6381_s2 + $0x28] sm:$0xff] }
  0x94   :  { %3485 = vmatprep.mubr.msk.f32.mxu0 %vm4361_vm1, %v4360_v0 }
  0x95   :  { %3632 = vmatmul.mubr.msk.f32.gmra.mxu1 %vm146_vm0, %v82_v21 }
  0x96   :  { %3634 = vmatprep.mubr.msk.f32.mxu1 %vm4361_vm1, %v4360_v0 }
  0x97   :  { %3486 = vmatmul.mubr.msk.f32.gmra.mxu0 %vm146_vm0, %v133_v22 }
  0x98   :  { %3488 = vmatprep.mubr.msk.f32.mxu0 %vm4361_vm1, %v4360_v0 }
  0x99   :  { %3635 = vmatmul.mubr.msk.f32.gmra.mxu1 %vm146_vm0, %v83_v23 }
  0x9a   :  { %3637 = vmatprep.mubr.msk.f32.mxu1 %vm4361_vm1, %v4360_v0 }
  0x9b   :  { %3489 = vmatmul.mubr.msk.f32.gmra.mxu0 %vm146_vm0, %v134_v25 }
  0x9c   :  { %3491 = vmatprep.mubr.msk.f32.mxu0 %vm4361_vm1, %v4360_v0 }
  0x9d   :  { %3638 = vmatmul.mubr.msk.f32.gmra.mxu1 %vm146_vm0, %v84_v26  ;;  %v1067_v26 = vld [vmem:[%s6381_s2 + $0x30] sm:$0xff] }
  0x9e   :  { %3640 = vmatprep.mubr.msk.f32.mxu1 %vm4361_vm1, %v4360_v0 }
  0x9f   :  { %3492 = vmatmul.mubr.msk.f32.gmra.mxu0 %vm146_vm0, %v135_v27 }
  0xa0   :  { %3494 = vmatprep.mubr.msk.f32.mxu0 %vm4361_vm1, %v4360_v0 }
  0xa1   :  { %3641 = vmatmul.mubr.msk.f32.gmra.mxu1 %vm146_vm0, %v85_v28 }
  0xa2   :  { %3643 = vmatprep.mubr.msk.f32.mxu1 %vm4361_vm1, %v4360_v0 }
  0xa3   :  { %3495 = vmatmul.mubr.msk.f32.gmra.mxu0 %vm146_vm0, %v136_v29 }
  0xa4   :  { %3497 = vmatprep.mubr.msk.f32.mxu0 %vm4361_vm1, %v4360_v0 }
  0xa5   :  { %3644 = vmatmul.mubr.msk.f32.gmra.mxu1 %vm146_vm0, %v86_v30 }
  0xa6   :  { %3646 = vmatprep.mubr.msk.f32.mxu1 %vm4361_vm1, %v4360_v0 }
  0xa7   :  { %3498 = vmatmul.mubr.msk.f32.gmra.mxu0 %vm146_vm0, %v137_v32  ;;  %v1727_v32 = vld [vmem:[%s6380_s7 + $0x18] sm:$0xff] }
  0xa8   :  { %3500 = vmatprep.mubr.msk.f32.mxu0 %vm4361_vm1, %v4360_v0  ;;  %3846 = vmatpush3.msra.mxu1 %v1727_v32 }
  0xa9   :  { %3647 = vmatmul.mubr.msk.f32.gmra.mxu1 %vm146_vm0, %v87_v33  ;;  %v1068_v33 = vld [vmem:[%s6381_s2 + $0x38] sm:$0xff]  ;;  %3847 = vmatprep.subr.mxu1 %v4360_v0 }
  0xaa   :  { %3649 = vmatprep.mubr.msk.f32.mxu1 %vm4361_vm1, %v4360_v0 }
  0xab   :  { %3501 = vmatmul.mubr.msk.f32.gmra.mxu0 %vm146_vm0, %v138_v34 }
  0xac   :  { %3503 = vmatprep.mubr.msk.f32.mxu0 %vm4361_vm1, %v4360_v0 }
  0xad   :  { %3650 = vmatmul.mubr.msk.f32.gmra.mxu1 %vm146_vm0, %v88_v35 }
  0xae   :  { %3652 = vmatprep.mubr.msk.f32.mxu1 %vm4361_vm1, %v4360_v0 }
  0xaf   :  { %3504 = vmatmul.mubr.msk.f32.gmra.mxu0 %vm146_vm0, %v139_v36 }
  0xb0   :  { %3506 = vmatprep.mubr.msk.f32.mxu0 %vm4361_vm1, %v4360_v0 }
  0xb1   :  { %3653 = vmatmul.mubr.msk.f32.gmra.mxu1 %vm146_vm0, %v89_v37 }
  0xb2   :  { %3655 = vmatprep.mubr.msk.f32.mxu1 %vm4361_vm1, %v4360_v0 }
  0xb3   :  { %3507 = vmatmul.mubr.msk.f32.gmra.mxu0 %vm146_vm0, %v140_v39  ;;  %v1069_v39 = vld [vmem:[%s6381_s2 + $0x40] sm:$0xff] }
  0xb4   :  { %3509 = vmatprep.mubr.msk.f32.mxu0 %vm4361_vm1, %v4360_v0 }
  0xb5   :  { %3656 = vmatmul.mubr.msk.f32.gmra.mxu1 %vm146_vm0, %v90_v40 }
  0xb6   :  { %3658 = vmatprep.mubr.msk.f32.mxu1 %vm4361_vm1, %v4360_v0 }
  0xb7   :  { %3510 = vmatmul.mubr.msk.f32.gmra.mxu0 %vm146_vm0, %v141_v41 }
  0xb8   :  { %3512 = vmatprep.mubr.msk.f32.mxu0 %vm4361_vm1, %v4360_v0 }
  0xb9   :  { %3659 = vmatmul.mubr.msk.f32.gmra.mxu1 %vm146_vm0, %v91_v42 }
  0xba   :  { %3661 = vmatprep.mubr.msk.f32.mxu1 %vm4361_vm1, %v4360_v0 }
  0xbb   :  { %3513 = vmatmul.mubr.msk.f32.gmra.mxu0 %vm146_vm0, %v142_v43 }
  0xbc   :  { %3515 = vmatprep.mubr.msk.f32.mxu0 %vm4361_vm1, %v4360_v0 }
  0xbd   :  { %3662 = vmatmul.mubr.msk.f32.gmra.mxu1 %vm146_vm0, %v92_v44 }
  0xbe   :  { %3664 = vmatprep.mubr.msk.f32.mxu1 %vm4361_vm1, %v4360_v0 }
  0xbf   :  { %3516 = vmatmul.mubr.msk.f32.gmra.mxu0 %vm146_vm0, %v143_v46 }
  0xc0   :  { %3518 = vmatprep.mubr.msk.f32.mxu0 %vm4361_vm1, %v4360_v0 }
  0xc1   :  { %3665 = vmatmul.mubr.msk.f32.gmra.mxu1 %vm146_vm0, %v93_v47 }
  0xc2   :  { %3667 = vmatprep.mubr.msk.f32.mxu1 %vm4361_vm1, %v4360_v0 }
  0xc3   :  { %v360_v50 = vpop.f32.mrf.mxu0  ;;  %3519 = vmatmul.mubr.msk.f32.gmra.mxu0 %vm146_vm0, %v144_v48 }
  0xc4   :  { %3674 = vmatprep.mubr.msk.f32.mxu0 %vm4361_vm1, %v4360_v0 }
  0xc5   :  { %v817_v52 = vpop.f32.mrf.mxu1  ;;  %3668 = vmatmul.mubr.msk.f32.gmra.mxu1 %vm146_vm0, %v94_v49  ;;  %v3376_v53 = vpop.f32.mrf.mxu0 }
  0xc6   :  { %v5083_v54 = vadd.f32 %v817_v52, %v360_v50  ;;  %3853 = vmatprep.mubr.msk.f32.mxu1 %vm4361_vm1, %v4360_v0  ;;  %v1071_v52 = vld [vmem:[%s6381_s2 + $0x50] sm:$0xff] }
  0xc7   :  { %v3525_v55 = vpop.f32.mrf.mxu1  ;;  %v365_v56 = vpop.f32.mrf.mxu0  ;;  %3675 = vmatmul.mubr.msk.f32.vlgmr.msra.gmra.mxu0 %vm1112_vm2, %v1061_v51  ;;  %v1726_v51 = vld [vmem:[%s6380_s7 + $0x10] sm:$0xff] }
  0xc8   :  { %3677 = vmatprep.mubr.msk.f32.mxu0 %vm4361_vm1, %v4360_v0  ;;  %3848 = vmatpush3.msra.mxu1 %v1726_v51 }
  0xc9   :  { %v822_v59 = vpop.f32.mrf.mxu1  ;;  %v3379_v60 = vpop.f32.mrf.mxu0  ;;  %3849 = vmatprep.subr.mxu1 %v4360_v0 }
  0xca   :  { %v5097_v61 = vadd.f32 %v822_v59, %v365_v56  ;;  %v1072_v59 = vld [vmem:[%s6381_s2 + $0x58] sm:$0xff] }
  0xcb   :  { %v3528_v62 = vpop.f32.mrf.mxu1  ;;  %v370_v63 = vpop.f32.mrf.mxu0  ;;  %3678 = vmatmul.mubr.msk.f32.gmra.mxu0 %vm1112_vm2, %v1062_v58 }
  0xcc   :  { %3680 = vmatprep.mubr.msk.f32.mxu0 %vm4361_vm1, %v4360_v0 }
  0xcd   :  { %v827_v2 = vpop.f32.mrf.mxu1  ;;  %v3382_v3 = vpop.f32.mrf.mxu0 }
  0xce   :  { %v5105_v4 = vadd.f32 %v827_v2, %v370_v63  ;;  %v1073_v3 = vld [vmem:[%s6381_s2 + $0x60] sm:$0xff] }
  0xcf   :  { %v3531_v5 = vpop.f32.mrf.mxu1  ;;  %v375_v6 = vpop.f32.mrf.mxu0  ;;  %3681 = vmatmul.mubr.msk.f32.gmra.mxu0 %vm1112_vm2, %v1063_v1 }
  0xd0   :  { %3683 = vmatprep.mubr.msk.f32.mxu0 %vm4361_vm1, %v4360_v0 }
  0xd1   :  { %v832_v8 = vpop.f32.mrf.mxu1  ;;  %v3385_v9 = vpop.f32.mrf.mxu0 }
  0xd2   :  { %v5113_v10 = vadd.f32 %v832_v8, %v375_v6 }
  0xd3   :  { %v3534_v11 = vpop.f32.mrf.mxu1  ;;  %v380_v12 = vpop.f32.mrf.mxu0  ;;  %3684 = vmatmul.mubr.msk.f32.gmra.mxu0 %vm1112_vm2, %v1064_v7 }
  0xd4   :  { %3686 = vmatprep.mubr.msk.f32.mxu0 %vm4361_vm1, %v4360_v0  ;;  %v1725_v11 = vld [vmem:[%s6380_s7 + $0x8] sm:$0xff] }
  0xd5   :  { %v837_v15 = vpop.f32.mrf.mxu1  ;;  %v3388_v16 = vpop.f32.mrf.mxu0  ;;  %3850 = vmatpush3.msra.mxu1 %v1725_v11 }
  0xd6   :  { %v5125_v17 = vadd.f32 %v837_v15, %v380_v12  ;;  %v1074_v12 = vld [vmem:[%s6381_s2 + $0x68] sm:$0xff]  ;;  %3851 = vmatprep.subr.mxu1 %v4360_v0 }
  0xd7   :  { %v3537_v18 = vpop.f32.mrf.mxu1  ;;  %v385_v19 = vpop.f32.mrf.mxu0  ;;  %3687 = vmatmul.mubr.msk.f32.gmra.mxu0 %vm1112_vm2, %v1065_v14 }
  0xd8   :  { %3689 = vmatprep.mubr.msk.f32.mxu0 %vm4361_vm1, %v4360_v0 }
  0xd9   :  { %v842_v21 = vpop.f32.mrf.mxu1  ;;  %v3391_v22 = vpop.f32.mrf.mxu0 }
  0xda   :  { %v5133_v23 = vadd.f32 %v842_v21, %v385_v19  ;;  %v1075_v19 = vld [vmem:[%s6381_s2 + $0x70] sm:$0xff] }
  0xdb   :  { %v3540_v24 = vpop.f32.mrf.mxu1  ;;  %v390_v25 = vpop.f32.mrf.mxu0  ;;  %3690 = vmatmul.mubr.msk.f32.gmra.mxu0 %vm1112_vm2, %v1066_v20 }
  0xdc   :  { %3692 = vmatprep.mubr.msk.f32.mxu0 %vm4361_vm1, %v4360_v0 }
  0xdd   :  { %v847_v27 = vpop.f32.mrf.mxu1  ;;  %v3394_v28 = vpop.f32.mrf.mxu0 }
  0xde   :  { %v5141_v29 = vadd.f32 %v847_v27, %v390_v25 }
  0xdf   :  { %v3543_v30 = vpop.f32.mrf.mxu1  ;;  %v395_v31 = vpop.f32.mrf.mxu0  ;;  %3693 = vmatmul.mubr.msk.f32.gmra.mxu0 %vm1112_vm2, %v1067_v26  ;;  %v1076_v26 = vld [vmem:[%s6381_s2 + $0x78] sm:$0xff] }
  0xe0   :  { %3695 = vmatprep.mubr.msk.f32.mxu0 %vm4361_vm1, %v4360_v0 }
  0xe1   :  { %v852_v34 = vpop.f32.mrf.mxu1  ;;  %v3397_v35 = vpop.f32.mrf.mxu0 }
  0xe2   :  { %v5153_v36 = vadd.f32 %v852_v34, %v395_v31  ;;  %v1077_v34 = vld [vmem:[%s6381_s2 + $0x80] sm:$0xff] }
  0xe3   :  { %v3546_v37 = vpop.f32.mrf.mxu1  ;;  %v400_v38 = vpop.f32.mrf.mxu0  ;;  %3696 = vmatmul.mubr.msk.f32.gmra.mxu0 %vm1112_vm2, %v1068_v33  ;;  %v1724_v33 = vld [vmem:[%s6380_s7] sm:$0xff] }
  0xe4   :  { %3698 = vmatprep.mubr.msk.f32.mxu0 %vm4361_vm1, %v4360_v0  ;;  %3852 = vmatpush3.msra.mxu1 %v1724_v33 }
  0xe5   :  { %v857_v40 = vpop.f32.mrf.mxu1  ;;  %v3400_v41 = vpop.f32.mrf.mxu0  ;;  %4179 = vmatprep.subr.mxu1 %v4360_v0 }
  0xe6   :  { %v5161_v42 = vadd.f32 %v857_v40, %v400_v38  ;;  %v1078_v41 = vld [vmem:[%s6381_s2 + $0x88] sm:$0xff] }
  0xe7   :  { %v3549_v43 = vpop.f32.mrf.mxu1  ;;  %v405_v44 = vpop.f32.mrf.mxu0  ;;  %3699 = vmatmul.mubr.msk.f32.gmra.mxu0 %vm1112_vm2, %v1069_v39 }
  0xe8   :  { %3701 = vmatprep.mubr.msk.f32.mxu0 %vm4361_vm1, %v4360_v0 }
  0xe9   :  { %v862_v46 = vpop.f32.mrf.mxu1  ;;  %v3403_v47 = vpop.f32.mrf.mxu0 }
  0xea   :  { %v5169_v48 = vadd.f32 %v862_v46, %v405_v44 }
  0xeb   :  { %v3552_v49 = vpop.f32.mrf.mxu1  ;;  %v410_v50 = vpop.f32.mrf.mxu0  ;;  %3702 = vmatmul.mubr.msk.f32.gmra.mxu0 %vm1112_vm2, %v1070_v45 }
  0xec   :  { %3704 = vmatprep.mubr.msk.f32.mxu0 %vm4361_vm1, %v4360_v0  ;;  %v1079_v49 = vld [vmem:[%s6381_s2 + $0x90] sm:$0xff] }
  0xed   :  { %v867_v53 = vpop.f32.mrf.mxu1  ;;  %v3406_v55 = vpop.f32.mrf.mxu0 }
  0xee   :  { %v5181_v56 = vadd.f32 %v867_v53, %v410_v50 }
  0xef   :  { %v3555_v57 = vpop.f32.mrf.mxu1  ;;  %v415_v58 = vpop.f32.mrf.mxu0  ;;  %3705 = vmatmul.mubr.msk.f32.gmra.mxu0 %vm1112_vm2, %v1071_v52 }
  0xf0   :  { %3707 = vmatprep.mubr.msk.f32.mxu0 %vm4361_vm1, %v4360_v0  ;;  %v1080_v57 = vld [vmem:[%s6381_s2 + $0x98] sm:$0xff] }
  0xf1   :  { %v872_v60 = vpop.f32.mrf.mxu1  ;;  %v3409_v62 = vpop.f32.mrf.mxu0 }
  0xf2   :  { %v5189_v63 = vadd.f32 %v872_v60, %v415_v58 }
  0xf3   :  { %v3558_v1 = vpop.f32.mrf.mxu1  ;;  %v420_v2 = vpop.f32.mrf.mxu0  ;;  %3708 = vmatmul.mubr.msk.f32.gmra.mxu0 %vm1112_vm2, %v1072_v59 }
  0xf4   :  { %3710 = vmatprep.mubr.msk.f32.mxu0 %vm4361_vm1, %v4360_v0 }
  0xf5   :  { %v877_v5 = vpop.f32.mrf.mxu1  ;;  %v3412_v6 = vpop.f32.mrf.mxu0 }
  0xf6   :  { %v5197_v7 = vadd.f32 %v877_v5, %v420_v2  ;;  %v1081_v2 = vld [vmem:[%s6381_s2 + $0xa0] sm:$0xff]  ;;  %v2121_v6 = vld [vmem:[%s6382_s9 + $0x78] sm:$0xff] }
  0xf7   :  { %v3561_v8 = vpop.f32.mrf.mxu1  ;;  %v425_v9 = vpop.f32.mrf.mxu0  ;;  %3711 = vmatmul.mubr.msk.f32.gmra.mxu0 %vm1112_vm2, %v1073_v3 }
  0xf8   :  { %3713 = vmatprep.mubr.msk.f32.mxu0 %vm4361_vm1, %v4360_v0  ;;  %4001 = vmatpush3.msra.mxu0 %v2121_v6 }
  0xf9   :  { %v882_v13 = vpop.f32.mrf.mxu1  ;;  %v3415_v14 = vpop.f32.mrf.mxu0  ;;  %4002 = vmatprep.subr.mxu0 %v4360_v0 }
  0xfa   :  { %v5209_v15 = vadd.f32 %v882_v13, %v425_v9 }
  0xfb   :  { %v3564_v16 = vpop.f32.mrf.mxu1  ;;  %v430_v18 = vpop.f32.mrf.mxu0  ;;  %3714 = vmatmul.mubr.msk.f32.gmra.mxu0 %vm1112_vm2, %v1074_v12  ;;  %v1082_v12 = vld [vmem:[%s6381_s2 + $0xa8] sm:$0xff] }
  0xfc   :  { %3716 = vmatprep.mubr.msk.f32.mxu0 %vm4361_vm1, %v4360_v0 }
  0xfd   :  { %v887_v20 = vpop.f32.mrf.mxu1  ;;  %v3418_v21 = vpop.f32.mrf.mxu0 }
  0xfe   :  { %v5217_v22 = vadd.f32 %v887_v20, %v430_v18  ;;  %v1083_v20 = vld [vmem:[%s6381_s2 + $0xb0] sm:$0xff] }
  0xff   :  { %v3567_v24 = vpop.f32.mrf.mxu1  ;;  %v435_v25 = vpop.f32.mrf.mxu0  ;;  %3717 = vmatmul.mubr.msk.f32.gmra.mxu0 %vm1112_vm2, %v1075_v19 }
 0x100   :  { %3719 = vmatprep.mubr.msk.f32.mxu0 %vm4361_vm1, %v4360_v0 }
 0x101   :  { %v892_v27 = vpop.f32.mrf.mxu1  ;;  %v3421_v28 = vpop.f32.mrf.mxu0 }
 0x102   :  { %v5225_v30 = vadd.f32 %v892_v27, %v435_v25  ;;  %v1084_v28 = vld [vmem:[%s6381_s2 + $0xb8] sm:$0xff] }
 0x103   :  { %v3570_v31 = vpop.f32.mrf.mxu1  ;;  %v440_v32 = vpop.f32.mrf.mxu0  ;;  %3720 = vmatmul.mubr.msk.f32.gmra.mxu0 %vm1112_vm2, %v1076_v26 }
 0x104   :  { %3722 = vmatprep.mubr.msk.f32.mxu0 %vm4361_vm1, %v4360_v0  ;;  %v2120_v31 = vld [vmem:[%s6382_s9 + $0x70] sm:$0xff] }
 0x105   :  { %v897_v35 = vpop.f32.mrf.mxu1  ;;  %v3424_v37 = vpop.f32.mrf.mxu0  ;;  %4003 = vmatpush3.msra.mxu0 %v2120_v31 }
 0x106   :  { %v5237_v38 = vadd.f32 %v897_v35, %v440_v32  ;;  %4004 = vmatprep.subr.mxu0 %v4360_v0 }
 0x107   :  { %v3573_v39 = vpop.f32.mrf.mxu1  ;;  %v445_v40 = vpop.f32.mrf.mxu0  ;;  %3723 = vmatmul.mubr.msk.f32.gmra.mxu0 %vm1112_vm2, %v1077_v34 }
 0x108   :  { %3725 = vmatprep.mubr.msk.f32.mxu0 %vm4361_vm1, %v4360_v0  ;;  %v1085_v39 = vld [vmem:[%s6381_s2 + $0xc0] sm:$0xff] }
 0x109   :  { %v902_v43 = vpop.f32.mrf.mxu1  ;;  %v3427_v44 = vpop.f32.mrf.mxu0 }
 0x10a   :  { %v5245_v45 = vadd.f32 %v902_v43, %v445_v40 }
 0x10b   :  { %v3576_v46 = vpop.f32.mrf.mxu1  ;;  %v450_v47 = vpop.f32.mrf.mxu0  ;;  %3726 = vmatmul.mubr.msk.f32.gmra.mxu0 %vm1112_vm2, %v1078_v41 }
 0x10c   :  { %3728 = vmatprep.mubr.msk.f32.mxu0 %vm4361_vm1, %v4360_v0 }
 0x10d   :  { %v907_v50 = vpop.f32.mrf.mxu1  ;;  %v3430_v51 = vpop.f32.mrf.mxu0 }
 0x10e   :  { %v5253_v52 = vadd.f32 %v907_v50, %v450_v47  ;;  %v1086_v47 = vld [vmem:[%s6381_s2 + $0xc8] sm:$0xff] }
 0x10f   :  { %v3579_v53 = vpop.f32.mrf.mxu1  ;;  %v455_v55 = vpop.f32.mrf.mxu0  ;;  %3729 = vmatmul.mubr.msk.f32.gmra.mxu0 %vm1112_vm2, %v1079_v49 }
 0x110   :  { %3731 = vmatprep.mubr.msk.f32.mxu0 %vm4361_vm1, %v4360_v0 }
 0x111   :  { %v912_v58 = vpop.f32.mrf.mxu1  ;;  %v3433_v59 = vpop.f32.mrf.mxu0 }
 0x112   :  { %v5261_v60 = vadd.f32 %v912_v58, %v455_v55  ;;  %v2119_v58 = vld [vmem:[%s6382_s9 + $0x68] sm:$0xff] }
 0x113   :  { %v3582_v62 = vpop.f32.mrf.mxu1  ;;  %v460_v1 = vpop.f32.mrf.mxu0  ;;  %3732 = vmatmul.mubr.msk.f32.gmra.mxu0 %vm1112_vm2, %v1080_v57  ;;  %v1087_v57 = vld [vmem:[%s6381_s2 + $0xd0] sm:$0xff] }
 0x114   :  { %3734 = vmatprep.mubr.msk.f32.mxu0 %vm4361_vm1, %v4360_v0  ;;  %4005 = vmatpush3.msra.mxu0 %v2119_v58  ;;  %v1093_v58 = vld [vmem:[%s6381_s2 + $0x100] sm:$0xff] }
 0x115   :  { %v917_v3 = vpop.f32.mrf.mxu1  ;;  %v3436_v5 = vpop.f32.mrf.mxu0  ;;  %4006 = vmatprep.subr.mxu0 %v4360_v0 }
 0x116   :  { %v5272_v8 = vadd.f32 %v917_v3, %v460_v1  ;;  %v1088_v5 = vld [vmem:[%s6381_s2 + $0xd8] sm:$0xff] }
 0x117   :  { %v3585_v9 = vpop.f32.mrf.mxu1  ;;  %v465_v11 = vpop.f32.mrf.mxu0  ;;  %3735 = vmatmul.mubr.msk.f32.gmra.mxu0 %vm1112_vm2, %v1081_v2 }
 0x118   :  { %3737 = vmatprep.mubr.msk.f32.mxu0 %vm4361_vm1, %v4360_v0 }
 0x119   :  { %v922_v13 = vpop.f32.mrf.mxu1  ;;  %v3439_v14 = vpop.f32.mrf.mxu0 }
 0x11a   :  { %v5281_v16 = vadd.f32 %v922_v13, %v465_v11  ;;  %v1089_v14 = vld [vmem:[%s6381_s2 + $0xe0] sm:$0xff] }
 0x11b   :  { %v3588_v18 = vpop.f32.mrf.mxu1  ;;  %v470_v19 = vpop.f32.mrf.mxu0  ;;  %3738 = vmatmul.mubr.msk.f32.gmra.mxu0 %vm1112_vm2, %v1082_v12 }
 0x11c   :  { %3740 = vmatprep.mubr.msk.f32.mxu0 %vm4361_vm1, %v4360_v0 }
 0x11d   :  { %v927_v21 = vpop.f32.mrf.mxu1  ;;  %v3442_v24 = vpop.f32.mrf.mxu0 }
 0x11e   :  { %v5289_v25 = vadd.f32 %v927_v21, %v470_v19 }
 0x11f   :  { %v3591_v26 = vpop.f32.mrf.mxu1  ;;  %v475_v27 = vpop.f32.mrf.mxu0  ;;  %3741 = vmatmul.mubr.msk.f32.gmra.mxu0 %vm1112_vm2, %v1083_v20 }
 0x120   :  { %3743 = vmatprep.mubr.msk.f32.mxu0 %vm4361_vm1, %v4360_v0  ;;  %v1090_v26 = vld [vmem:[%s6381_s2 + $0xe8] sm:$0xff] }
 0x121   :  { %v932_v32 = vpop.f32.mrf.mxu1  ;;  %v3445_v33 = vpop.f32.mrf.mxu0 }
 0x122   :  { %v5300_v34 = vadd.f32 %v932_v32, %v475_v27  ;;  %v2118_v27 = vld [vmem:[%s6382_s9 + $0x60] sm:$0xff] }
 0x123   :  { %v3594_v35 = vpop.f32.mrf.mxu1  ;;  %v480_v37 = vpop.f32.mrf.mxu0  ;;  %3744 = vmatmul.mubr.msk.f32.gmra.mxu0 %vm1112_vm2, %v1084_v28 }
 0x124   :  { %3746 = vmatprep.mubr.msk.f32.mxu0 %vm4361_vm1, %v4360_v0  ;;  %4007 = vmatpush3.msra.mxu0 %v2118_v27 }
 0x125   :  { %v937_v40 = vpop.f32.mrf.mxu1  ;;  %v3448_v41 = vpop.f32.mrf.mxu0  ;;  %4008 = vmatprep.subr.mxu0 %v4360_v0 }
 0x126   :  { %v5309_v43 = vadd.f32 %v937_v40, %v480_v37  ;;  %v1091_v37 = vld [vmem:[%s6381_s2 + $0xf0] sm:$0xff] }
 0x127   :  { %v3597_v44 = vpop.f32.mrf.mxu1  ;;  %v485_v46 = vpop.f32.mrf.mxu0  ;;  %3747 = vmatmul.mubr.msk.f32.gmra.mxu0 %vm1112_vm2, %v1085_v39 }
 0x128   :  { %3749 = vmatprep.mubr.msk.f32.mxu0 %vm4361_vm1, %v4360_v0 }
 0x129   :  { %v942_v49 = vpop.f32.mrf.mxu1  ;;  %v3451_v50 = vpop.f32.mrf.mxu0 }
 0x12a   :  { %v5317_v51 = vadd.f32 %v942_v49, %v485_v46 }
 0x12b   :  { %v3600_v53 = vpop.f32.mrf.mxu1  ;;  %v490_v55 = vpop.f32.mrf.mxu0  ;;  %3750 = vmatmul.mubr.msk.f32.gmra.mxu0 %vm1112_vm2, %v1086_v47  ;;  %v1092_v47 = vld [vmem:[%s6381_s2 + $0xf8] sm:$0xff] }
 0x12c   :  { %3752 = vmatprep.mubr.msk.f32.mxu0 %vm4361_vm1, %v4360_v0 }
 0x12d   :  { %v947_v59 = vpop.f32.mrf.mxu1  ;;  %v3454_v62 = vpop.f32.mrf.mxu0 }
 0x12e   :  { %v5328_v1 = vadd.f32 %v947_v59, %v490_v55  ;;  %v2117_v59 = vld [vmem:[%s6382_s9 + $0x58] sm:$0xff] }
 0x12f   :  { %v3603_v2 = vpop.f32.mrf.mxu1  ;;  %v495_v3 = vpop.f32.mrf.mxu0  ;;  %3753 = vmatmul.mubr.msk.f32.gmra.mxu0 %vm1112_vm2, %v1087_v57 }
 0x130   :  { %3755 = vmatprep.mubr.msk.f32.mxu0 %vm4361_vm1, %v4360_v0  ;;  %4009 = vmatpush3.msra.mxu0 %v2117_v59  ;;  %v1098_v59 = vld [vmem:[%s6381_s2 + $0x128] sm:$0xff] }
 0x131   :  { %v952_v6 = vpop.f32.mrf.mxu1  ;;  %v3457_v9 = vpop.f32.mrf.mxu0  ;;  %4010 = vmatprep.subr.mxu0 %v4360_v0 }
 0x132   :  { %v5337_v11 = vadd.f32 %v952_v6, %v495_v3  ;;  %v1094_v9 = vld [vmem:[%s6381_s2 + $0x108] sm:$0xff] }
 0x133   :  { %v3606_v12 = vpop.f32.mrf.mxu1  ;;  %v500_v13 = vpop.f32.mrf.mxu0  ;;  %3756 = vmatmul.mubr.msk.f32.gmra.mxu0 %vm1112_vm2, %v1088_v5 }
 0x134   :  { %3758 = vmatprep.mubr.msk.f32.mxu0 %vm4361_vm1, %v4360_v0 }
 0x135   :  { %v957_v18 = vpop.f32.mrf.mxu1  ;;  %v3460_v19 = vpop.f32.mrf.mxu0 }
 0x136   :  { %v5345_v20 = vadd.f32 %v957_v18, %v500_v13 }
 0x137   :  { %v3609_v21 = vpop.f32.mrf.mxu1  ;;  %v505_v24 = vpop.f32.mrf.mxu0  ;;  %3759 = vmatmul.mubr.msk.f32.gmra.mxu0 %vm1112_vm2, %v1089_v14 }
 0x138   :  { %3761 = vmatprep.mubr.msk.f32.mxu0 %vm4361_vm1, %v4360_v0  ;;  %v1095_v21 = vld [vmem:[%s6381_s2 + $0x110] sm:$0xff] }
 0x139   :  { %v962_v28 = vpop.f32.mrf.mxu1  ;;  %v3463_v31 = vpop.f32.mrf.mxu0 }
 0x13a   :  { %v5356_v32 = vadd.f32 %v962_v28, %v505_v24 }
 0x13b   :  { %v3612_v33 = vpop.f32.mrf.mxu1  ;;  %v510_v35 = vpop.f32.mrf.mxu0  ;;  %3762 = vmatmul.mubr.msk.f32.gmra.mxu0 %vm1112_vm2, %v1090_v26 }
 0x13c   :  { %3764 = vmatprep.mubr.msk.f32.mxu0 %vm4361_vm1, %v4360_v0  ;;  %v1096_v33 = vld [vmem:[%s6381_s2 + $0x118] sm:$0xff] }
 0x13d   :  { %v967_v39 = vpop.f32.mrf.mxu1  ;;  %v3466_v40 = vpop.f32.mrf.mxu0 }
 0x13e   :  { %v5365_v41 = vadd.f32 %v967_v39, %v510_v35  ;;  %v2116_v35 = vld [vmem:[%s6382_s9 + $0x50] sm:$0xff] }
 0x13f   :  { %v3615_v44 = vpop.f32.mrf.mxu1  ;;  %v515_v46 = vpop.f32.mrf.mxu0  ;;  %3765 = vmatmul.mubr.msk.f32.gmra.mxu0 %vm1112_vm2, %v1091_v37 }
 0x140   :  { %3767 = vmatprep.mubr.msk.f32.mxu0 %vm4361_vm1, %v4360_v0  ;;  %4011 = vmatpush3.msra.mxu0 %v2116_v35 }
 0x141   :  { %v972_v49 = vpop.f32.mrf.mxu1  ;;  %v3469_v50 = vpop.f32.mrf.mxu0  ;;  %4012 = vmatprep.subr.mxu0 %v4360_v0 }
 0x142   :  { %v5373_v53 = vadd.f32 %v972_v49, %v515_v46 }
 0x143   :  { %v3618_v55 = vpop.f32.mrf.mxu1  ;;  %v520_v57 = vpop.f32.mrf.mxu0  ;;  %3768 = vmatmul.mubr.msk.f32.gmra.mxu0 %vm1112_vm2, %v1092_v47  ;;  %v1097_v47 = vld [vmem:[%s6381_s2 + $0x120] sm:$0xff] }
 0x144   :  { %3770 = vmatprep.mubr.msk.f32.mxu0 %vm4361_vm1, %v4360_v0 }
 0x145   :  { %v977_v62 = vpop.f32.mrf.mxu1  ;;  %v3472_v2 = vpop.f32.mrf.mxu0 }
 0x146   :  { %v5384_v3 = vadd.f32 %v977_v62, %v520_v57 }
 0x147   :  { %v3621_v5 = vpop.f32.mrf.mxu1  ;;  %v525_v6 = vpop.f32.mrf.mxu0  ;;  %3771 = vmatmul.mubr.msk.f32.gmra.mxu0 %vm1112_vm2, %v1093_v58 }
 0x148   :  { %3773 = vmatprep.mubr.msk.f32.mxu0 %vm4361_vm1, %v4360_v0 }
 0x149   :  { %v982_v12 = vpop.f32.mrf.mxu1  ;;  %v3475_v13 = vpop.f32.mrf.mxu0 }
 0x14a   :  { %v5393_v14 = vadd.f32 %v982_v12, %v525_v6  ;;  %v1099_v12 = vld [vmem:[%s6381_s2 + $0x130] sm:$0xff]  ;;  %v2115_v13 = vld [vmem:[%s6382_s9 + $0x48] sm:$0xff] }
 0x14b   :  { %v3624_v18 = vpop.f32.mrf.mxu1  ;;  %v530_v19 = vpop.f32.mrf.mxu0  ;;  %3774 = vmatmul.mubr.msk.f32.gmra.mxu0 %vm1112_vm2, %v1094_v9 }
 0x14c   :  { %3776 = vmatprep.mubr.msk.f32.mxu0 %vm4361_vm1, %v4360_v0  ;;  %4013 = vmatpush3.msra.mxu0 %v2115_v13  ;;  %v1103_v13 = vld [vmem:[%s6381_s2 + $0x150] sm:$0xff] }
 0x14d   :  { %v987_v24 = vpop.f32.mrf.mxu1  ;;  %v3478_v26 = vpop.f32.mrf.mxu0  ;;  %4014 = vmatprep.subr.mxu0 %v4360_v0 }
 0x14e   :  { %v5401_v27 = vadd.f32 %v987_v24, %v530_v19 }
 0x14f   :  { %v3627_v28 = vpop.f32.mrf.mxu1  ;;  %v535_v31 = vpop.f32.mrf.mxu0  ;;  %3777 = vmatmul.mubr.msk.f32.gmra.mxu0 %vm1112_vm2, %v1095_v21 }
 0x150   :  { %3779 = vmatprep.mubr.msk.f32.mxu0 %vm4361_vm1, %v4360_v0  ;;  %v1100_v28 = vld [vmem:[%s6381_s2 + $0x138] sm:$0xff] }
 0x151   :  { %v992_v37 = vpop.f32.mrf.mxu1  ;;  %v3481_v39 = vpop.f32.mrf.mxu0 }
 0x152   :  { %v5412_v40 = vadd.f32 %v992_v37, %v535_v31 }
 0x153   :  { %v3630_v44 = vpop.f32.mrf.mxu1  ;;  %v540_v46 = vpop.f32.mrf.mxu0  ;;  %3780 = vmatmul.mubr.msk.f32.gmra.mxu0 %vm1112_vm2, %v1096_v33 }
 0x154   :  { %3782 = vmatprep.mubr.msk.f32.mxu0 %vm4361_vm1, %v4360_v0  ;;  %v1101_v44 = vld [vmem:[%s6381_s2 + $0x140] sm:$0xff] }
 0x155   :  { %v997_v49 = vpop.f32.mrf.mxu1  ;;  %v3484_v50 = vpop.f32.mrf.mxu0 }
 0x156   :  { %v5421_v55 = vadd.f32 %v997_v49, %v540_v46 }
 0x157   :  { %v3633_v57 = vpop.f32.mrf.mxu1  ;;  %v545_v58 = vpop.f32.mrf.mxu0  ;;  %3783 = vmatmul.mubr.msk.f32.gmra.mxu0 %vm1112_vm2, %v1097_v47 }
 0x158   :  { %3785 = vmatprep.mubr.msk.f32.mxu0 %vm4361_vm1, %v4360_v0 }
 0x159   :  { %v1002_v62 = vpop.f32.mrf.mxu1  ;;  %v3487_v2 = vpop.f32.mrf.mxu0 }
 0x15a   :  { %v5429_v5 = vadd.f32 %v1002_v62, %v545_v58  ;;  %v1102_v58 = vld [vmem:[%s6381_s2 + $0x148] sm:$0xff] }
 0x15b   :  { %v3636_v6 = vpop.f32.mrf.mxu1  ;;  %v550_v9 = vpop.f32.mrf.mxu0  ;;  %3786 = vmatmul.mubr.msk.f32.gmra.mxu0 %vm1112_vm2, %v1098_v59  ;;  %v2114_v59 = vld [vmem:[%s6382_s9 + $0x40] sm:$0xff] }
 0x15c   :  { %3788 = vmatprep.mubr.msk.f32.mxu0 %vm4361_vm1, %v4360_v0  ;;  %4015 = vmatpush3.msra.mxu0 %v2114_v59 }
 0x15d   :  { %v1007_v18 = vpop.f32.mrf.mxu1  ;;  %v3490_v19 = vpop.f32.mrf.mxu0  ;;  %4016 = vmatprep.subr.mxu0 %v4360_v0 }
 0x15e   :  { %v5440_v21 = vadd.f32 %v1007_v18, %v550_v9 }
 0x15f   :  { %v3639_v24 = vpop.f32.mrf.mxu1  ;;  %v555_v26 = vpop.f32.mrf.mxu0  ;;  %3789 = vmatmul.mubr.msk.f32.gmra.mxu0 %vm1112_vm2, %v1099_v12 }
 0x160   :  { %3791 = vmatprep.mubr.msk.f32.mxu0 %vm4361_vm1, %v4360_v0 }
 0x161   :  { %v1012_v31 = vpop.f32.mrf.mxu1  ;;  %v3493_v33 = vpop.f32.mrf.mxu0 }
 0x162   :  { %v5449_v35 = vadd.f32 %v1012_v31, %v555_v26  ;;  %v1104_v31 = vld [vmem:[%s6381_s2 + $0x158] sm:$0xff] }
 0x163   :  { %v3642_v37 = vpop.f32.mrf.mxu1  ;;  %v560_v39 = vpop.f32.mrf.mxu0  ;;  %3792 = vmatmul.mubr.msk.f32.gmra.mxu0 %vm1112_vm2, %v1100_v28 }
 0x164   :  { %3794 = vmatprep.mubr.msk.f32.mxu0 %vm4361_vm1, %v4360_v0 }
 0x165   :  { %v1017_v46 = vpop.f32.mrf.mxu1  ;;  %v3496_v47 = vpop.f32.mrf.mxu0 }
 0x166   :  { %v5457_v49 = vadd.f32 %v1017_v46, %v560_v39  ;;  %v1105_v47 = vld [vmem:[%s6381_s2 + $0x160] sm:$0xff] }
 0x167   :  { %v3645_v50 = vpop.f32.mrf.mxu1  ;;  %v565_v57 = vpop.f32.mrf.mxu0  ;;  %3795 = vmatmul.mubr.msk.f32.gmra.mxu0 %vm1112_vm2, %v1101_v44 }
 0x168   :  { %3797 = vmatprep.mubr.msk.f32.mxu0 %vm4361_vm1, %v4360_v0  ;;  %v2113_v50 = vld [vmem:[%s6382_s9 + $0x38] sm:$0xff] }
 0x169   :  { %v1022_v62 = vpop.f32.mrf.mxu1  ;;  %v3499_v2 = vpop.f32.mrf.mxu0  ;;  %4017 = vmatpush3.msra.mxu0 %v2113_v50 }
 0x16a   :  { %v5468_v6 = vadd.f32 %v1022_v62, %v565_v57  ;;  %4018 = vmatprep.subr.mxu0 %v4360_v0 }
 0x16b   :  { %v3648_v9 = vpop.f32.mrf.mxu1  ;;  %v570_v12 = vpop.f32.mrf.mxu0  ;;  %3798 = vmatmul.mubr.msk.f32.gmra.mxu0 %vm1112_vm2, %v1102_v58 }
 0x16c   :  { %3800 = vmatprep.mubr.msk.f32.mxu0 %vm4361_vm1, %v4360_v0  ;;  %v1106_v9 = vld [vmem:[%s6381_s2 + $0x168] sm:$0xff] }
 0x16d   :  { %v1027_v18 = vpop.f32.mrf.mxu1  ;;  %v3502_v19 = vpop.f32.mrf.mxu0 }
 0x16e   :  { %v5477_v24 = vadd.f32 %v1027_v18, %v570_v12 }
 0x16f   :  { %v3651_v26 = vpop.f32.mrf.mxu1  ;;  %v575_v28 = vpop.f32.mrf.mxu0  ;;  %3801 = vmatmul.mubr.msk.f32.gmra.mxu0 %vm1112_vm2, %v1103_v13 }
 0x170   :  { %3803 = vmatprep.mubr.msk.f32.mxu0 %vm4361_vm1, %v4360_v0 }
 0x171   :  { %v1032_v33 = vpop.f32.mrf.mxu1  ;;  %v3505_v37 = vpop.f32.mrf.mxu0 }
 0x172   :  { %v5485_v39 = vadd.f32 %v1032_v33, %v575_v28  ;;  %v1107_v28 = vld [vmem:[%s6381_s2 + $0x170] sm:$0xff] }
 0x173   :  { %v3654_v44 = vpop.f32.mrf.mxu1  ;;  %v580_v46 = vpop.f32.mrf.mxu0  ;;  %3804 = vmatmul.mubr.msk.f32.gmra.mxu0 %vm1112_vm2, %v1104_v31 }
 0x174   :  { %3806 = vmatprep.mubr.msk.f32.mxu0 %vm4361_vm1, %v4360_v0 }
 0x175   :  { %v1037_v57 = vpop.f32.mrf.mxu1  ;;  %v3508_v58 = vpop.f32.mrf.mxu0 }
 0x176   :  { %v5496_v59 = vadd.f32 %v1037_v57, %v580_v46 }
 0x177   :  { %v3657_v62 = vpop.f32.mrf.mxu1  ;;  %v585_v2 = vpop.f32.mrf.mxu0  ;;  %3807 = vmatmul.mubr.msk.f32.gmra.mxu0 %vm1112_vm2, %v1105_v47  ;;  %v1108_v47 = vld [vmem:[%s6381_s2 + $0x178] sm:$0xff] }
 0x178   :  { %3809 = vmatprep.mubr.msk.f32.mxu0 %vm4361_vm1, %v4360_v0 }
 0x179   :  { %v1042_v12 = vpop.f32.mrf.mxu1  ;;  %v3511_v13 = vpop.f32.mrf.mxu0 }
 0x17a   :  { %v5505_v18 = vadd.f32 %v1042_v12, %v585_v2  ;;  %v2112_v12 = vld [vmem:[%s6382_s9 + $0x30] sm:$0xff] }
 0x17b   :  { %v3660_v19 = vpop.f32.mrf.mxu1  ;;  %v590_v26 = vpop.f32.mrf.mxu0  ;;  %3810 = vmatmul.mubr.msk.f32.gmra.mxu0 %vm1112_vm2, %v1106_v9  ;;  %v1109_v9 = vld [vmem:[%s6381_s2 + $0x180] sm:$0xff] }
 0x17c   :  { %3812 = vmatprep.mubr.msk.f32.mxu0 %vm4361_vm1, %v4360_v0  ;;  %4019 = vmatpush3.msra.mxu0 %v2112_v12 }
 0x17d   :  { %v1047_v31 = vpop.f32.mrf.mxu1  ;;  %v3514_v33 = vpop.f32.mrf.mxu0  ;;  %4020 = vmatprep.subr.mxu0 %v4360_v0 }
 0x17e   :  { %v5513_v37 = vadd.f32 %v1047_v31, %v590_v26  ;;  %v5538_v31 = vld [vmem:[%s6383_s6] ss:$0 sm:$0xff] }
 0x17f   :  { %v3663_v44 = vpop.f32.mrf.mxu1  ;;  %v595_v46 = vpop.f32.mrf.mxu0  ;;  %3813 = vmatmul.mubr.msk.f32.gmra.mxu0 %vm1112_vm2, %v1107_v28 }
 0x180   :  { %3815 = vmatprep.mubr.msk.f32.mxu0 %vm4361_vm1, %v4360_v0 }
 0x181   :  { %v1052_v50 = vpop.f32.mrf.mxu1  ;;  %v3517_v57 = vpop.f32.mrf.mxu0 }
 0x182   :  { %v5521_v58 = vadd.f32 %v1052_v50, %v595_v46 }
 0x183   :  { %v3666_v62 = vpop.f32.mrf.mxu1  ;;  %v600_v2 = vpop.f32.mrf.mxu0  ;;  %3816 = vmatmul.mubr.msk.f32.gmra.mxu0 %vm1112_vm2, %v1108_v47 }
 0x184   :  { %3818 = vmatprep.mubr.msk.f32.mxu0 %vm4361_vm1, %v4360_v0 }
 0x185   :  { %v1057_v13 = vpop.f32.mrf.mxu1  ;;  %v3520_v19 = vpop.f32.mrf.mxu0 }
 0x186   :  { %v5532_v26 = vadd.f32 %v1057_v13, %v600_v2  ;;  %v2111_v19 = vld [vmem:[%s6382_s9 + $0x28] sm:$0xff] }
 0x187   :  { %v1326_v28 = vpop.f32.mrf.mxu0  ;;  %3819 = vmatmul.mubr.msk.f32.gmra.mxu0 %vm1112_vm2, %v1109_v9  ;;  %v3669_v33 = vpop.f32.mrf.mxu1 }
 0x188   :  { %v1570_v44 = vadd.f32 %v1326_v28, %v5083_v54  ;;  %4032 = vmatprep.mubr.msk.f32.mxu0 %vm4361_vm1, %v4360_v0  ;;  %4021 = vmatpush3.msra.mxu0 %v2111_v19 }
 0x189   :  { %v3676_v46 = vpop.f32.mrf.mxu0  ;;  %4022 = vmatprep.subr.mxu0 %v4360_v0 }
 0x18a   :  { %v1626_v47 = vadd.f32 %v5538_v31, %v1570_v44 }
 0x18b   :  { %v1331_v50 = vpop.f32.mrf.mxu0 }
 0x18c   :  { %v1675_v57 = vmax.f32 %v1626_v47, 0.0  ;;  %v1571_v62 = vadd.f32 %v1331_v50, %v5097_v61 }
 0x18d   :  { %v3679_v2 = vpop.f32.mrf.mxu0 }
 0x18e   :  { %v1627_v12 = vadd.f32 %v5538_v31, %v1571_v62  ;;  %3854 = vmatmul.mubr.f32.vlgmr.msra.gmra.mxu1 %v1675_v57 }
 0x18f   :  { %v1336_v13 = vpop.f32.mrf.mxu0  ;;  %3856 = vmatprep.mubr.msk.f32.mxu1 %vm4361_vm1, %v4360_v0 }
 0x190   :  { %v1676_v9 = vmax.f32 %v1627_v12, 0.0  ;;  %v1572_v54 = vadd.f32 %v1336_v13, %v5105_v4 }
 0x191   :  { %v3682_v28 = vpop.f32.mrf.mxu0 }
 0x192   :  { %v1628_v33 = vadd.f32 %v5538_v31, %v1572_v54  ;;  %3857 = vmatmul.mubr.f32.gmra.mxu1 %v1676_v9  ;;  %v2110_v54 = vld [vmem:[%s6382_s9 + $0x20] sm:$0xff] }
 0x193   :  { %v1341_v61 = vpop.f32.mrf.mxu0  ;;  %3859 = vmatprep.mubr.msk.f32.mxu1 %vm4361_vm1, %v4360_v0  ;;  %4023 = vmatpush3.msra.mxu0 %v2110_v54 }
 0x194   :  { %v1677_v44 = vmax.f32 %v1628_v33, 0.0  ;;  %v1573_v46 = vadd.f32 %v1341_v61, %v5113_v10  ;;  %4024 = vmatprep.subr.mxu0 %v4360_v0 }
 0x195   :  { %v3685_v47 = vpop.f32.mrf.mxu0 }
 0x196   :  { %v1629_v4 = vadd.f32 %v5538_v31, %v1573_v46  ;;  %3860 = vmatmul.mubr.f32.gmra.mxu1 %v1677_v44 }
 0x197   :  { %v1346_v50 = vpop.f32.mrf.mxu0  ;;  %3862 = vmatprep.mubr.msk.f32.mxu1 %vm4361_vm1, %v4360_v0 }
 0x198   :  { %v1678_v57 = vmax.f32 %v1629_v4, 0.0  ;;  %v1574_v62 = vadd.f32 %v1346_v50, %v5125_v17 }
 0x199   :  { %v3688_v2 = vpop.f32.mrf.mxu0 }
 0x19a   :  { %v1630_v12 = vadd.f32 %v5538_v31, %v1574_v62  ;;  %3863 = vmatmul.mubr.f32.gmra.mxu1 %v1678_v57 }
 0x19b   :  { %v1351_v13 = vpop.f32.mrf.mxu0  ;;  %3865 = vmatprep.mubr.msk.f32.mxu1 %vm4361_vm1, %v4360_v0 }
 0x19c   :  { %v1679_v10 = vmax.f32 %v1630_v12, 0.0  ;;  %v1575_v9 = vadd.f32 %v1351_v13, %v5133_v23  ;;  %v2109_v12 = vld [vmem:[%s6382_s9 + $0x18] sm:$0xff] }
 0x19d   :  { %v3691_v19 = vpop.f32.mrf.mxu0  ;;  %4025 = vmatpush3.msra.mxu0 %v2109_v12 }
 0x19e   :  { %v1631_v28 = vadd.f32 %v5538_v31, %v1575_v9  ;;  %3866 = vmatmul.mubr.f32.gmra.mxu1 %v1679_v10  ;;  %4026 = vmatprep.subr.mxu0 %v4360_v0 }
 0x19f   :  { %v1356_v17 = vpop.f32.mrf.mxu0  ;;  %3868 = vmatprep.mubr.msk.f32.mxu1 %vm4361_vm1, %v4360_v0 }
 0x1a0   :  { %v1680_v33 = vmax.f32 %v1631_v28, 0.0  ;;  %v1576_v61 = vadd.f32 %v1356_v17, %v5141_v29 }
 0x1a1   :  { %v3694_v44 = vpop.f32.mrf.mxu0 }
 0x1a2   :  { %v1632_v23 = vadd.f32 %v5538_v31, %v1576_v61  ;;  %3869 = vmatmul.mubr.f32.gmra.mxu1 %v1680_v33 }
 0x1a3   :  { %v1361_v46 = vpop.f32.mrf.mxu0  ;;  %3871 = vmatprep.mubr.msk.f32.mxu1 %vm4361_vm1, %v4360_v0 }
 0x1a4   :  { %v1681_v47 = vmax.f32 %v1632_v23, 0.0  ;;  %v1577_v4 = vadd.f32 %v1361_v46, %v5153_v36 }
 0x1a5   :  { %v3697_v50 = vpop.f32.mrf.mxu0 }
 0x1a6   :  { %v1633_v57 = vadd.f32 %v5538_v31, %v1577_v4  ;;  %3872 = vmatmul.mubr.f32.gmra.mxu1 %v1681_v47  ;;  %v2108_v47 = vld [vmem:[%s6382_s9 + $0x10] sm:$0xff] }
 0x1a7   :  { %v1366_v62 = vpop.f32.mrf.mxu0  ;;  %3874 = vmatprep.mubr.msk.f32.mxu1 %vm4361_vm1, %v4360_v0  ;;  %4027 = vmatpush3.msra.mxu0 %v2108_v47 }
 0x1a8   :  { %v1682_v29 = vmax.f32 %v1633_v57, 0.0  ;;  %v1578_v2 = vadd.f32 %v1366_v62, %v5161_v42  ;;  %4028 = vmatprep.subr.mxu0 %v4360_v0 }
 0x1a9   :  { %v3700_v13 = vpop.f32.mrf.mxu0 }
 0x1aa   :  { %v1634_v10 = vadd.f32 %v5538_v31, %v1578_v2  ;;  %3875 = vmatmul.mubr.f32.gmra.mxu1 %v1682_v29 }
 0x1ab   :  { %v1371_v36 = vpop.f32.mrf.mxu0  ;;  %3877 = vmatprep.mubr.msk.f32.mxu1 %vm4361_vm1, %v4360_v0 }
 0x1ac   :  { %v1683_v9 = vmax.f32 %v1634_v10, 0.0  ;;  %v1579_v54 = vadd.f32 %v1371_v36, %v5169_v48 }
 0x1ad   :  { %v3703_v19 = vpop.f32.mrf.mxu0 }
 0x1ae   :  { %v1635_v42 = vadd.f32 %v5538_v31, %v1579_v54  ;;  %3878 = vmatmul.mubr.f32.gmra.mxu1 %v1683_v9  ;;  %v2107_v19 = vld [vmem:[%s6382_s9 + $0x8] sm:$0xff] }
 0x1af   :  { %v1376_v28 = vpop.f32.mrf.mxu0  ;;  %3880 = vmatprep.mubr.msk.f32.mxu1 %vm4361_vm1, %v4360_v0  ;;  %4029 = vmatpush3.msra.mxu0 %v2107_v19 }
 0x1b0   :  { %v1684_v17 = vmax.f32 %v1635_v42, 0.0  ;;  %v1580_v33 = vadd.f32 %v1376_v28, %v5181_v56  ;;  %4030 = vmatprep.subr.mxu0 %v4360_v0 }
 0x1b1   :  { %v3706_v61 = vpop.f32.mrf.mxu0 }
 0x1b2   :  { %v1636_v44 = vadd.f32 %v5538_v31, %v1580_v33  ;;  %3881 = vmatmul.mubr.f32.gmra.mxu1 %v1684_v17 }
 0x1b3   :  { %v1381_v23 = vpop.f32.mrf.mxu0  ;;  %3883 = vmatprep.mubr.msk.f32.mxu1 %vm4361_vm1, %v4360_v0 }
 0x1b4   :  { %v1685_v48 = vmax.f32 %v1636_v44, 0.0  ;;  %v1581_v46 = vadd.f32 %v1381_v23, %v5189_v63 }
 0x1b5   :  { %v3709_v4 = vpop.f32.mrf.mxu0 }
 0x1b6   :  { %v1637_v50 = vadd.f32 %v5538_v31, %v1581_v46  ;;  %3884 = vmatmul.mubr.f32.gmra.mxu1 %v1685_v48 }
 0x1b7   :  { %v1386_v56 = vpop.f32.mrf.mxu0  ;;  %3886 = vmatprep.mubr.msk.f32.mxu1 %vm4361_vm1, %v4360_v0 }
 0x1b8   :  { %v1686_v57 = vmax.f32 %v1637_v50, 0.0  ;;  %v1582_v62 = vadd.f32 %v1386_v56, %v5197_v7  ;;  %v2106_v56 = vld [vmem:[%s6382_s9] sm:$0xff] }
 0x1b9   :  { %v3712_v29 = vpop.f32.mrf.mxu0  ;;  %4031 = vmatpush3.msra.mxu0 %v2106_v56 }
 0x1ba   :  { %v1638_v63 = vadd.f32 %v5538_v31, %v1582_v62  ;;  %3887 = vmatmul.mubr.f32.gmra.mxu1 %v1686_v57 }
 0x1bb   :  { %v1391_v2 = vpop.f32.mrf.mxu0  ;;  %3889 = vmatprep.mubr.msk.f32.mxu1 %vm4361_vm1, %v4360_v0 }
 0x1bc   :  { %v1687_v12 = vmax.f32 %v1638_v63, 0.0  ;;  %v1583_v13 = vadd.f32 %v1391_v2, %v5209_v15 }
 0x1bd   :  { %v3715_v10 = vpop.f32.mrf.mxu0 }
 0x1be   :  { %v1639_v36 = vadd.f32 %v5538_v31, %v1583_v13  ;;  %3890 = vmatmul.mubr.f32.gmra.mxu1 %v1687_v12 }
 0x1bf   :  { %v1396_v9 = vpop.f32.mrf.mxu0  ;;  %3892 = vmatprep.mubr.msk.f32.mxu1 %vm4361_vm1, %v4360_v0 }
 0x1c0   :  { %v1688_v7 = vmax.f32 %v1639_v36, 0.0  ;;  %v1584_v54 = vadd.f32 %v1396_v9, %v5217_v22 }
 0x1c1   :  { %v3718_v42 = vpop.f32.mrf.mxu0 }
 0x1c2   :  { %v1640_v28 = vadd.f32 %v5538_v31, %v1584_v54  ;;  %3893 = vmatmul.mubr.f32.gmra.mxu1 %v1688_v7  ;;  %v2503_v7 = vld [vmem:[%s6384_s11 + $0x78] sm:$0xff] }
 0x1c3   :  { %v1401_v15 = vpop.f32.mrf.mxu0  ;;  %3895 = vmatprep.mubr.msk.f32.mxu1 %vm4361_vm1, %v4360_v0  ;;  %4180 = vmatpush3.msra.mxu1 %v2503_v7 }
 0x1c4   :  { %v1689_v17 = vmax.f32 %v1640_v28, 0.0  ;;  %v1585_v33 = vadd.f32 %v1401_v15, %v5225_v30  ;;  %4181 = vmatprep.subr.mxu1 %v4360_v0 }
 0x1c5   :  { %v3721_v61 = vpop.f32.mrf.mxu0 }
 0x1c6   :  { %v1641_v22 = vadd.f32 %v5538_v31, %v1585_v33  ;;  %3896 = vmatmul.mubr.f32.gmra.mxu1 %v1689_v17 }
 0x1c7   :  { %v1406_v44 = vpop.f32.mrf.mxu0  ;;  %3898 = vmatprep.mubr.msk.f32.mxu1 %vm4361_vm1, %v4360_v0 }
 0x1c8   :  { %v1690_v23 = vmax.f32 %v1641_v22, 0.0  ;;  %v1586_v48 = vadd.f32 %v1406_v44, %v5237_v38 }
 0x1c9   :  { %v3724_v46 = vpop.f32.mrf.mxu0 }
 0x1ca   :  { %v1642_v47 = vadd.f32 %v5538_v31, %v1586_v48  ;;  %3899 = vmatmul.mubr.f32.gmra.mxu1 %v1690_v23 }
 0x1cb   :  { %v1411_v4 = vpop.f32.mrf.mxu0  ;;  %3901 = vmatprep.mubr.msk.f32.mxu1 %vm4361_vm1, %v4360_v0 }
 0x1cc   :  { %v1691_v30 = vmax.f32 %v1642_v47, 0.0  ;;  %v1587_v50 = vadd.f32 %v1411_v4, %v5245_v45 }
 0x1cd   :  { %v3727_v57 = vpop.f32.mrf.mxu0 }
 0x1ce   :  { %v1643_v62 = vadd.f32 %v5538_v31, %v1587_v50  ;;  %3902 = vmatmul.mubr.f32.gmra.mxu1 %v1691_v30  ;;  %v2502_v30 = vld [vmem:[%s6384_s11 + $0x70] sm:$0xff] }
 0x1cf   :  { %v1416_v38 = vpop.f32.mrf.mxu0  ;;  %3904 = vmatprep.mubr.msk.f32.mxu1 %vm4361_vm1, %v4360_v0  ;;  %4182 = vmatpush3.msra.mxu1 %v2502_v30 }
 0x1d0   :  { %v1692_v29 = vmax.f32 %v1643_v62, 0.0  ;;  %v1588_v63 = vadd.f32 %v1416_v38, %v5253_v52  ;;  %4183 = vmatprep.subr.mxu1 %v4360_v0 }
 0x1d1   :  { %v3730_v2 = vpop.f32.mrf.mxu0 }
 0x1d2   :  { %v1644_v12 = vadd.f32 %v5538_v31, %v1588_v63  ;;  %3905 = vmatmul.mubr.f32.gmra.mxu1 %v1692_v29 }
 0x1d3   :  { %v1421_v45 = vpop.f32.mrf.mxu0  ;;  %3907 = vmatprep.mubr.msk.f32.mxu1 %vm4361_vm1, %v4360_v0 }
 0x1d4   :  { %v1693_v13 = vmax.f32 %v1644_v12, 0.0  ;;  %v1589_v10 = vadd.f32 %v1421_v45, %v5261_v60 }
 0x1d5   :  { %v3733_v36 = vpop.f32.mrf.mxu0 }
 0x1d6   :  { %v1645_v9 = vadd.f32 %v5538_v31, %v1589_v10  ;;  %3908 = vmatmul.mubr.f32.gmra.mxu1 %v1693_v13  ;;  %v2501_v36 = vld [vmem:[%s6384_s11 + $0x68] sm:$0xff] }
 0x1d7   :  { %v1426_v52 = vpop.f32.mrf.mxu0  ;;  %3910 = vmatprep.mubr.msk.f32.mxu1 %vm4361_vm1, %v4360_v0  ;;  %4184 = vmatpush3.msra.mxu1 %v2501_v36 }
 0x1d8   :  { %v1694_v54 = vmax.f32 %v1645_v9, 0.0  ;;  %v1590_v19 = vadd.f32 %v1426_v52, %v5272_v8  ;;  %4185 = vmatprep.subr.mxu1 %v4360_v0 }
 0x1d9   :  { %v3736_v42 = vpop.f32.mrf.mxu0 }
 0x1da   :  { %v1646_v60 = vadd.f32 %v5538_v31, %v1590_v19  ;;  %3911 = vmatmul.mubr.f32.gmra.mxu1 %v1694_v54 }
 0x1db   :  { %v1431_v28 = vpop.f32.mrf.mxu0  ;;  %3913 = vmatprep.mubr.msk.f32.mxu1 %vm4361_vm1, %v4360_v0 }
 0x1dc   :  { %v1695_v15 = vmax.f32 %v1646_v60, 0.0  ;;  %v1591_v17 = vadd.f32 %v1431_v28, %v5281_v16 }
 0x1dd   :  { %v3739_v33 = vpop.f32.mrf.mxu0 }
 0x1de   :  { %v1647_v61 = vadd.f32 %v5538_v31, %v1591_v17  ;;  %3914 = vmatmul.mubr.f32.gmra.mxu1 %v1695_v15 }
 0x1df   :  { %v1436_v22 = vpop.f32.mrf.mxu0  ;;  %3916 = vmatprep.mubr.msk.f32.mxu1 %vm4361_vm1, %v4360_v0 }
 0x1e0   :  { %v1696_v8 = vmax.f32 %v1647_v61, 0.0  ;;  %v1592_v44 = vadd.f32 %v1436_v22, %v5289_v25  ;;  %v2500_v22 = vld [vmem:[%s6384_s11 + $0x60] sm:$0xff] }
 0x1e1   :  { %v3742_v23 = vpop.f32.mrf.mxu0  ;;  %4186 = vmatpush3.msra.mxu1 %v2500_v22 }
 0x1e2   :  { %v1648_v48 = vadd.f32 %v5538_v31, %v1592_v44  ;;  %3917 = vmatmul.mubr.f32.gmra.mxu1 %v1696_v8  ;;  %4187 = vmatprep.subr.mxu1 %v4360_v0 }
 0x1e3   :  { %v1441_v46 = vpop.f32.mrf.mxu0  ;;  %3919 = vmatprep.mubr.msk.f32.mxu1 %vm4361_vm1, %v4360_v0 }
 0x1e4   :  { %v1697_v16 = vmax.f32 %v1648_v48, 0.0  ;;  %v1593_v47 = vadd.f32 %v1441_v46, %v5300_v34 }
 0x1e5   :  { %v3745_v4 = vpop.f32.mrf.mxu0 }
 0x1e6   :  { %v1649_v50 = vadd.f32 %v5538_v31, %v1593_v47  ;;  %3920 = vmatmul.mubr.f32.gmra.mxu1 %v1697_v16 }
 0x1e7   :  { %v1446_v25 = vpop.f32.mrf.mxu0  ;;  %3922 = vmatprep.mubr.msk.f32.mxu1 %vm4361_vm1, %v4360_v0 }
 0x1e8   :  { %v1698_v56 = vmax.f32 %v1649_v50, 0.0  ;;  %v1594_v57 = vadd.f32 %v1446_v25, %v5309_v43 }
 0x1e9   :  { %v3748_v62 = vpop.f32.mrf.mxu0 }
 0x1ea   :  { %v1650_v34 = vadd.f32 %v5538_v31, %v1594_v57  ;;  %3923 = vmatmul.mubr.f32.gmra.mxu1 %v1698_v56  ;;  %v2499_v57 = vld [vmem:[%s6384_s11 + $0x58] sm:$0xff] }
 0x1eb   :  { %v1451_v38 = vpop.f32.mrf.mxu0  ;;  %3925 = vmatprep.mubr.msk.f32.mxu1 %vm4361_vm1, %v4360_v0  ;;  %4188 = vmatpush3.msra.mxu1 %v2499_v57 }
 0x1ec   :  { %v1699_v29 = vmax.f32 %v1650_v34, 0.0  ;;  %v1595_v63 = vadd.f32 %v1451_v38, %v5317_v51  ;;  %4189 = vmatprep.subr.mxu1 %v4360_v0 }
 0x1ed   :  { %v3751_v2 = vpop.f32.mrf.mxu0 }
 0x1ee   :  { %v1651_v12 = vadd.f32 %v5538_v31, %v1595_v63  ;;  %3926 = vmatmul.mubr.f32.gmra.mxu1 %v1699_v29 }
 0x1ef   :  { %v1456_v45 = vpop.f32.mrf.mxu0  ;;  %3928 = vmatprep.mubr.msk.f32.mxu1 %vm4361_vm1, %v4360_v0 }
 0x1f0   :  { %v1700_v43 = vmax.f32 %v1651_v12, 0.0  ;;  %v1596_v13 = vadd.f32 %v1456_v45, %v5328_v1 }
 0x1f1   :  { %v3754_v10 = vpop.f32.mrf.mxu0 }
 0x1f2   :  { %v1652_v9 = vadd.f32 %v5538_v31, %v1596_v13  ;;  %3929 = vmatmul.mubr.f32.gmra.mxu1 %v1700_v43 }
 0x1f3   :  { %v1461_v51 = vpop.f32.mrf.mxu0  ;;  %3931 = vmatprep.mubr.msk.f32.mxu1 %vm4361_vm1, %v4360_v0 }
 0x1f4   :  { %v1701_v7 = vmax.f32 %v1652_v9, 0.0  ;;  %v1597_v52 = vadd.f32 %v1461_v51, %v5337_v11  ;;  %v2498_v9 = vld [vmem:[%s6384_s11 + $0x50] sm:$0xff] }
 0x1f5   :  { %v3757_v54 = vpop.f32.mrf.mxu0  ;;  %4190 = vmatpush3.msra.mxu1 %v2498_v9 }
 0x1f6   :  { %v1653_v1 = vadd.f32 %v5538_v31, %v1597_v52  ;;  %3932 = vmatmul.mubr.f32.gmra.mxu1 %v1701_v7  ;;  %4191 = vmatprep.subr.mxu1 %v4360_v0 }
 0x1f7   :  { %v1466_v19 = vpop.f32.mrf.mxu0  ;;  %3934 = vmatprep.mubr.msk.f32.mxu1 %vm4361_vm1, %v4360_v0 }
 0x1f8   :  { %v1702_v42 = vmax.f32 %v1653_v1, 0.0  ;;  %v1598_v60 = vadd.f32 %v1466_v19, %v5345_v20 }
 0x1f9   :  { %v3760_v28 = vpop.f32.mrf.mxu0 }
 0x1fa   :  { %v1654_v15 = vadd.f32 %v5538_v31, %v1598_v60  ;;  %3935 = vmatmul.mubr.f32.gmra.mxu1 %v1702_v42 }
 0x1fb   :  { %v1471_v17 = vpop.f32.mrf.mxu0  ;;  %3937 = vmatprep.mubr.msk.f32.mxu1 %vm4361_vm1, %v4360_v0 }
 0x1fc   :  { %v1703_v11 = vmax.f32 %v1654_v15, 0.0  ;;  %v1599_v33 = vadd.f32 %v1471_v17, %v5356_v32 }
 0x1fd   :  { %v3763_v61 = vpop.f32.mrf.mxu0 }
 0x1fe   :  { %v1655_v8 = vadd.f32 %v5538_v31, %v1599_v33  ;;  %3938 = vmatmul.mubr.f32.gmra.mxu1 %v1703_v11  ;;  %v2497_v33 = vld [vmem:[%s6384_s11 + $0x48] sm:$0xff] }
 0x1ff   :  { %v1476_v20 = vpop.f32.mrf.mxu0  ;;  %3940 = vmatprep.mubr.msk.f32.mxu1 %vm4361_vm1, %v4360_v0  ;;  %4192 = vmatpush3.msra.mxu1 %v2497_v33 }
 0x200   :  { %v1704_v44 = vmax.f32 %v1655_v8, 0.0  ;;  %v1600_v23 = vadd.f32 %v1476_v20, %v5365_v41  ;;  %4193 = vmatprep.subr.mxu1 %v4360_v0 }
 0x201   :  { %v3766_v48 = vpop.f32.mrf.mxu0 }
 0x202   :  { %v1656_v32 = vadd.f32 %v5538_v31, %v1600_v23  ;;  %3941 = vmatmul.mubr.f32.gmra.mxu1 %v1704_v44 }
 0x203   :  { %v1481_v46 = vpop.f32.mrf.mxu0  ;;  %3943 = vmatprep.mubr.msk.f32.mxu1 %vm4361_vm1, %v4360_v0 }
 0x204   :  { %v1705_v16 = vmax.f32 %v1656_v32, 0.0  ;;  %v1601_v47 = vadd.f32 %v1481_v46, %v5373_v53 }
 0x205   :  { %v3769_v4 = vpop.f32.mrf.mxu0 }
 0x206   :  { %v1657_v30 = vadd.f32 %v5538_v31, %v1601_v47  ;;  %3944 = vmatmul.mubr.f32.gmra.mxu1 %v1705_v16 }
 0x207   :  { %v1486_v50 = vpop.f32.mrf.mxu0  ;;  %3946 = vmatprep.mubr.msk.f32.mxu1 %vm4361_vm1, %v4360_v0 }
 0x208   :  { %v1706_v41 = vmax.f32 %v1657_v30, 0.0  ;;  %v1602_v25 = vadd.f32 %v1486_v50, %v5384_v3  ;;  %v2496_v30 = vld [vmem:[%s6384_s11 + $0x40] sm:$0xff] }
 0x209   :  { %v3772_v56 = vpop.f32.mrf.mxu0  ;;  %4194 = vmatpush3.msra.mxu1 %v2496_v30 }
 0x20a   :  { %v1658_v62 = vadd.f32 %v5538_v31, %v1602_v25  ;;  %3947 = vmatmul.mubr.f32.gmra.mxu1 %v1706_v41  ;;  %4195 = vmatprep.subr.mxu1 %v4360_v0 }
 0x20b   :  { %v1491_v53 = vpop.f32.mrf.mxu0  ;;  %3949 = vmatprep.mubr.msk.f32.mxu1 %vm4361_vm1, %v4360_v0 }
 0x20c   :  { %v1707_v34 = vmax.f32 %v1658_v62, 0.0  ;;  %v1603_v38 = vadd.f32 %v1491_v53, %v5393_v14 }
 0x20d   :  { %v3775_v29 = vpop.f32.mrf.mxu0 }
 0x20e   :  { %v1659_v3 = vadd.f32 %v5538_v31, %v1603_v38  ;;  %3950 = vmatmul.mubr.f32.gmra.mxu1 %v1707_v34 }
 0x20f   :  { %v1496_v63 = vpop.f32.mrf.mxu0  ;;  %3952 = vmatprep.mubr.msk.f32.mxu1 %vm4361_vm1, %v4360_v0 }
 0x210   :  { %v1708_v2 = vmax.f32 %v1659_v3, 0.0  ;;  %v1604_v12 = vadd.f32 %v1496_v63, %v5401_v27 }
 0x211   :  { %v3778_v45 = vpop.f32.mrf.mxu0 }
 0x212   :  { %v1660_v43 = vadd.f32 %v5538_v31, %v1604_v12  ;;  %3953 = vmatmul.mubr.f32.gmra.mxu1 %v1708_v2  ;;  %v2495_v2 = vld [vmem:[%s6384_s11 + $0x38] sm:$0xff] }
 0x213   :  { %v1501_v13 = vpop.f32.mrf.mxu0  ;;  %3955 = vmatprep.mubr.msk.f32.mxu1 %vm4361_vm1, %v4360_v0  ;;  %4196 = vmatpush3.msra.mxu1 %v2495_v2 }
 0x214   :  { %v1709_v14 = vmax.f32 %v1660_v43, 0.0  ;;  %v1605_v10 = vadd.f32 %v1501_v13, %v5412_v40  ;;  %4197 = vmatprep.subr.mxu1 %v4360_v0 }
 0x215   :  { %v3781_v36 = vpop.f32.mrf.mxu0 }
 0x216   :  { %v1661_v51 = vadd.f32 %v5538_v31, %v1605_v10  ;;  %3956 = vmatmul.mubr.f32.gmra.mxu1 %v1709_v14 }
 0x217   :  { %v1506_v27 = vpop.f32.mrf.mxu0  ;;  %3958 = vmatprep.mubr.msk.f32.mxu1 %vm4361_vm1, %v4360_v0 }
 0x218   :  { %v1710_v7 = vmax.f32 %v1661_v51, 0.0  ;;  %v1606_v52 = vadd.f32 %v1506_v27, %v5421_v55 }
 0x219   :  { %v3784_v54 = vpop.f32.mrf.mxu0 }
 0x21a   :  { %v1662_v40 = vadd.f32 %v5538_v31, %v1606_v52  ;;  %3959 = vmatmul.mubr.f32.gmra.mxu1 %v1710_v7  ;;  %v2494_v54 = vld [vmem:[%s6384_s11 + $0x30] sm:$0xff] }
 0x21b   :  { %v1511_v1 = vpop.f32.mrf.mxu0  ;;  %3961 = vmatprep.mubr.msk.f32.mxu1 %vm4361_vm1, %v4360_v0  ;;  %4198 = vmatpush3.msra.mxu1 %v2494_v54 }
 0x21c   :  { %v1711_v19 = vmax.f32 %v1662_v40, 0.0  ;;  %v1607_v42 = vadd.f32 %v1511_v1, %v5429_v5  ;;  %4199 = vmatprep.subr.mxu1 %v4360_v0 }
 0x21d   :  { %v3787_v60 = vpop.f32.mrf.mxu0 }
 0x21e   :  { %v1663_v28 = vadd.f32 %v5538_v31, %v1607_v42  ;;  %3962 = vmatmul.mubr.f32.gmra.mxu1 %v1711_v19 }
 0x21f   :  { %v1516_v15 = vpop.f32.mrf.mxu0  ;;  %3964 = vmatprep.mubr.msk.f32.mxu1 %vm4361_vm1, %v4360_v0 }
 0x220   :  { %v1712_v55 = vmax.f32 %v1663_v28, 0.0  ;;  %v1608_v17 = vadd.f32 %v1516_v15, %v5440_v21  ;;  %v5803_v28 = vld [vmem:[%s6385_s8] ss:$0 sm:$0xff] }
 0x221   :  { %v3790_v11 = vpop.f32.mrf.mxu0 }
 0x222   :  { %v1664_v61 = vadd.f32 %v5538_v31, %v1608_v17  ;;  %3965 = vmatmul.mubr.f32.gmra.mxu1 %v1712_v55 }
 0x223   :  { %v1521_v5 = vpop.f32.mrf.mxu0  ;;  %3967 = vmatprep.mubr.msk.f32.mxu1 %vm4361_vm1, %v4360_v0 }
 0x224   :  { %v1713_v22 = vmax.f32 %v1664_v61, 0.0  ;;  %v1609_v8 = vadd.f32 %v1521_v5, %v5449_v35 }
 0x225   :  { %v3793_v20 = vpop.f32.mrf.mxu0 }
 0x226   :  { %v1665_v21 = vadd.f32 %v5538_v31, %v1609_v8  ;;  %3968 = vmatmul.mubr.f32.gmra.mxu1 %v1713_v22 }
 0x227   :  { %v1526_v44 = vpop.f32.mrf.mxu0  ;;  %3970 = vmatprep.mubr.msk.f32.mxu1 %vm4361_vm1, %v4360_v0 }
 0x228   :  { %v1714_v23 = vmax.f32 %v1665_v21, 0.0  ;;  %v1610_v48 = vadd.f32 %v1526_v44, %v5457_v49 }
 0x229   :  { %v3796_v32 = vpop.f32.mrf.mxu0 }
 0x22a   :  { %v1666_v46 = vadd.f32 %v5538_v31, %v1610_v48  ;;  %3971 = vmatmul.mubr.f32.gmra.mxu1 %v1714_v23 }
 0x22b   :  { %v1531_v16 = vpop.f32.mrf.mxu0  ;;  %3973 = vmatprep.mubr.msk.f32.mxu1 %vm4361_vm1, %v4360_v0 }
 0x22c   :  { %v1715_v35 = vmax.f32 %v1666_v46, 0.0  ;;  %v1611_v47 = vadd.f32 %v1531_v16, %v5468_v6  ;;  %v2492_v46 = vld [vmem:[%s6384_s11 + $0x20] sm:$0xff] }
 0x22d   :  { %v3799_v4 = vpop.f32.mrf.mxu0 }
 0x22e   :  { %v1667_v50 = vadd.f32 %v5538_v31, %v1611_v47  ;;  %3974 = vmatmul.mubr.f32.gmra.mxu1 %v1715_v35 }
 0x22f   :  { %v1536_v49 = vpop.f32.mrf.mxu0  ;;  %3976 = vmatprep.mubr.msk.f32.mxu1 %vm4361_vm1, %v4360_v0 }
 0x230   :  { %v1716_v41 = vmax.f32 %v1667_v50, 0.0  ;;  %v1612_v25 = vadd.f32 %v1536_v49, %v5477_v24 }
 0x231   :  { %v3802_v56 = vpop.f32.mrf.mxu0 }
 0x232   :  { %v1668_v6 = vadd.f32 %v5538_v31, %v1612_v25  ;;  %3977 = vmatmul.mubr.f32.gmra.mxu1 %v1716_v41 }
 0x233   :  { %v1541_v57 = vpop.f32.mrf.mxu0  ;;  %3979 = vmatprep.mubr.msk.f32.mxu1 %vm4361_vm1, %v4360_v0 }
 0x234   :  { %v1717_v62 = vmax.f32 %v1668_v6, 0.0  ;;  %v1613_v53 = vadd.f32 %v1541_v57, %v5485_v39 }
 0x235   :  { %v3805_v34 = vpop.f32.mrf.mxu0 }
 0x236   :  { %v1669_v38 = vadd.f32 %v5538_v31, %v1613_v53  ;;  %3980 = vmatmul.mubr.f32.gmra.mxu1 %v1717_v62  ;;  %v2491_v62 = vld [vmem:[%s6384_s11 + $0x18] sm:$0xff] }
 0x237   :  { %v1546_v29 = vpop.f32.mrf.mxu0  ;;  %3982 = vmatprep.mubr.msk.f32.mxu1 %vm4361_vm1, %v4360_v0 }
 0x238   :  { %v1718_v24 = vmax.f32 %v1669_v38, 0.0  ;;  %v1614_v3 = vadd.f32 %v1546_v29, %v5496_v59 }
 0x239   :  { %v3808_v63 = vpop.f32.mrf.mxu0 }
 0x23a   :  { %v1670_v12 = vadd.f32 %v5538_v31, %v1614_v3  ;;  %3983 = vmatmul.mubr.f32.gmra.mxu1 %v1718_v24 }
 0x23b   :  { %v1551_v39 = vpop.f32.mrf.mxu0  ;;  %3985 = vmatprep.mubr.msk.f32.mxu1 %vm4361_vm1, %v4360_v0 }
 0x23c   :  { %v1719_v45 = vmax.f32 %v1670_v12, 0.0  ;;  %v1615_v43 = vadd.f32 %v1551_v39, %v5505_v18 }
 0x23d   :  { %v3811_v13 = vpop.f32.mrf.mxu0 }
 0x23e   :  { %v1671_v59 = vadd.f32 %v5538_v31, %v1615_v43  ;;  %3986 = vmatmul.mubr.f32.gmra.mxu1 %v1719_v45  ;;  %v2490_v13 = vld [vmem:[%s6384_s11 + $0x10] sm:$0xff] }
 0x23f   :  { %v1556_v14 = vpop.f32.mrf.mxu0  ;;  %3988 = vmatprep.mubr.msk.f32.mxu1 %vm4361_vm1, %v4360_v0 }
 0x240   :  { %v1720_v10 = vmax.f32 %v1671_v59, 0.0  ;;  %v1616_v36 = vadd.f32 %v1556_v14, %v5513_v37 }
 0x241   :  { %v3814_v9 = vpop.f32.mrf.mxu0 }
 0x242   :  { %v1672_v51 = vadd.f32 %v5538_v31, %v1616_v36  ;;  %3989 = vmatmul.mubr.f32.gmra.mxu1 %v1720_v10 }
 0x243   :  { %v1561_v27 = vpop.f32.mrf.mxu0  ;;  %3991 = vmatprep.mubr.msk.f32.mxu1 %vm4361_vm1, %v4360_v0 }
 0x244   :  { %v1721_v18 = vmax.f32 %v1672_v51, 0.0  ;;  %v1617_v7 = vadd.f32 %v1561_v27, %v5521_v58 }
 0x245   :  { %v3817_v52 = vpop.f32.mrf.mxu0 }
 0x246   :  { %v1673_v40 = vadd.f32 %v5538_v31, %v1617_v7  ;;  %3992 = vmatmul.mubr.f32.gmra.mxu1 %v1721_v18 }
 0x247   :  { %v1566_v37 = vpop.f32.mrf.mxu0  ;;  %3994 = vmatprep.mubr.msk.f32.mxu1 %vm4361_vm1, %v4360_v0 }
 0x248   :  { %v1722_v1 = vmax.f32 %v1673_v40, 0.0  ;;  %v1618_v19 = vadd.f32 %v1566_v37, %v5532_v26  ;;  %v2489_v37 = vld [vmem:[%s6384_s11 + $0x8] sm:$0xff] }
 0x249   :  { %v3820_v42 = vpop.f32.mrf.mxu0 }
 0x24a   :  { %v1674_v58 = vadd.f32 %v5538_v31, %v1618_v19  ;;  %3995 = vmatmul.mubr.f32.gmra.mxu1 %v1722_v1  ;;  %v2493_v31 = vld [vmem:[%s6384_s11 + $0x28] sm:$0xff] }
 0x24b   :  { %3997 = vmatprep.mubr.msk.f32.mxu1 %vm4361_vm1, %v4360_v0  ;;  %4200 = vmatpush3.msra.mxu1 %v2493_v31 }
 0x24c   :  { %v1723_v60 = vmax.f32 %v1674_v58, 0.0  ;;  %4201 = vmatprep.subr.mxu1 %v4360_v0 }
 0x24d   :  { %4202 = vmatpush3.msra.mxu1 %v2492_v46 }
 0x24e   :  { %v1813_v15 = vpop.f32.mrf.mxu1  ;;  %3998 = vmatmul.mubr.f32.gmra.mxu1 %v1723_v60  ;;  %4203 = vmatprep.subr.mxu1 %v4360_v0 }
 0x24f   :  { %v1814_v55 = vadd.f32 %v5803_v28, %v1813_v15  ;;  %4211 = vmatprep.mubr.msk.f32.mxu1 %vm4361_vm1, %v4360_v0  ;;  %4204 = vmatpush3.msra.mxu1 %v2491_v62 }
 0x250   :  { %v3855_v26 = vpop.f32.mrf.mxu1  ;;  %4205 = vmatprep.subr.mxu1 %v4360_v0 }
 0x251   :  { %v2057_v17 = vmax.f32 %v1814_v55, 0.0  ;;  %4206 = vmatpush3.msra.mxu1 %v2490_v13 }
 0x252   :  { %v1818_v11 = vpop.f32.mrf.mxu1  ;;  %4207 = vmatprep.subr.mxu1 %v4360_v0 }
 0x253   :  { %v1819_v33 = vadd.f32 %v5803_v28, %v1818_v11  ;;  %4033 = vmatmul.mubr.f32.vlgmr.msra.gmra.mxu0 %v2057_v17  ;;  %4208 = vmatpush3.msra.mxu1 %v2489_v37 }
 0x254   :  { %v3858_v61 = vpop.f32.mrf.mxu1  ;;  %4035 = vmatprep.mubr.msk.f32.mxu0 %vm4361_vm1, %v4360_v0  ;;  %4209 = vmatprep.subr.mxu1 %v4360_v0 }
 0x255   :  { %v2058_v5 = vmax.f32 %v1819_v33, 0.0  ;;  %v2488_v61 = vld [vmem:[%s6384_s11] sm:$0xff] }
 0x256   :  { %v1823_v22 = vpop.f32.mrf.mxu1  ;;  %4210 = vmatpush3.msra.mxu1 %v2488_v61 }
 0x257   :  { %v1824_v8 = vadd.f32 %v5803_v28, %v1823_v22  ;;  %4036 = vmatmul.mubr.f32.gmra.mxu0 %v2058_v5 }
 0x258   :  { %v3861_v20 = vpop.f32.mrf.mxu1  ;;  %4038 = vmatprep.mubr.msk.f32.mxu0 %vm4361_vm1, %v4360_v0 }
 0x259   :  { %v2059_v21 = vmax.f32 %v1824_v8, 0.0 }
 0x25a   :  { %v1828_v44 = vpop.f32.mrf.mxu1 }
 0x25b   :  { %v1829_v23 = vadd.f32 %v5803_v28, %v1828_v44  ;;  %4039 = vmatmul.mubr.f32.gmra.mxu0 %v2059_v21 }
 0x25c   :  { %v3864_v48 = vpop.f32.mrf.mxu1  ;;  %4041 = vmatprep.mubr.msk.f32.mxu0 %vm4361_vm1, %v4360_v0 }
 0x25d   :  { %v2060_v32 = vmax.f32 %v1829_v23, 0.0 }
 0x25e   :  { %v1833_v16 = vpop.f32.mrf.mxu1 }
 0x25f   :  { %v1834_v35 = vadd.f32 %v5803_v28, %v1833_v16  ;;  %4042 = vmatmul.mubr.f32.gmra.mxu0 %v2060_v32 }
 0x260   :  { %v3867_v47 = vpop.f32.mrf.mxu1  ;;  %4044 = vmatprep.mubr.msk.f32.mxu0 %vm4361_vm1, %v4360_v0 }
 0x261   :  { %v2061_v4 = vmax.f32 %v1834_v35, 0.0 }
 0x262   :  { %v1838_v30 = vpop.f32.mrf.mxu1 }
 0x263   :  { %v1839_v50 = vadd.f32 %v5803_v28, %v1838_v30  ;;  %4045 = vmatmul.mubr.f32.gmra.mxu0 %v2061_v4 }
 0x264   :  { %v3870_v49 = vpop.f32.mrf.mxu1  ;;  %4047 = vmatprep.mubr.msk.f32.mxu0 %vm4361_vm1, %v4360_v0 }
 0x265   :  { %v2062_v41 = vmax.f32 %v1839_v50, 0.0 }
 0x266   :  { %v1843_v25 = vpop.f32.mrf.mxu1 }
 0x267   :  { %v1844_v56 = vadd.f32 %v5803_v28, %v1843_v25  ;;  %4048 = vmatmul.mubr.f32.gmra.mxu0 %v2062_v41 }
 0x268   :  { %v3873_v6 = vpop.f32.mrf.mxu1  ;;  %4050 = vmatprep.mubr.msk.f32.mxu0 %vm4361_vm1, %v4360_v0 }
 0x269   :  { %v2063_v57 = vmax.f32 %v1844_v56, 0.0 }
 0x26a   :  { %v1848_v53 = vpop.f32.mrf.mxu1 }
 0x26b   :  { %v1849_v34 = vadd.f32 %v5803_v28, %v1848_v53  ;;  %4051 = vmatmul.mubr.f32.gmra.mxu0 %v2063_v57 }
 0x26c   :  { %v3876_v38 = vpop.f32.mrf.mxu1  ;;  %4053 = vmatprep.mubr.msk.f32.mxu0 %vm4361_vm1, %v4360_v0 }
 0x26d   :  { %v2064_v29 = vmax.f32 %v1849_v34, 0.0 }
 0x26e   :  { %v1853_v24 = vpop.f32.mrf.mxu1 }
 0x26f   :  { %v1854_v3 = vadd.f32 %v5803_v28, %v1853_v24  ;;  %4054 = vmatmul.mubr.f32.gmra.mxu0 %v2064_v29 }
 0x270   :  { %v3879_v63 = vpop.f32.mrf.mxu1  ;;  %4056 = vmatprep.mubr.msk.f32.mxu0 %vm4361_vm1, %v4360_v0 }
 0x271   :  { %v2065_v2 = vmax.f32 %v1854_v3, 0.0 }
 0x272   :  { %v1858_v12 = vpop.f32.mrf.mxu1 }
 0x273   :  { %v1859_v39 = vadd.f32 %v5803_v28, %v1858_v12  ;;  %4057 = vmatmul.mubr.f32.gmra.mxu0 %v2065_v2 }
 0x274   :  { %v3882_v45 = vpop.f32.mrf.mxu1  ;;  %4059 = vmatprep.mubr.msk.f32.mxu0 %vm4361_vm1, %v4360_v0 }
 0x275   :  { %v2066_v43 = vmax.f32 %v1859_v39, 0.0 }
 0x276   :  { %v1863_v59 = vpop.f32.mrf.mxu1 }
 0x277   :  { %v1864_v14 = vadd.f32 %v5803_v28, %v1863_v59  ;;  %4060 = vmatmul.mubr.f32.gmra.mxu0 %v2066_v43 }
 0x278   :  { %v3885_v10 = vpop.f32.mrf.mxu1  ;;  %4062 = vmatprep.mubr.msk.f32.mxu0 %vm4361_vm1, %v4360_v0 }
 0x279   :  { %v2067_v36 = vmax.f32 %v1864_v14, 0.0 }
 0x27a   :  { %v1868_v9 = vpop.f32.mrf.mxu1 }
 0x27b   :  { %v1869_v51 = vadd.f32 %v5803_v28, %v1868_v9  ;;  %4063 = vmatmul.mubr.f32.gmra.mxu0 %v2067_v36 }
 0x27c   :  { %v3888_v27 = vpop.f32.mrf.mxu1  ;;  %4065 = vmatprep.mubr.msk.f32.mxu0 %vm4361_vm1, %v4360_v0 }
 0x27d   :  { %v2068_v18 = vmax.f32 %v1869_v51, 0.0 }
 0x27e   :  { %v1873_v7 = vpop.f32.mrf.mxu1 }
 0x27f   :  { %v1874_v52 = vadd.f32 %v5803_v28, %v1873_v7  ;;  %4066 = vmatmul.mubr.f32.gmra.mxu0 %v2068_v18 }
 0x280   :  { %v3891_v54 = vpop.f32.mrf.mxu1  ;;  %4068 = vmatprep.mubr.msk.f32.mxu0 %vm4361_vm1, %v4360_v0 }
 0x281   :  { %v2069_v40 = vmax.f32 %v1874_v52, 0.0 }
 0x282   :  { %v1878_v1 = vpop.f32.mrf.mxu1 }
 0x283   :  { %v1879_v19 = vadd.f32 %v5803_v28, %v1878_v1  ;;  %4069 = vmatmul.mubr.f32.gmra.mxu0 %v2069_v40 }
 0x284   :  { %v3894_v42 = vpop.f32.mrf.mxu1  ;;  %4071 = vmatprep.mubr.msk.f32.mxu0 %vm4361_vm1, %v4360_v0 }
 0x285   :  { %v2070_v58 = vmax.f32 %v1879_v19, 0.0 }
 0x286   :  { %v1883_v60 = vpop.f32.mrf.mxu1 }
 0x287   :  { %v1884_v15 = vadd.f32 %v5803_v28, %v1883_v60  ;;  %4072 = vmatmul.mubr.f32.gmra.mxu0 %v2070_v58 }
 0x288   :  { %v3897_v55 = vpop.f32.mrf.mxu1  ;;  %4074 = vmatprep.mubr.msk.f32.mxu0 %vm4361_vm1, %v4360_v0 }
 0x289   :  { %v2071_v26 = vmax.f32 %v1884_v15, 0.0 }
 0x28a   :  { %v1888_v17 = vpop.f32.mrf.mxu1 }
 0x28b   :  { %v1889_v31 = vadd.f32 %v5803_v28, %v1888_v17  ;;  %4075 = vmatmul.mubr.f32.gmra.mxu0 %v2071_v26 }
 0x28c   :  { %v3900_v11 = vpop.f32.mrf.mxu1  ;;  %4077 = vmatprep.mubr.msk.f32.mxu0 %vm4361_vm1, %v4360_v0 }
 0x28d   :  { %v2072_v33 = vmax.f32 %v1889_v31, 0.0 }
 0x28e   :  { %v1893_v5 = vpop.f32.mrf.mxu1 }
 0x28f   :  { %v1894_v22 = vadd.f32 %v5803_v28, %v1893_v5  ;;  %4078 = vmatmul.mubr.f32.gmra.mxu0 %v2072_v33 }
 0x290   :  { %v3903_v8 = vpop.f32.mrf.mxu1  ;;  %4080 = vmatprep.mubr.msk.f32.mxu0 %vm4361_vm1, %v4360_v0 }
 0x291   :  { %v2073_v20 = vmax.f32 %v1894_v22, 0.0 }
 0x292   :  { %v1898_v21 = vpop.f32.mrf.mxu1 }
 0x293   :  { %v1899_v44 = vadd.f32 %v5803_v28, %v1898_v21  ;;  %4081 = vmatmul.mubr.f32.gmra.mxu0 %v2073_v20 }
 0x294   :  { %v3906_v23 = vpop.f32.mrf.mxu1  ;;  %4083 = vmatprep.mubr.msk.f32.mxu0 %vm4361_vm1, %v4360_v0 }
 0x295   :  { %v2074_v48 = vmax.f32 %v1899_v44, 0.0 }
 0x296   :  { %v1903_v32 = vpop.f32.mrf.mxu1 }
 0x297   :  { %v1904_v46 = vadd.f32 %v5803_v28, %v1903_v32  ;;  %4084 = vmatmul.mubr.f32.gmra.mxu0 %v2074_v48 }
 0x298   :  { %v3909_v16 = vpop.f32.mrf.mxu1  ;;  %4086 = vmatprep.mubr.msk.f32.mxu0 %vm4361_vm1, %v4360_v0 }
 0x299   :  { %v2075_v35 = vmax.f32 %v1904_v46, 0.0 }
 0x29a   :  { %v1908_v47 = vpop.f32.mrf.mxu1 }
 0x29b   :  { %v1909_v4 = vadd.f32 %v5803_v28, %v1908_v47  ;;  %4087 = vmatmul.mubr.f32.gmra.mxu0 %v2075_v35 }
 0x29c   :  { %v3912_v30 = vpop.f32.mrf.mxu1  ;;  %4089 = vmatprep.mubr.msk.f32.mxu0 %vm4361_vm1, %v4360_v0 }
 0x29d   :  { %v2076_v50 = vmax.f32 %v1909_v4, 0.0 }
 0x29e   :  { %v1913_v49 = vpop.f32.mrf.mxu1 }
 0x29f   :  { %v1914_v41 = vadd.f32 %v5803_v28, %v1913_v49  ;;  %4090 = vmatmul.mubr.f32.gmra.mxu0 %v2076_v50 }
 0x2a0   :  { %v3915_v25 = vpop.f32.mrf.mxu1  ;;  %4092 = vmatprep.mubr.msk.f32.mxu0 %vm4361_vm1, %v4360_v0 }
 0x2a1   :  { %v2077_v56 = vmax.f32 %v1914_v41, 0.0 }
 0x2a2   :  { %v1918_v6 = vpop.f32.mrf.mxu1 }
 0x2a3   :  { %v1919_v57 = vadd.f32 %v5803_v28, %v1918_v6  ;;  %4093 = vmatmul.mubr.f32.gmra.mxu0 %v2077_v56 }
 0x2a4   :  { %v3918_v62 = vpop.f32.mrf.mxu1  ;;  %4095 = vmatprep.mubr.msk.f32.mxu0 %vm4361_vm1, %v4360_v0 }
 0x2a5   :  { %v2078_v53 = vmax.f32 %v1919_v57, 0.0 }
 0x2a6   :  { %v1923_v34 = vpop.f32.mrf.mxu1 }
 0x2a7   :  { %v1924_v38 = vadd.f32 %v5803_v28, %v1923_v34  ;;  %4096 = vmatmul.mubr.f32.gmra.mxu0 %v2078_v53 }
 0x2a8   :  { %v3921_v29 = vpop.f32.mrf.mxu1  ;;  %4098 = vmatprep.mubr.msk.f32.mxu0 %vm4361_vm1, %v4360_v0 }
 0x2a9   :  { %v2079_v24 = vmax.f32 %v1924_v38, 0.0 }
 0x2aa   :  { %v1928_v3 = vpop.f32.mrf.mxu1 }
 0x2ab   :  { %v1929_v63 = vadd.f32 %v5803_v28, %v1928_v3  ;;  %4099 = vmatmul.mubr.f32.gmra.mxu0 %v2079_v24 }
 0x2ac   :  { %v3924_v2 = vpop.f32.mrf.mxu1  ;;  %4101 = vmatprep.mubr.msk.f32.mxu0 %vm4361_vm1, %v4360_v0 }
 0x2ad   :  { %v2080_v12 = vmax.f32 %v1929_v63, 0.0 }
 0x2ae   :  { %v1933_v39 = vpop.f32.mrf.mxu1 }
 0x2af   :  { %v1934_v45 = vadd.f32 %v5803_v28, %v1933_v39  ;;  %4102 = vmatmul.mubr.f32.gmra.mxu0 %v2080_v12 }
 0x2b0   :  { %v3927_v43 = vpop.f32.mrf.mxu1  ;;  %4104 = vmatprep.mubr.msk.f32.mxu0 %vm4361_vm1, %v4360_v0 }
 0x2b1   :  { %v2081_v13 = vmax.f32 %v1934_v45, 0.0 }
 0x2b2   :  { %v1938_v59 = vpop.f32.mrf.mxu1 }
 0x2b3   :  { %v1939_v14 = vadd.f32 %v5803_v28, %v1938_v59  ;;  %4105 = vmatmul.mubr.f32.gmra.mxu0 %v2081_v13 }
 0x2b4   :  { %v3930_v10 = vpop.f32.mrf.mxu1  ;;  %4107 = vmatprep.mubr.msk.f32.mxu0 %vm4361_vm1, %v4360_v0 }
 0x2b5   :  { %v2082_v36 = vmax.f32 %v1939_v14, 0.0 }
 0x2b6   :  { %v1943_v9 = vpop.f32.mrf.mxu1 }
 0x2b7   :  { %v1944_v51 = vadd.f32 %v5803_v28, %v1943_v9  ;;  %4108 = vmatmul.mubr.f32.gmra.mxu0 %v2082_v36 }
 0x2b8   :  { %v3933_v27 = vpop.f32.mrf.mxu1  ;;  %4110 = vmatprep.mubr.msk.f32.mxu0 %vm4361_vm1, %v4360_v0 }
 0x2b9   :  { %v2083_v18 = vmax.f32 %v1944_v51, 0.0 }
 0x2ba   :  { %v1948_v7 = vpop.f32.mrf.mxu1 }
 0x2bb   :  { %v1949_v52 = vadd.f32 %v5803_v28, %v1948_v7  ;;  %4111 = vmatmul.mubr.f32.gmra.mxu0 %v2083_v18 }
 0x2bc   :  { %v3936_v54 = vpop.f32.mrf.mxu1  ;;  %4113 = vmatprep.mubr.msk.f32.mxu0 %vm4361_vm1, %v4360_v0 }
 0x2bd   :  { %v2084_v40 = vmax.f32 %v1949_v52, 0.0 }
 0x2be   :  { %v1953_v37 = vpop.f32.mrf.mxu1 }
 0x2bf   :  { %v1954_v1 = vadd.f32 %v5803_v28, %v1953_v37  ;;  %4114 = vmatmul.mubr.f32.gmra.mxu0 %v2084_v40 }
 0x2c0   :  { %v3939_v19 = vpop.f32.mrf.mxu1  ;;  %4116 = vmatprep.mubr.msk.f32.mxu0 %vm4361_vm1, %v4360_v0 }
 0x2c1   :  { %v2085_v42 = vmax.f32 %v1954_v1, 0.0 }
 0x2c2   :  { %v1958_v58 = vpop.f32.mrf.mxu1 }
 0x2c3   :  { %v1959_v60 = vadd.f32 %v5803_v28, %v1958_v58  ;;  %4117 = vmatmul.mubr.f32.gmra.mxu0 %v2085_v42 }
 0x2c4   :  { %v3942_v15 = vpop.f32.mrf.mxu1  ;;  %4119 = vmatprep.mubr.msk.f32.mxu0 %vm4361_vm1, %v4360_v0 }
 0x2c5   :  { %v2086_v55 = vmax.f32 %v1959_v60, 0.0 }
 0x2c6   :  { %v1963_v26 = vpop.f32.mrf.mxu1 }
 0x2c7   :  { %v1964_v17 = vadd.f32 %v5803_v28, %v1963_v26  ;;  %4120 = vmatmul.mubr.f32.gmra.mxu0 %v2086_v55 }
 0x2c8   :  { %v3945_v31 = vpop.f32.mrf.mxu1  ;;  %4122 = vmatprep.mubr.msk.f32.mxu0 %vm4361_vm1, %v4360_v0 }
 0x2c9   :  { %v2087_v11 = vmax.f32 %v1964_v17, 0.0 }
 0x2ca   :  { %v1968_v33 = vpop.f32.mrf.mxu1 }
 0x2cb   :  { %v1969_v61 = vadd.f32 %v5803_v28, %v1968_v33  ;;  %4123 = vmatmul.mubr.f32.gmra.mxu0 %v2087_v11 }
 0x2cc   :  { %v3948_v5 = vpop.f32.mrf.mxu1  ;;  %4125 = vmatprep.mubr.msk.f32.mxu0 %vm4361_vm1, %v4360_v0 }
 0x2cd   :  { %v2088_v22 = vmax.f32 %v1969_v61, 0.0 }
 0x2ce   :  { %v1973_v8 = vpop.f32.mrf.mxu1 }
 0x2cf   :  { %v1974_v20 = vadd.f32 %v5803_v28, %v1973_v8  ;;  %4126 = vmatmul.mubr.f32.gmra.mxu0 %v2088_v22 }
 0x2d0   :  { %v3951_v21 = vpop.f32.mrf.mxu1  ;;  %4128 = vmatprep.mubr.msk.f32.mxu0 %vm4361_vm1, %v4360_v0 }
 0x2d1   :  { %v2089_v44 = vmax.f32 %v1974_v20, 0.0 }
 0x2d2   :  { %v1978_v23 = vpop.f32.mrf.mxu1 }
 0x2d3   :  { %v1979_v48 = vadd.f32 %v5803_v28, %v1978_v23  ;;  %4129 = vmatmul.mubr.f32.gmra.mxu0 %v2089_v44 }
 0x2d4   :  { %v3954_v32 = vpop.f32.mrf.mxu1  ;;  %4131 = vmatprep.mubr.msk.f32.mxu0 %vm4361_vm1, %v4360_v0 }
 0x2d5   :  { %v2090_v46 = vmax.f32 %v1979_v48, 0.0  ;;  %v5978_v32 = vld [vmem:[%s6386_s10] ss:$0 sm:$0xff] }
 0x2d6   :  { %v1983_v16 = vpop.f32.mrf.mxu1 }
 0x2d7   :  { %v1984_v35 = vadd.f32 %v5803_v28, %v1983_v16  ;;  %4132 = vmatmul.mubr.f32.gmra.mxu0 %v2090_v46 }
 0x2d8   :  { %v3957_v47 = vpop.f32.mrf.mxu1  ;;  %4134 = vmatprep.mubr.msk.f32.mxu0 %vm4361_vm1, %v4360_v0 }
 0x2d9   :  { %v2091_v4 = vmax.f32 %v1984_v35, 0.0 }
 0x2da   :  { %v1988_v30 = vpop.f32.mrf.mxu1 }
 0x2db   :  { %v1989_v50 = vadd.f32 %v5803_v28, %v1988_v30  ;;  %4135 = vmatmul.mubr.f32.gmra.mxu0 %v2091_v4 }
 0x2dc   :  { %v3960_v49 = vpop.f32.mrf.mxu1  ;;  %4137 = vmatprep.mubr.msk.f32.mxu0 %vm4361_vm1, %v4360_v0 }
 0x2dd   :  { %v2092_v41 = vmax.f32 %v1989_v50, 0.0 }
 0x2de   :  { %v1993_v25 = vpop.f32.mrf.mxu1 }
 0x2df   :  { %v1994_v56 = vadd.f32 %v5803_v28, %v1993_v25  ;;  %4138 = vmatmul.mubr.f32.gmra.mxu0 %v2092_v41 }
 0x2e0   :  { %v3963_v6 = vpop.f32.mrf.mxu1  ;;  %4140 = vmatprep.mubr.msk.f32.mxu0 %vm4361_vm1, %v4360_v0 }
 0x2e1   :  { %v2093_v57 = vmax.f32 %v1994_v56, 0.0 }
 0x2e2   :  { %v1998_v62 = vpop.f32.mrf.mxu1 }
 0x2e3   :  { %v1999_v53 = vadd.f32 %v5803_v28, %v1998_v62  ;;  %4141 = vmatmul.mubr.f32.gmra.mxu0 %v2093_v57 }
 0x2e4   :  { %v3966_v34 = vpop.f32.mrf.mxu1  ;;  %4143 = vmatprep.mubr.msk.f32.mxu0 %vm4361_vm1, %v4360_v0 }
 0x2e5   :  { %v2094_v38 = vmax.f32 %v1999_v53, 0.0 }
 0x2e6   :  { %v2003_v29 = vpop.f32.mrf.mxu1 }
 0x2e7   :  { %v2004_v24 = vadd.f32 %v5803_v28, %v2003_v29  ;;  %4144 = vmatmul.mubr.f32.gmra.mxu0 %v2094_v38 }
 0x2e8   :  { %v3969_v3 = vpop.f32.mrf.mxu1  ;;  %4146 = vmatprep.mubr.msk.f32.mxu0 %vm4361_vm1, %v4360_v0 }
 0x2e9   :  { %v2095_v63 = vmax.f32 %v2004_v24, 0.0 }
 0x2ea   :  { %v2008_v2 = vpop.f32.mrf.mxu1 }
 0x2eb   :  { %v2009_v12 = vadd.f32 %v5803_v28, %v2008_v2  ;;  %4147 = vmatmul.mubr.f32.gmra.mxu0 %v2095_v63 }
 0x2ec   :  { %v3972_v39 = vpop.f32.mrf.mxu1  ;;  %4149 = vmatprep.mubr.msk.f32.mxu0 %vm4361_vm1, %v4360_v0 }
 0x2ed   :  { %v2096_v45 = vmax.f32 %v2009_v12, 0.0 }
 0x2ee   :  { %v2013_v43 = vpop.f32.mrf.mxu1 }
 0x2ef   :  { %v2014_v13 = vadd.f32 %v5803_v28, %v2013_v43  ;;  %4150 = vmatmul.mubr.f32.gmra.mxu0 %v2096_v45 }
 0x2f0   :  { %v3975_v59 = vpop.f32.mrf.mxu1  ;;  %4152 = vmatprep.mubr.msk.f32.mxu0 %vm4361_vm1, %v4360_v0 }
 0x2f1   :  { %v2097_v14 = vmax.f32 %v2014_v13, 0.0 }
 0x2f2   :  { %v2018_v10 = vpop.f32.mrf.mxu1 }
 0x2f3   :  { %v2019_v36 = vadd.f32 %v5803_v28, %v2018_v10  ;;  %4153 = vmatmul.mubr.f32.gmra.mxu0 %v2097_v14 }
 0x2f4   :  { %v3978_v9 = vpop.f32.mrf.mxu1  ;;  %4155 = vmatprep.mubr.msk.f32.mxu0 %vm4361_vm1, %v4360_v0 }
 0x2f5   :  { %v2098_v51 = vmax.f32 %v2019_v36, 0.0 }
 0x2f6   :  { %v2023_v27 = vpop.f32.mrf.mxu1 }
 0x2f7   :  { %v2024_v18 = vadd.f32 %v5803_v28, %v2023_v27  ;;  %4156 = vmatmul.mubr.f32.gmra.mxu0 %v2098_v51 }
 0x2f8   :  { %v3981_v7 = vpop.f32.mrf.mxu1  ;;  %4158 = vmatprep.mubr.msk.f32.mxu0 %vm4361_vm1, %v4360_v0 }
 0x2f9   :  { %v2099_v52 = vmax.f32 %v2024_v18, 0.0 }
 0x2fa   :  { %v2028_v54 = vpop.f32.mrf.mxu1 }
 0x2fb   :  { %v2029_v40 = vadd.f32 %v5803_v28, %v2028_v54  ;;  %4159 = vmatmul.mubr.f32.gmra.mxu0 %v2099_v52 }
 0x2fc   :  { %v3984_v37 = vpop.f32.mrf.mxu1  ;;  %4161 = vmatprep.mubr.msk.f32.mxu0 %vm4361_vm1, %v4360_v0 }
 0x2fd   :  { %v2100_v1 = vmax.f32 %v2029_v40, 0.0 }
 0x2fe   :  { %v2033_v19 = vpop.f32.mrf.mxu1 }
 0x2ff   :  { %v2034_v42 = vadd.f32 %v5803_v28, %v2033_v19  ;;  %4162 = vmatmul.mubr.f32.gmra.mxu0 %v2100_v1 }
 0x300   :  { %v3987_v58 = vpop.f32.mrf.mxu1  ;;  %4164 = vmatprep.mubr.msk.f32.mxu0 %vm4361_vm1, %v4360_v0 }
 0x301   :  { %v2101_v60 = vmax.f32 %v2034_v42, 0.0 }
 0x302   :  { %v2038_v15 = vpop.f32.mrf.mxu1 }
 0x303   :  { %v2039_v55 = vadd.f32 %v5803_v28, %v2038_v15  ;;  %4165 = vmatmul.mubr.f32.gmra.mxu0 %v2101_v60 }
 0x304   :  { %v3990_v26 = vpop.f32.mrf.mxu1  ;;  %4167 = vmatprep.mubr.msk.f32.mxu0 %vm4361_vm1, %v4360_v0 }
 0x305   :  { %v2102_v17 = vmax.f32 %v2039_v55, 0.0 }
 0x306   :  { %v2043_v31 = vpop.f32.mrf.mxu1 }
 0x307   :  { %v2044_v11 = vadd.f32 %v5803_v28, %v2043_v31  ;;  %4168 = vmatmul.mubr.f32.gmra.mxu0 %v2102_v17 }
 0x308   :  { %v3993_v33 = vpop.f32.mrf.mxu1  ;;  %4170 = vmatprep.mubr.msk.f32.mxu0 %vm4361_vm1, %v4360_v0 }
 0x309   :  { %v2103_v61 = vmax.f32 %v2044_v11, 0.0 }
 0x30a   :  { %v2048_v5 = vpop.f32.mrf.mxu1 }
 0x30b   :  { %v2049_v22 = vadd.f32 %v5803_v28, %v2048_v5  ;;  %4171 = vmatmul.mubr.f32.gmra.mxu0 %v2103_v61 }
 0x30c   :  { %v3996_v8 = vpop.f32.mrf.mxu1  ;;  %4173 = vmatprep.mubr.msk.f32.mxu0 %vm4361_vm1, %v4360_v0 }
 0x30d   :  { %v2104_v20 = vmax.f32 %v2049_v22, 0.0 }
 0x30e   :  { %v2053_v21 = vpop.f32.mrf.mxu1 }
 0x30f   :  { %v2054_v44 = vadd.f32 %v5803_v28, %v2053_v21  ;;  %4174 = vmatmul.mubr.f32.gmra.mxu0 %v2104_v20 }
 0x310   :  { %v3999_v23 = vpop.f32.mrf.mxu1  ;;  %4176 = vmatprep.mubr.msk.f32.mxu0 %vm4361_vm1, %v4360_v0 }
 0x311   :  { %v2105_v48 = vmax.f32 %v2054_v44, 0.0 }
 0x313   :  { %v2195_v46 = vpop.f32.mrf.mxu0  ;;  %4177 = vmatmul.mubr.f32.gmra.mxu0 %v2105_v48 }
 0x314   :  { %v2196_v16 = vadd.f32 %v5978_v32, %v2195_v46 }
 0x315   :  { %v4034_v35 = vpop.f32.mrf.mxu0 }
 0x316   :  { %v2439_v47 = vmax.f32 %v2196_v16, 0.0  ;;  %v18_v35 = vstv %s6387_s12 }
 0x317   :  { %v2200_v4 = vpop.f32.mrf.mxu0  ;;  %19 = vst [vmem:[#allocation2] sm:$0x1] %v18_v35 }
 0x318   :  { %v2201_v28 = vadd.f32 %v5978_v32, %v2200_v4  ;;  %4212 = vmatmul.mubr.f32.vlgmr.msra.gmra.mxu1 %v2439_v47 }
 0x319   :  { %v4037_v30 = vpop.f32.mrf.mxu0  ;;  %4214 = vmatprep.mubr.msk.f32.mxu1 %vm4361_vm1, %v4360_v0 }
 0x31a   :  { %v2440_v50 = vmax.f32 %v2201_v28, 0.0 }
 0x31b   :  { %v2205_v49 = vpop.f32.mrf.mxu0 }
 0x31c   :  { %v2206_v41 = vadd.f32 %v5978_v32, %v2205_v49  ;;  %4215 = vmatmul.mubr.f32.gmra.mxu1 %v2440_v50 }
 0x31d   :  { %v4040_v25 = vpop.f32.mrf.mxu0  ;;  %4217 = vmatprep.mubr.msk.f32.mxu1 %vm4361_vm1, %v4360_v0 }
 0x31e   :  { %v2441_v56 = vmax.f32 %v2206_v41, 0.0 }
 0x31f   :  { %v2210_v6 = vpop.f32.mrf.mxu0 }
 0x320   :  { %v2211_v57 = vadd.f32 %v5978_v32, %v2210_v6  ;;  %4218 = vmatmul.mubr.f32.gmra.mxu1 %v2441_v56 }
 0x321   :  { %v4043_v62 = vpop.f32.mrf.mxu0  ;;  %4220 = vmatprep.mubr.msk.f32.mxu1 %vm4361_vm1, %v4360_v0 }
 0x322   :  { %v2442_v53 = vmax.f32 %v2211_v57, 0.0 }
 0x323   :  { %v2215_v34 = vpop.f32.mrf.mxu0 }
 0x324   :  { %v2216_v38 = vadd.f32 %v5978_v32, %v2215_v34  ;;  %4221 = vmatmul.mubr.f32.gmra.mxu1 %v2442_v53 }
 0x325   :  { %v4046_v29 = vpop.f32.mrf.mxu0  ;;  %4223 = vmatprep.mubr.msk.f32.mxu1 %vm4361_vm1, %v4360_v0 }
 0x326   :  { %v2443_v24 = vmax.f32 %v2216_v38, 0.0 }
 0x327   :  { %v2220_v3 = vpop.f32.mrf.mxu0 }
 0x328   :  { %v2221_v63 = vadd.f32 %v5978_v32, %v2220_v3  ;;  %4224 = vmatmul.mubr.f32.gmra.mxu1 %v2443_v24 }
 0x329   :  { %v4049_v2 = vpop.f32.mrf.mxu0  ;;  %4226 = vmatprep.mubr.msk.f32.mxu1 %vm4361_vm1, %v4360_v0 }
 0x32a   :  { %v2444_v12 = vmax.f32 %v2221_v63, 0.0 }
 0x32b   :  { %v2225_v39 = vpop.f32.mrf.mxu0 }
 0x32c   :  { %v2226_v45 = vadd.f32 %v5978_v32, %v2225_v39  ;;  %4227 = vmatmul.mubr.f32.gmra.mxu1 %v2444_v12 }
 0x32d   :  { %v4052_v43 = vpop.f32.mrf.mxu0  ;;  %4229 = vmatprep.mubr.msk.f32.mxu1 %vm4361_vm1, %v4360_v0 }
 0x32e   :  { %v2445_v13 = vmax.f32 %v2226_v45, 0.0 }
 0x32f   :  { %v2230_v59 = vpop.f32.mrf.mxu0 }
 0x330   :  { %v2231_v14 = vadd.f32 %v5978_v32, %v2230_v59  ;;  %4230 = vmatmul.mubr.f32.gmra.mxu1 %v2445_v13 }
 0x331   :  { %v4055_v10 = vpop.f32.mrf.mxu0  ;;  %4232 = vmatprep.mubr.msk.f32.mxu1 %vm4361_vm1, %v4360_v0 }
 0x332   :  { %v2446_v36 = vmax.f32 %v2231_v14, 0.0 }
 0x333   :  { %v2235_v9 = vpop.f32.mrf.mxu0 }
 0x334   :  { %v2236_v51 = vadd.f32 %v5978_v32, %v2235_v9  ;;  %4233 = vmatmul.mubr.f32.gmra.mxu1 %v2446_v36 }
 0x335   :  { %v4058_v27 = vpop.f32.mrf.mxu0  ;;  %4235 = vmatprep.mubr.msk.f32.mxu1 %vm4361_vm1, %v4360_v0 }
 0x336   :  { %v2447_v18 = vmax.f32 %v2236_v51, 0.0 }
 0x337   :  { %v2240_v7 = vpop.f32.mrf.mxu0 }
 0x338   :  { %v2241_v52 = vadd.f32 %v5978_v32, %v2240_v7  ;;  %4236 = vmatmul.mubr.f32.gmra.mxu1 %v2447_v18 }
 0x339   :  { %v4061_v54 = vpop.f32.mrf.mxu0  ;;  %4238 = vmatprep.mubr.msk.f32.mxu1 %vm4361_vm1, %v4360_v0 }
 0x33a   :  { %v2448_v40 = vmax.f32 %v2241_v52, 0.0 }
 0x33b   :  { %v2245_v37 = vpop.f32.mrf.mxu0 }
 0x33c   :  { %v2246_v1 = vadd.f32 %v5978_v32, %v2245_v37  ;;  %4239 = vmatmul.mubr.f32.gmra.mxu1 %v2448_v40 }
 0x33d   :  { %v4064_v19 = vpop.f32.mrf.mxu0  ;;  %4241 = vmatprep.mubr.msk.f32.mxu1 %vm4361_vm1, %v4360_v0 }
 0x33e   :  { %v2449_v42 = vmax.f32 %v2246_v1, 0.0 }
 0x33f   :  { %v2250_v58 = vpop.f32.mrf.mxu0 }
 0x340   :  { %v2251_v60 = vadd.f32 %v5978_v32, %v2250_v58  ;;  %4242 = vmatmul.mubr.f32.gmra.mxu1 %v2449_v42 }
 0x341   :  { %v4067_v15 = vpop.f32.mrf.mxu0  ;;  %4244 = vmatprep.mubr.msk.f32.mxu1 %vm4361_vm1, %v4360_v0 }
 0x342   :  { %v2450_v55 = vmax.f32 %v2251_v60, 0.0 }
 0x343   :  { %v2255_v26 = vpop.f32.mrf.mxu0 }
 0x344   :  { %v2256_v17 = vadd.f32 %v5978_v32, %v2255_v26  ;;  %4245 = vmatmul.mubr.f32.gmra.mxu1 %v2450_v55 }
 0x345   :  { %v4070_v31 = vpop.f32.mrf.mxu0  ;;  %4247 = vmatprep.mubr.msk.f32.mxu1 %vm4361_vm1, %v4360_v0 }
 0x346   :  { %v2451_v11 = vmax.f32 %v2256_v17, 0.0 }
 0x347   :  { %v2260_v33 = vpop.f32.mrf.mxu0 }
 0x348   :  { %v2261_v61 = vadd.f32 %v5978_v32, %v2260_v33  ;;  %4248 = vmatmul.mubr.f32.gmra.mxu1 %v2451_v11 }
 0x349   :  { %v4073_v5 = vpop.f32.mrf.mxu0  ;;  %4250 = vmatprep.mubr.msk.f32.mxu1 %vm4361_vm1, %v4360_v0 }
 0x34a   :  { %v2452_v22 = vmax.f32 %v2261_v61, 0.0 }
 0x34b   :  { %v2265_v8 = vpop.f32.mrf.mxu0 }
 0x34c   :  { %v2266_v20 = vadd.f32 %v5978_v32, %v2265_v8  ;;  %4251 = vmatmul.mubr.f32.gmra.mxu1 %v2452_v22 }
 0x34d   :  { %v4076_v21 = vpop.f32.mrf.mxu0  ;;  %4253 = vmatprep.mubr.msk.f32.mxu1 %vm4361_vm1, %v4360_v0 }
 0x34e   :  { %v2453_v44 = vmax.f32 %v2266_v20, 0.0 }
 0x34f   :  { %v2270_v23 = vpop.f32.mrf.mxu0 }
 0x350   :  { %v2271_v48 = vadd.f32 %v5978_v32, %v2270_v23  ;;  %4254 = vmatmul.mubr.f32.gmra.mxu1 %v2453_v44 }
 0x351   :  { %v4079_v46 = vpop.f32.mrf.mxu0  ;;  %4256 = vmatprep.mubr.msk.f32.mxu1 %vm4361_vm1, %v4360_v0 }
 0x352   :  { %v2454_v16 = vmax.f32 %v2271_v48, 0.0 }
 0x353   :  { %v2275_v47 = vpop.f32.mrf.mxu0 }
 0x354   :  { %v2276_v4 = vadd.f32 %v5978_v32, %v2275_v47  ;;  %4257 = vmatmul.mubr.f32.gmra.mxu1 %v2454_v16 }
 0x355   :  { %v4082_v28 = vpop.f32.mrf.mxu0  ;;  %4259 = vmatprep.mubr.msk.f32.mxu1 %vm4361_vm1, %v4360_v0 }
 0x356   :  { %v2455_v30 = vmax.f32 %v2276_v4, 0.0 }
 0x357   :  { %v2280_v50 = vpop.f32.mrf.mxu0 }
 0x358   :  { %v2281_v49 = vadd.f32 %v5978_v32, %v2280_v50  ;;  %4260 = vmatmul.mubr.f32.gmra.mxu1 %v2455_v30 }
 0x359   :  { %v4085_v41 = vpop.f32.mrf.mxu0  ;;  %4262 = vmatprep.mubr.msk.f32.mxu1 %vm4361_vm1, %v4360_v0 }
 0x35a   :  { %v2456_v25 = vmax.f32 %v2281_v49, 0.0 }
 0x35b   :  { %v2285_v56 = vpop.f32.mrf.mxu0 }
 0x35c   :  { %v2286_v6 = vadd.f32 %v5978_v32, %v2285_v56  ;;  %4263 = vmatmul.mubr.f32.gmra.mxu1 %v2456_v25 }
 0x35d   :  { %v4088_v57 = vpop.f32.mrf.mxu0  ;;  %4265 = vmatprep.mubr.msk.f32.mxu1 %vm4361_vm1, %v4360_v0 }
 0x35e   :  { %v2457_v62 = vmax.f32 %v2286_v6, 0.0 }
 0x35f   :  { %v2290_v53 = vpop.f32.mrf.mxu0 }
 0x360   :  { %v2291_v34 = vadd.f32 %v5978_v32, %v2290_v53  ;;  %4266 = vmatmul.mubr.f32.gmra.mxu1 %v2457_v62 }
 0x361   :  { %v4091_v38 = vpop.f32.mrf.mxu0  ;;  %4268 = vmatprep.mubr.msk.f32.mxu1 %vm4361_vm1, %v4360_v0 }
 0x362   :  { %v2458_v29 = vmax.f32 %v2291_v34, 0.0 }
 0x363   :  { %v2295_v24 = vpop.f32.mrf.mxu0 }
 0x364   :  { %v2296_v3 = vadd.f32 %v5978_v32, %v2295_v24  ;;  %4269 = vmatmul.mubr.f32.gmra.mxu1 %v2458_v29 }
 0x365   :  { %v4094_v63 = vpop.f32.mrf.mxu0  ;;  %4271 = vmatprep.mubr.msk.f32.mxu1 %vm4361_vm1, %v4360_v0 }
 0x366   :  { %v2459_v2 = vmax.f32 %v2296_v3, 0.0 }
 0x367   :  { %v2300_v12 = vpop.f32.mrf.mxu0 }
 0x368   :  { %v2301_v39 = vadd.f32 %v5978_v32, %v2300_v12  ;;  %4272 = vmatmul.mubr.f32.gmra.mxu1 %v2459_v2 }
 0x369   :  { %v4097_v45 = vpop.f32.mrf.mxu0  ;;  %4274 = vmatprep.mubr.msk.f32.mxu1 %vm4361_vm1, %v4360_v0 }
 0x36a   :  { %v2460_v43 = vmax.f32 %v2301_v39, 0.0 }
 0x36b   :  { %v2305_v13 = vpop.f32.mrf.mxu0 }
 0x36c   :  { %v2306_v59 = vadd.f32 %v5978_v32, %v2305_v13  ;;  %4275 = vmatmul.mubr.f32.gmra.mxu1 %v2460_v43 }
 0x36d   :  { %v4100_v14 = vpop.f32.mrf.mxu0  ;;  %4277 = vmatprep.mubr.msk.f32.mxu1 %vm4361_vm1, %v4360_v0 }
 0x36e   :  { %v2461_v10 = vmax.f32 %v2306_v59, 0.0 }
 0x36f   :  { %v2310_v36 = vpop.f32.mrf.mxu0 }
 0x370   :  { %v2311_v9 = vadd.f32 %v5978_v32, %v2310_v36  ;;  %4278 = vmatmul.mubr.f32.gmra.mxu1 %v2461_v10 }
 0x371   :  { %v4103_v51 = vpop.f32.mrf.mxu0  ;;  %4280 = vmatprep.mubr.msk.f32.mxu1 %vm4361_vm1, %v4360_v0 }
 0x372   :  { %v2462_v27 = vmax.f32 %v2311_v9, 0.0 }
 0x373   :  { %v2315_v18 = vpop.f32.mrf.mxu0 }
 0x374   :  { %v2316_v7 = vadd.f32 %v5978_v32, %v2315_v18  ;;  %4281 = vmatmul.mubr.f32.gmra.mxu1 %v2462_v27 }
 0x375   :  { %v4106_v52 = vpop.f32.mrf.mxu0  ;;  %4283 = vmatprep.mubr.msk.f32.mxu1 %vm4361_vm1, %v4360_v0 }
 0x376   :  { %v2463_v54 = vmax.f32 %v2316_v7, 0.0 }
 0x377   :  { %v2320_v40 = vpop.f32.mrf.mxu0 }
 0x378   :  { %v2321_v37 = vadd.f32 %v5978_v32, %v2320_v40  ;;  %4284 = vmatmul.mubr.f32.gmra.mxu1 %v2463_v54 }
 0x379   :  { %v4109_v1 = vpop.f32.mrf.mxu0  ;;  %4286 = vmatprep.mubr.msk.f32.mxu1 %vm4361_vm1, %v4360_v0 }
 0x37a   :  { %v2464_v19 = vmax.f32 %v2321_v37, 0.0 }
 0x37b   :  { %v2325_v42 = vpop.f32.mrf.mxu0 }
 0x37c   :  { %v2326_v58 = vadd.f32 %v5978_v32, %v2325_v42  ;;  %4287 = vmatmul.mubr.f32.gmra.mxu1 %v2464_v19 }
 0x37d   :  { %v4112_v60 = vpop.f32.mrf.mxu0  ;;  %4289 = vmatprep.mubr.msk.f32.mxu1 %vm4361_vm1, %v4360_v0 }
 0x37e   :  { %v2465_v15 = vmax.f32 %v2326_v58, 0.0 }
 0x37f   :  { %v2330_v55 = vpop.f32.mrf.mxu0 }
 0x380   :  { %v2331_v26 = vadd.f32 %v5978_v32, %v2330_v55  ;;  %4290 = vmatmul.mubr.f32.gmra.mxu1 %v2465_v15 }
 0x381   :  { %v4115_v17 = vpop.f32.mrf.mxu0  ;;  %4292 = vmatprep.mubr.msk.f32.mxu1 %vm4361_vm1, %v4360_v0 }
 0x382   :  { %v2466_v31 = vmax.f32 %v2331_v26, 0.0 }
 0x383   :  { %v2335_v11 = vpop.f32.mrf.mxu0 }
 0x384   :  { %v2336_v33 = vadd.f32 %v5978_v32, %v2335_v11  ;;  %4293 = vmatmul.mubr.f32.gmra.mxu1 %v2466_v31 }
 0x385   :  { %v4118_v61 = vpop.f32.mrf.mxu0  ;;  %4295 = vmatprep.mubr.msk.f32.mxu1 %vm4361_vm1, %v4360_v0 }
 0x386   :  { %v2467_v5 = vmax.f32 %v2336_v33, 0.0 }
 0x387   :  { %v2340_v22 = vpop.f32.mrf.mxu0 }
 0x388   :  { %v2341_v8 = vadd.f32 %v5978_v32, %v2340_v22  ;;  %4296 = vmatmul.mubr.f32.gmra.mxu1 %v2467_v5 }
 0x389   :  { %v4121_v20 = vpop.f32.mrf.mxu0  ;;  %4298 = vmatprep.mubr.msk.f32.mxu1 %vm4361_vm1, %v4360_v0 }
 0x38a   :  { %v2468_v21 = vmax.f32 %v2341_v8, 0.0 }
 0x38b   :  { %v2345_v44 = vpop.f32.mrf.mxu0 }
 0x38c   :  { %v2346_v23 = vadd.f32 %v5978_v32, %v2345_v44  ;;  %4299 = vmatmul.mubr.f32.gmra.mxu1 %v2468_v21 }
 0x38d   :  { %v4124_v48 = vpop.f32.mrf.mxu0  ;;  %4301 = vmatprep.mubr.msk.f32.mxu1 %vm4361_vm1, %v4360_v0 }
 0x38e   :  { %v2469_v46 = vmax.f32 %v2346_v23, 0.0 }
 0x38f   :  { %v2350_v16 = vpop.f32.mrf.mxu0 }
 0x390   :  { %v2351_v35 = vadd.f32 %v5978_v32, %v2350_v16  ;;  %4302 = vmatmul.mubr.f32.gmra.mxu1 %v2469_v46 }
 0x391   :  { %v4127_v47 = vpop.f32.mrf.mxu0  ;;  %4304 = vmatprep.mubr.msk.f32.mxu1 %vm4361_vm1, %v4360_v0 }
 0x392   :  { %v2470_v4 = vmax.f32 %v2351_v35, 0.0 }
 0x393   :  { %v2355_v28 = vpop.f32.mrf.mxu0 }
 0x394   :  { %v2356_v30 = vadd.f32 %v5978_v32, %v2355_v28  ;;  %4305 = vmatmul.mubr.f32.gmra.mxu1 %v2470_v4 }
 0x395   :  { %v4130_v50 = vpop.f32.mrf.mxu0  ;;  %4307 = vmatprep.mubr.msk.f32.mxu1 %vm4361_vm1, %v4360_v0 }
 0x396   :  { %v2471_v49 = vmax.f32 %v2356_v30, 0.0 }
 0x397   :  { %v2360_v41 = vpop.f32.mrf.mxu0 }
 0x398   :  { %v2361_v25 = vadd.f32 %v5978_v32, %v2360_v41  ;;  %4308 = vmatmul.mubr.f32.gmra.mxu1 %v2471_v49 }
 0x399   :  { %v4133_v56 = vpop.f32.mrf.mxu0  ;;  %4310 = vmatprep.mubr.msk.f32.mxu1 %vm4361_vm1, %v4360_v0 }
 0x39a   :  { %v2472_v6 = vmax.f32 %v2361_v25, 0.0  ;;  %v6128_v56 = vld [vmem:[#allocation2] ss:$0 sm:$0xff] }
 0x39b   :  { %v2365_v57 = vpop.f32.mrf.mxu0 }
 0x39c   :  { %v2366_v62 = vadd.f32 %v5978_v32, %v2365_v57  ;;  %4311 = vmatmul.mubr.f32.gmra.mxu1 %v2472_v6 }
 0x39d   :  { %v4136_v53 = vpop.f32.mrf.mxu0  ;;  %4313 = vmatprep.mubr.msk.f32.mxu1 %vm4361_vm1, %v4360_v0 }
 0x39e   :  { %v2473_v34 = vmax.f32 %v2366_v62, 0.0 }
 0x39f   :  { %v2370_v38 = vpop.f32.mrf.mxu0 }
 0x3a0   :  { %v2371_v29 = vadd.f32 %v5978_v32, %v2370_v38  ;;  %4314 = vmatmul.mubr.f32.gmra.mxu1 %v2473_v34 }
 0x3a1   :  { %v4139_v24 = vpop.f32.mrf.mxu0  ;;  %4316 = vmatprep.mubr.msk.f32.mxu1 %vm4361_vm1, %v4360_v0 }
 0x3a2   :  { %v2474_v3 = vmax.f32 %v2371_v29, 0.0 }
 0x3a3   :  { %v2375_v63 = vpop.f32.mrf.mxu0 }
 0x3a4   :  { %v2376_v2 = vadd.f32 %v5978_v32, %v2375_v63  ;;  %4317 = vmatmul.mubr.f32.gmra.mxu1 %v2474_v3 }
 0x3a5   :  { %v4142_v12 = vpop.f32.mrf.mxu0  ;;  %4319 = vmatprep.mubr.msk.f32.mxu1 %vm4361_vm1, %v4360_v0 }
 0x3a6   :  { %v2475_v39 = vmax.f32 %v2376_v2, 0.0 }
 0x3a7   :  { %v2380_v45 = vpop.f32.mrf.mxu0 }
 0x3a8   :  { %v2381_v43 = vadd.f32 %v5978_v32, %v2380_v45  ;;  %4320 = vmatmul.mubr.f32.gmra.mxu1 %v2475_v39 }
 0x3a9   :  { %v4145_v13 = vpop.f32.mrf.mxu0  ;;  %4322 = vmatprep.mubr.msk.f32.mxu1 %vm4361_vm1, %v4360_v0 }
 0x3aa   :  { %v2476_v59 = vmax.f32 %v2381_v43, 0.0 }
 0x3ab   :  { %v2385_v14 = vpop.f32.mrf.mxu0 }
 0x3ac   :  { %v2386_v10 = vadd.f32 %v5978_v32, %v2385_v14  ;;  %4323 = vmatmul.mubr.f32.gmra.mxu1 %v2476_v59 }
 0x3ad   :  { %v4148_v36 = vpop.f32.mrf.mxu0  ;;  %4325 = vmatprep.mubr.msk.f32.mxu1 %vm4361_vm1, %v4360_v0 }
 0x3ae   :  { %v2477_v9 = vmax.f32 %v2386_v10, 0.0 }
 0x3af   :  { %v2390_v51 = vpop.f32.mrf.mxu0 }
 0x3b0   :  { %v2391_v27 = vadd.f32 %v5978_v32, %v2390_v51  ;;  %4326 = vmatmul.mubr.f32.gmra.mxu1 %v2477_v9 }
 0x3b1   :  { %v4151_v18 = vpop.f32.mrf.mxu0  ;;  %4328 = vmatprep.mubr.msk.f32.mxu1 %vm4361_vm1, %v4360_v0 }
 0x3b2   :  { %v2478_v7 = vmax.f32 %v2391_v27, 0.0 }
 0x3b3   :  { %v2395_v52 = vpop.f32.mrf.mxu0 }
 0x3b4   :  { %v2396_v54 = vadd.f32 %v5978_v32, %v2395_v52  ;;  %4329 = vmatmul.mubr.f32.gmra.mxu1 %v2478_v7 }
 0x3b5   :  { %v4154_v40 = vpop.f32.mrf.mxu0  ;;  %4331 = vmatprep.mubr.msk.f32.mxu1 %vm4361_vm1, %v4360_v0 }
 0x3b6   :  { %v2479_v37 = vmax.f32 %v2396_v54, 0.0 }
 0x3b7   :  { %v2400_v1 = vpop.f32.mrf.mxu0 }
 0x3b8   :  { %v2401_v19 = vadd.f32 %v5978_v32, %v2400_v1  ;;  %4332 = vmatmul.mubr.f32.gmra.mxu1 %v2479_v37 }
 0x3b9   :  { %v4157_v42 = vpop.f32.mrf.mxu0  ;;  %4334 = vmatprep.mubr.msk.f32.mxu1 %vm4361_vm1, %v4360_v0 }
 0x3ba   :  { %v2480_v58 = vmax.f32 %v2401_v19, 0.0 }
 0x3bb   :  { %v2405_v60 = vpop.f32.mrf.mxu0 }
 0x3bc   :  { %v2406_v15 = vadd.f32 %v5978_v32, %v2405_v60  ;;  %4335 = vmatmul.mubr.f32.gmra.mxu1 %v2480_v58 }
 0x3bd   :  { %v4160_v55 = vpop.f32.mrf.mxu0  ;;  %4337 = vmatprep.mubr.msk.f32.mxu1 %vm4361_vm1, %v4360_v0 }
 0x3be   :  { %v2481_v26 = vmax.f32 %v2406_v15, 0.0 }
 0x3bf   :  { %v2410_v17 = vpop.f32.mrf.mxu0 }
 0x3c0   :  { %v2411_v31 = vadd.f32 %v5978_v32, %v2410_v17  ;;  %4338 = vmatmul.mubr.f32.gmra.mxu1 %v2481_v26 }
 0x3c1   :  { %v4163_v11 = vpop.f32.mrf.mxu0  ;;  %4340 = vmatprep.mubr.msk.f32.mxu1 %vm4361_vm1, %v4360_v0 }
 0x3c2   :  { %v2482_v33 = vmax.f32 %v2411_v31, 0.0 }
 0x3c3   :  { %v2415_v61 = vpop.f32.mrf.mxu0 }
 0x3c4   :  { %v2416_v5 = vadd.f32 %v5978_v32, %v2415_v61  ;;  %4341 = vmatmul.mubr.f32.gmra.mxu1 %v2482_v33 }
 0x3c5   :  { %v4166_v22 = vpop.f32.mrf.mxu0  ;;  %4343 = vmatprep.mubr.msk.f32.mxu1 %vm4361_vm1, %v4360_v0 }
 0x3c6   :  { %v2483_v8 = vmax.f32 %v2416_v5, 0.0 }
 0x3c7   :  { %v2420_v20 = vpop.f32.mrf.mxu0 }
 0x3c8   :  { %v2421_v21 = vadd.f32 %v5978_v32, %v2420_v20  ;;  %4344 = vmatmul.mubr.f32.gmra.mxu1 %v2483_v8 }
 0x3c9   :  { %v4169_v44 = vpop.f32.mrf.mxu0  ;;  %4346 = vmatprep.mubr.msk.f32.mxu1 %vm4361_vm1, %v4360_v0 }
 0x3ca   :  { %v2484_v23 = vmax.f32 %v2421_v21, 0.0 }
 0x3cb   :  { %v2425_v48 = vpop.f32.mrf.mxu0 }
 0x3cc   :  { %v2426_v46 = vadd.f32 %v5978_v32, %v2425_v48  ;;  %4347 = vmatmul.mubr.f32.gmra.mxu1 %v2484_v23 }
 0x3cd   :  { %v4172_v16 = vpop.f32.mrf.mxu0  ;;  %4349 = vmatprep.mubr.msk.f32.mxu1 %vm4361_vm1, %v4360_v0 }
 0x3ce   :  { %v2485_v35 = vmax.f32 %v2426_v46, 0.0 }
 0x3cf   :  { %v2430_v47 = vpop.f32.mrf.mxu0 }
 0x3d0   :  { %v2431_v4 = vadd.f32 %v5978_v32, %v2430_v47  ;;  %4350 = vmatmul.mubr.f32.gmra.mxu1 %v2485_v35 }
 0x3d1   :  { %v4175_v28 = vpop.f32.mrf.mxu0  ;;  %4352 = vmatprep.mubr.msk.f32.mxu1 %vm4361_vm1, %v4360_v0 }
 0x3d2   :  { %v2486_v30 = vmax.f32 %v2431_v4, 0.0 }
 0x3d3   :  { %v2435_v50 = vpop.f32.mrf.mxu0 }
 0x3d4   :  { %v2436_v49 = vadd.f32 %v5978_v32, %v2435_v50  ;;  %4353 = vmatmul.mubr.f32.gmra.mxu1 %v2486_v30 }
 0x3d5   :  { %v4178_v41 = vpop.f32.mrf.mxu0  ;;  %4355 = vmatprep.mubr.msk.f32.mxu1 %vm4361_vm1, %v4360_v0 }
 0x3d6   :  { %v2487_v25 = vmax.f32 %v2436_v49, 0.0 }
 0x3d8   :  { %v2577_v6 = vpop.f32.mrf.mxu1  ;;  %4356 = vmatmul.mubr.f32.gmra.mxu1 %v2487_v25 }
 0x3d9   :  { %v2578_v57 = vadd.f32 %v6128_v56, %v2577_v6 }
 0x3da   :  { %v4213_v62 = vpop.f32.mrf.mxu1 }
 0x3db   :  { %2822 = vst.msk [vmem:[%s6388_s13] sm:$0xff] %vm2821_vm3, %v2578_v57 }
 0x3dc   :  { %v2582_v32 = vpop.f32.mrf.mxu1 }
 0x3dd   :  { %v2583_v53 = vadd.f32 %v6128_v56, %v2582_v32 }
 0x3de   :  { %v4216_v34 = vpop.f32.mrf.mxu1 }
 0x3df   :  { %2823 = vst.msk [vmem:[%s6388_s13 + $0x8] sm:$0xff] %vm2821_vm3, %v2583_v53 }
 0x3e0   :  { %v2587_v0 = vpop.f32.mrf.mxu1 }
 0x3e1   :  { %v2588_v38 = vadd.f32 %v6128_v56, %v2587_v0 }
 0x3e2   :  { %v4219_v29 = vpop.f32.mrf.mxu1 }
 0x3e3   :  { %2824 = vst.msk [vmem:[%s6388_s13 + $0x10] sm:$0xff] %vm2821_vm3, %v2588_v38 }
 0x3e4   :  { %v2592_v24 = vpop.f32.mrf.mxu1 }
 0x3e5   :  { %v2593_v3 = vadd.f32 %v6128_v56, %v2592_v24 }
 0x3e6   :  { %v4222_v63 = vpop.f32.mrf.mxu1 }
 0x3e7   :  { %2825 = vst.msk [vmem:[%s6388_s13 + $0x18] sm:$0xff] %vm2821_vm3, %v2593_v3 }
 0x3e8   :  { %v2597_v2 = vpop.f32.mrf.mxu1 }
 0x3e9   :  { %v2598_v12 = vadd.f32 %v6128_v56, %v2597_v2 }
 0x3ea   :  { %v4225_v39 = vpop.f32.mrf.mxu1 }
 0x3eb   :  { %2826 = vst.msk [vmem:[%s6388_s13 + $0x20] sm:$0xff] %vm2821_vm3, %v2598_v12 }
 0x3ec   :  { %v2602_v45 = vpop.f32.mrf.mxu1 }
 0x3ed   :  { %v2603_v43 = vadd.f32 %v6128_v56, %v2602_v45 }
 0x3ee   :  { %v4228_v13 = vpop.f32.mrf.mxu1 }
 0x3ef   :  { %2827 = vst.msk [vmem:[%s6388_s13 + $0x28] sm:$0xff] %vm2821_vm3, %v2603_v43 }
 0x3f0   :  { %v2607_v59 = vpop.f32.mrf.mxu1 }
 0x3f1   :  { %v2608_v14 = vadd.f32 %v6128_v56, %v2607_v59 }
 0x3f2   :  { %v4231_v10 = vpop.f32.mrf.mxu1 }
 0x3f3   :  { %2828 = vst.msk [vmem:[%s6388_s13 + $0x30] sm:$0xff] %vm2821_vm3, %v2608_v14 }
 0x3f4   :  { %v2612_v36 = vpop.f32.mrf.mxu1 }
 0x3f5   :  { %v2613_v9 = vadd.f32 %v6128_v56, %v2612_v36 }
 0x3f6   :  { %v4234_v51 = vpop.f32.mrf.mxu1 }
 0x3f7   :  { %2829 = vst.msk [vmem:[%s6388_s13 + $0x38] sm:$0xff] %vm2821_vm3, %v2613_v9 }
 0x3f8   :  { %v2617_v27 = vpop.f32.mrf.mxu1 }
 0x3f9   :  { %v2618_v18 = vadd.f32 %v6128_v56, %v2617_v27 }
 0x3fa   :  { %v4237_v7 = vpop.f32.mrf.mxu1 }
 0x3fb   :  { %2830 = vst.msk [vmem:[%s6388_s13 + $0x40] sm:$0xff] %vm2821_vm3, %v2618_v18 }
 0x3fc   :  { %v2622_v52 = vpop.f32.mrf.mxu1 }
 0x3fd   :  { %v2623_v54 = vadd.f32 %v6128_v56, %v2622_v52 }
 0x3fe   :  { %v4240_v40 = vpop.f32.mrf.mxu1 }
 0x3ff   :  { %2831 = vst.msk [vmem:[%s6388_s13 + $0x48] sm:$0xff] %vm2821_vm3, %v2623_v54 }
 0x400   :  { %v2627_v37 = vpop.f32.mrf.mxu1 }
 0x401   :  { %v2628_v1 = vadd.f32 %v6128_v56, %v2627_v37 }
 0x402   :  { %v4243_v19 = vpop.f32.mrf.mxu1 }
 0x403   :  { %2832 = vst.msk [vmem:[%s6388_s13 + $0x50] sm:$0xff] %vm2821_vm3, %v2628_v1 }
 0x404   :  { %v2632_v42 = vpop.f32.mrf.mxu1 }
 0x405   :  { %v2633_v58 = vadd.f32 %v6128_v56, %v2632_v42 }
 0x406   :  { %v4246_v60 = vpop.f32.mrf.mxu1 }
 0x407   :  { %2833 = vst.msk [vmem:[%s6388_s13 + $0x58] sm:$0xff] %vm2821_vm3, %v2633_v58 }
 0x408   :  { %v2637_v15 = vpop.f32.mrf.mxu1 }
 0x409   :  { %v2638_v55 = vadd.f32 %v6128_v56, %v2637_v15 }
 0x40a   :  { %v4249_v26 = vpop.f32.mrf.mxu1 }
 0x40b   :  { %2834 = vst.msk [vmem:[%s6388_s13 + $0x60] sm:$0xff] %vm2821_vm3, %v2638_v55 }
 0x40c   :  { %v2642_v17 = vpop.f32.mrf.mxu1 }
 0x40d   :  { %v2643_v31 = vadd.f32 %v6128_v56, %v2642_v17 }
 0x40e   :  { %v4252_v11 = vpop.f32.mrf.mxu1 }
 0x40f   :  { %2835 = vst.msk [vmem:[%s6388_s13 + $0x68] sm:$0xff] %vm2821_vm3, %v2643_v31 }
 0x410   :  { %v2647_v33 = vpop.f32.mrf.mxu1 }
 0x411   :  { %v2648_v61 = vadd.f32 %v6128_v56, %v2647_v33 }
 0x412   :  { %v4255_v5 = vpop.f32.mrf.mxu1 }
 0x413   :  { %2836 = vst.msk [vmem:[%s6388_s13 + $0x70] sm:$0xff] %vm2821_vm3, %v2648_v61 }
 0x414   :  { %v2652_v22 = vpop.f32.mrf.mxu1 }
 0x415   :  { %v2653_v8 = vadd.f32 %v6128_v56, %v2652_v22 }
 0x416   :  { %v4258_v20 = vpop.f32.mrf.mxu1 }
 0x417   :  { %2837 = vst.msk [vmem:[%s6388_s13 + $0x78] sm:$0xff] %vm2821_vm3, %v2653_v8 }
 0x418   :  { %v2657_v21 = vpop.f32.mrf.mxu1 }
 0x419   :  { %v2658_v44 = vadd.f32 %v6128_v56, %v2657_v21 }
 0x41a   :  { %v4261_v23 = vpop.f32.mrf.mxu1 }
 0x41b   :  { %2838 = vst.msk [vmem:[%s6388_s13 + $0x80] sm:$0xff] %vm2821_vm3, %v2658_v44 }
 0x41c   :  { %v2662_v48 = vpop.f32.mrf.mxu1 }
 0x41d   :  { %v2663_v46 = vadd.f32 %v6128_v56, %v2662_v48 }
 0x41e   :  { %v4264_v16 = vpop.f32.mrf.mxu1 }
 0x41f   :  { %2839 = vst.msk [vmem:[%s6388_s13 + $0x88] sm:$0xff] %vm2821_vm3, %v2663_v46 }
 0x420   :  { %v2667_v35 = vpop.f32.mrf.mxu1 }
 0x421   :  { %v2668_v47 = vadd.f32 %v6128_v56, %v2667_v35 }
 0x422   :  { %v4267_v4 = vpop.f32.mrf.mxu1 }
 0x423   :  { %2840 = vst.msk [vmem:[%s6388_s13 + $0x90] sm:$0xff] %vm2821_vm3, %v2668_v47 }
 0x424   :  { %v2672_v28 = vpop.f32.mrf.mxu1 }
 0x425   :  { %v2673_v30 = vadd.f32 %v6128_v56, %v2672_v28 }
 0x426   :  { %v4270_v50 = vpop.f32.mrf.mxu1 }
 0x427   :  { %2841 = vst.msk [vmem:[%s6388_s13 + $0x98] sm:$0xff] %vm2821_vm3, %v2673_v30 }
 0x428   :  { %v2677_v49 = vpop.f32.mrf.mxu1 }
 0x429   :  { %v2678_v41 = vadd.f32 %v6128_v56, %v2677_v49 }
 0x42a   :  { %v4273_v25 = vpop.f32.mrf.mxu1 }
 0x42b   :  { %2842 = vst.msk [vmem:[%s6388_s13 + $0xa0] sm:$0xff] %vm2821_vm3, %v2678_v41 }
 0x42c   :  { %v2682_v6 = vpop.f32.mrf.mxu1 }
 0x42d   :  { %v2683_v57 = vadd.f32 %v6128_v56, %v2682_v6 }
 0x42e   :  { %v4276_v62 = vpop.f32.mrf.mxu1 }
 0x42f   :  { %2843 = vst.msk [vmem:[%s6388_s13 + $0xa8] sm:$0xff] %vm2821_vm3, %v2683_v57 }
 0x430   :  { %v2687_v32 = vpop.f32.mrf.mxu1 }
 0x431   :  { %v2688_v53 = vadd.f32 %v6128_v56, %v2687_v32 }
 0x432   :  { %v4279_v34 = vpop.f32.mrf.mxu1 }
 0x433   :  { %2844 = vst.msk [vmem:[%s6388_s13 + $0xb0] sm:$0xff] %vm2821_vm3, %v2688_v53 }
 0x434   :  { %v2692_v0 = vpop.f32.mrf.mxu1 }
 0x435   :  { %v2693_v38 = vadd.f32 %v6128_v56, %v2692_v0 }
 0x436   :  { %v4282_v29 = vpop.f32.mrf.mxu1 }
 0x437   :  { %2845 = vst.msk [vmem:[%s6388_s13 + $0xb8] sm:$0xff] %vm2821_vm3, %v2693_v38 }
 0x438   :  { %v2697_v24 = vpop.f32.mrf.mxu1 }
 0x439   :  { %v2698_v3 = vadd.f32 %v6128_v56, %v2697_v24 }
 0x43a   :  { %v4285_v63 = vpop.f32.mrf.mxu1 }
 0x43b   :  { %2846 = vst.msk [vmem:[%s6388_s13 + $0xc0] sm:$0xff] %vm2821_vm3, %v2698_v3 }
 0x43c   :  { %v2702_v2 = vpop.f32.mrf.mxu1 }
 0x43d   :  { %v2703_v12 = vadd.f32 %v6128_v56, %v2702_v2 }
 0x43e   :  { %v4288_v39 = vpop.f32.mrf.mxu1 }
 0x43f   :  { %2847 = vst.msk [vmem:[%s6388_s13 + $0xc8] sm:$0xff] %vm2821_vm3, %v2703_v12 }
 0x440   :  { %v2707_v45 = vpop.f32.mrf.mxu1 }
 0x441   :  { %v2708_v43 = vadd.f32 %v6128_v56, %v2707_v45 }
 0x442   :  { %v4291_v13 = vpop.f32.mrf.mxu1 }
 0x443   :  { %2848 = vst.msk [vmem:[%s6388_s13 + $0xd0] sm:$0xff] %vm2821_vm3, %v2708_v43 }
 0x444   :  { %v2712_v59 = vpop.f32.mrf.mxu1 }
 0x445   :  { %v2713_v14 = vadd.f32 %v6128_v56, %v2712_v59 }
 0x446   :  { %v4294_v10 = vpop.f32.mrf.mxu1 }
 0x447   :  { %2849 = vst.msk [vmem:[%s6388_s13 + $0xd8] sm:$0xff] %vm2821_vm3, %v2713_v14 }
 0x448   :  { %v2717_v36 = vpop.f32.mrf.mxu1 }
 0x449   :  { %v2718_v9 = vadd.f32 %v6128_v56, %v2717_v36 }
 0x44a   :  { %v4297_v51 = vpop.f32.mrf.mxu1 }
 0x44b   :  { %2850 = vst.msk [vmem:[%s6388_s13 + $0xe0] sm:$0xff] %vm2821_vm3, %v2718_v9 }
 0x44c   :  { %v2722_v27 = vpop.f32.mrf.mxu1 }
 0x44d   :  { %v2723_v18 = vadd.f32 %v6128_v56, %v2722_v27 }
 0x44e   :  { %v4300_v7 = vpop.f32.mrf.mxu1 }
 0x44f   :  { %2851 = vst.msk [vmem:[%s6388_s13 + $0xe8] sm:$0xff] %vm2821_vm3, %v2723_v18 }
 0x450   :  { %v2727_v52 = vpop.f32.mrf.mxu1 }
 0x451   :  { %v2728_v54 = vadd.f32 %v6128_v56, %v2727_v52 }
 0x452   :  { %v4303_v40 = vpop.f32.mrf.mxu1 }
 0x453   :  { %2852 = vst.msk [vmem:[%s6388_s13 + $0xf0] sm:$0xff] %vm2821_vm3, %v2728_v54 }
 0x454   :  { %v2732_v37 = vpop.f32.mrf.mxu1 }
 0x455   :  { %v2733_v1 = vadd.f32 %v6128_v56, %v2732_v37 }
 0x456   :  { %v4306_v19 = vpop.f32.mrf.mxu1 }
 0x457   :  { %2853 = vst.msk [vmem:[%s6388_s13 + $0xf8] sm:$0xff] %vm2821_vm3, %v2733_v1 }
 0x458   :  { %v2737_v42 = vpop.f32.mrf.mxu1 }
 0x459   :  { %v2738_v58 = vadd.f32 %v6128_v56, %v2737_v42 }
 0x45a   :  { %v4309_v60 = vpop.f32.mrf.mxu1 }
 0x45b   :  { %2854 = vst.msk [vmem:[%s6388_s13 + $0x100] sm:$0xff] %vm2821_vm3, %v2738_v58 }
 0x45c   :  { %v2742_v15 = vpop.f32.mrf.mxu1 }
 0x45d   :  { %v2743_v55 = vadd.f32 %v6128_v56, %v2742_v15 }
 0x45e   :  { %v4312_v26 = vpop.f32.mrf.mxu1 }
 0x45f   :  { %2855 = vst.msk [vmem:[%s6388_s13 + $0x108] sm:$0xff] %vm2821_vm3, %v2743_v55 }
 0x460   :  { %v2747_v17 = vpop.f32.mrf.mxu1 }
 0x461   :  { %v2748_v31 = vadd.f32 %v6128_v56, %v2747_v17 }
 0x462   :  { %v4315_v11 = vpop.f32.mrf.mxu1 }
 0x463   :  { %2856 = vst.msk [vmem:[%s6388_s13 + $0x110] sm:$0xff] %vm2821_vm3, %v2748_v31 }
 0x464   :  { %v2752_v33 = vpop.f32.mrf.mxu1 }
 0x465   :  { %v2753_v61 = vadd.f32 %v6128_v56, %v2752_v33 }
 0x466   :  { %v4318_v5 = vpop.f32.mrf.mxu1 }
 0x467   :  { %2857 = vst.msk [vmem:[%s6388_s13 + $0x118] sm:$0xff] %vm2821_vm3, %v2753_v61 }
 0x468   :  { %v2757_v22 = vpop.f32.mrf.mxu1 }
 0x469   :  { %v2758_v8 = vadd.f32 %v6128_v56, %v2757_v22 }
 0x46a   :  { %v4321_v20 = vpop.f32.mrf.mxu1 }
 0x46b   :  { %2858 = vst.msk [vmem:[%s6388_s13 + $0x120] sm:$0xff] %vm2821_vm3, %v2758_v8 }
 0x46c   :  { %v2762_v21 = vpop.f32.mrf.mxu1 }
 0x46d   :  { %v2763_v44 = vadd.f32 %v6128_v56, %v2762_v21 }
 0x46e   :  { %v4324_v23 = vpop.f32.mrf.mxu1 }
 0x46f   :  { %2859 = vst.msk [vmem:[%s6388_s13 + $0x128] sm:$0xff] %vm2821_vm3, %v2763_v44 }
 0x470   :  { %v2767_v48 = vpop.f32.mrf.mxu1 }
 0x471   :  { %v2768_v46 = vadd.f32 %v6128_v56, %v2767_v48 }
 0x472   :  { %v4327_v16 = vpop.f32.mrf.mxu1 }
 0x473   :  { %2860 = vst.msk [vmem:[%s6388_s13 + $0x130] sm:$0xff] %vm2821_vm3, %v2768_v46 }
 0x474   :  { %v2772_v35 = vpop.f32.mrf.mxu1 }
 0x475   :  { %v2773_v47 = vadd.f32 %v6128_v56, %v2772_v35 }
 0x476   :  { %v4330_v4 = vpop.f32.mrf.mxu1 }
 0x477   :  { %2861 = vst.msk [vmem:[%s6388_s13 + $0x138] sm:$0xff] %vm2821_vm3, %v2773_v47 }
 0x478   :  { %v2777_v28 = vpop.f32.mrf.mxu1 }
 0x479   :  { %v2778_v30 = vadd.f32 %v6128_v56, %v2777_v28 }
 0x47a   :  { %v4333_v50 = vpop.f32.mrf.mxu1 }
 0x47b   :  { %2862 = vst.msk [vmem:[%s6388_s13 + $0x140] sm:$0xff] %vm2821_vm3, %v2778_v30 }
 0x47c   :  { %v2782_v49 = vpop.f32.mrf.mxu1 }
 0x47d   :  { %v2783_v41 = vadd.f32 %v6128_v56, %v2782_v49 }
 0x47e   :  { %v4336_v25 = vpop.f32.mrf.mxu1 }
 0x47f   :  { %2863 = vst.msk [vmem:[%s6388_s13 + $0x148] sm:$0xff] %vm2821_vm3, %v2783_v41 }
 0x480   :  { %v2787_v6 = vpop.f32.mrf.mxu1 }
 0x481   :  { %v2788_v57 = vadd.f32 %v6128_v56, %v2787_v6 }
 0x482   :  { %v4339_v62 = vpop.f32.mrf.mxu1 }
 0x483   :  { %2864 = vst.msk [vmem:[%s6388_s13 + $0x150] sm:$0xff] %vm2821_vm3, %v2788_v57 }
 0x484   :  { %v2792_v32 = vpop.f32.mrf.mxu1 }
 0x485   :  { %v2793_v53 = vadd.f32 %v6128_v56, %v2792_v32 }
 0x486   :  { %v4342_v34 = vpop.f32.mrf.mxu1 }
 0x487   :  { %2865 = vst.msk [vmem:[%s6388_s13 + $0x158] sm:$0xff] %vm2821_vm3, %v2793_v53 }
 0x488   :  { %v2797_v0 = vpop.f32.mrf.mxu1 }
 0x489   :  { %v2798_v38 = vadd.f32 %v6128_v56, %v2797_v0 }
 0x48a   :  { %v4345_v29 = vpop.f32.mrf.mxu1 }
 0x48b   :  { %2866 = vst.msk [vmem:[%s6388_s13 + $0x160] sm:$0xff] %vm2821_vm3, %v2798_v38 }
 0x48c   :  { %v2802_v24 = vpop.f32.mrf.mxu1 }
 0x48d   :  { %v2803_v3 = vadd.f32 %v6128_v56, %v2802_v24 }
 0x48e   :  { %v4348_v63 = vpop.f32.mrf.mxu1 }
 0x48f   :  { %2867 = vst.msk [vmem:[%s6388_s13 + $0x168] sm:$0xff] %vm2821_vm3, %v2803_v3 }
 0x490   :  { %v2807_v2 = vpop.f32.mrf.mxu1 }
 0x491   :  { %v2808_v12 = vadd.f32 %v6128_v56, %v2807_v2 }
 0x492   :  { %v4351_v39 = vpop.f32.mrf.mxu1 }
 0x493   :  { %2868 = vst.msk [vmem:[%s6388_s13 + $0x170] sm:$0xff] %vm2821_vm3, %v2808_v12 }
 0x494   :  { %v2812_v45 = vpop.f32.mrf.mxu1 }
 0x495   :  { %v2813_v43 = vadd.f32 %v6128_v56, %v2812_v45 }
 0x496   :  { %v4354_v13 = vpop.f32.mrf.mxu1 }
 0x497   :  { %2869 = vst.msk [vmem:[%s6388_s13 + $0x178] sm:$0xff] %vm2821_vm3, %v2813_v43 }
 0x498   :  { %v2817_v59 = vpop.f32.mrf.mxu1 }
 0x499   :  { %v2818_v14 = vadd.f32 %v6128_v56, %v2817_v59 }
 0x49a   :  { %v4357_v10 = vpop.f32.mrf.mxu1 }
 0x49b   :  { %2870 = vst.msk [vmem:[%s6388_s13 + $0x180] sm:$0xff] %vm2821_vm3, %v2818_v14 }

</bundles_post_ra>
